<compile_context>
chip_gen: v7x
topology: tpu7x:2x2x1
jax: 0.10.0
libtpu: 0.0.40
codegen_flags: <defaults>
</compile_context>

<pallas_src>
import jax
import jax.numpy as jnp
from jax.experimental import pallas as pl
from jax.experimental.pallas import tpu as pltpu

HID = 32          # hid_dim
N_HEADS = 4       # n_heads
HEAD_DIM = HID // N_HEADS
PF = 64           # pf_dim
LN_EPS = 1e-5
NEG_INF = -1e10
INV_SCALE = 1.0 / (float(HEAD_DIM) ** 0.5)   # MultiHeadAttentionLayer scale = sqrt(head_dim)

# Set to jnp.bfloat16 on v6e/v7x for ~2x MXU throughput (and ideally store
# activations/weights as bf16 in HBM too); kept f32 so the test matches the
# f32 reference to 1e-3.
MATMUL_DTYPE = jnp.float32


def _mm(a, b):
    return jnp.dot(a.astype(MATMUL_DTYPE), b.astype(MATMUL_DTYPE),
                   preferred_element_type=jnp.float32)


def _qkt(q, k):
    # (T, d) x (Tk, d) -> (T, Tk), contracting the last dim of both (no transpose).
    return jax.lax.dot_general(
        q.astype(MATMUL_DTYPE), k.astype(MATMUL_DTYPE),
        (((1,), (1,)), ((), ())), preferred_element_type=jnp.float32)


def _layer_norm(x, gamma, beta):
    mu = jnp.mean(x, axis=-1, keepdims=True)
    var = jnp.mean(jnp.square(x - mu), axis=-1, keepdims=True)
    return (x - mu) * jax.lax.rsqrt(var + LN_EPS) * gamma + beta


def decoder_layer_kernel(trg_ref, enc_ref, tbias_ref, sbias_ref, ln_ref,
                         sa_wqkv_ref, sa_bqkv_ref, sa_wo_ref, sa_bo_ref,
                         ea_wqkv_ref, ea_bqkv_ref, ea_wo_ref, ea_bo_ref,
                         w1_ref, b1_ref, w2_ref, b2_ref,
                         out_ref, attn_ref, ctx_ref):
    BLK, T, _ = tbias_ref.shape          # (BLK, T, T) additive self-attn mask bias
    S = sbias_ref.shape[2]               # (BLK, 1, S) additive cross-attn mask bias

    trg = trg_ref[...]                   # (BLK*T, H) flattened activations
    enc = enc_ref[...]                   # (BLK*S, H)
    tbias = tbias_ref[...]
    sbias = sbias_ref[...]
    ln = ln_ref[...]                     # (3, 2, H)

    def mha(q_flat, kv_flat, Tq, Tk, bias, Wqkv, bqkv, Wo, bo, self_attn, attn_out):
        # --- projections: fused QKV (one 3H-lane matmul when q == kv) ---
        if self_attn:
            qkv = _mm(q_flat, Wqkv) + bqkv                        # (BLK*T, 3H)
            q = qkv[:, :HID]
            k = qkv[:, HID:2 * HID]
            v = qkv[:, 2 * HID:]
        else:
            q = _mm(q_flat, Wqkv[:, :HID]) + bqkv[:, :HID]        # (BLK*Tq, H)
            kv = _mm(kv_flat, Wqkv[:, HID:]) + bqkv[:, HID:]      # (BLK*Tk, 2H)
            k = kv[:, :HID]
            v = kv[:, HID:]
        # --- reassociated output projection: vo_h = V_h @ Wo_h over the whole block ---
        vo = [_mm(v[:, h * HEAD_DIM:(h + 1) * HEAD_DIM],
                  Wo[h * HEAD_DIM:(h + 1) * HEAD_DIM, :]) for h in range(N_HEADS)]
        # --- per (batch, head) attention; results written straight into refs ---
        for bi in range(BLK):            # static loops: BLK (<= 8) and N_HEADS
            qb = q[bi * Tq:(bi + 1) * Tq, :]
            kb = k[bi * Tk:(bi + 1) * Tk, :]
            bias_b = bias[bi]            # (T, Tk) or (1, S); broadcast in the add
            acc = None
            for h in range(N_HEADS):
                sl = slice(h * HEAD_DIM, (h + 1) * HEAD_DIM)
                energy = _qkt(qb[:, sl], kb[:, sl]) * INV_SCALE + bias_b
                m = jnp.max(energy, axis=-1, keepdims=True)
                p = jnp.exp(energy - m)
                inv = pl.reciprocal(jnp.sum(p, axis=-1, keepdims=True), approx=False)
                attn = p * inv
                if attn_out is not None:
                    attn_out[bi * N_HEADS + h] = attn             # direct slice store
                ch = _mm(attn, vo[h][bi * Tk:(bi + 1) * Tk, :])   # (Tq, H)
                acc = ch if acc is None else acc + ch
            ctx_ref[bi * Tq:(bi + 1) * Tq, :] = acc + bo          # no concat

    sa_wqkv = sa_wqkv_ref[...]; sa_bqkv = sa_bqkv_ref[...]
    sa_wo = sa_wo_ref[...]; sa_bo = sa_bo_ref[...]
    ea_wqkv = ea_wqkv_ref[...]; ea_bqkv = ea_bqkv_ref[...]
    ea_wo = ea_wo_ref[...]; ea_bo = ea_bo_ref[...]

    # --- self attention + residual + LN (dropout == identity in eval) ---
    mha(trg, trg, T, T, tbias, sa_wqkv, sa_bqkv, sa_wo, sa_bo, True, None)
    t1 = _layer_norm(trg + ctx_ref[...], ln[0, 0:1], ln[0, 1:2])

    # --- encoder (cross) attention + residual + LN ---
    mha(t1, enc, T, S, sbias, ea_wqkv, ea_bqkv, ea_wo, ea_bo, False, attn_ref)
    t2 = _layer_norm(t1 + ctx_ref[...], ln[1, 0:1], ln[1, 1:2])

    # --- positionwise feedforward + residual + LN ---
    h1 = jnp.maximum(_mm(t2, w1_ref[...]) + b1_ref[...], 0.0)
    h2 = _mm(h1, w2_ref[...]) + b2_ref[...]
    out_ref[...] = _layer_norm(t2 + h2, ln[2, 0:1], ln[2, 1:2])


def _pick_blk(B, max_blk=8):
    """Largest blk <= max_blk dividing B with >= 4 grid steps (pipelining and v7x
    two-core sharding); fall back to >= 2 steps, then to B itself."""
    for min_steps in (4, 2):
        best = 0
        for blk in range(1, min(B, max_blk) + 1):
            if B % blk == 0 and B // blk >= min_steps:
                best = blk
        if best:
            return best
    return B


def transformer_decoder_layer(trg, enc_src, trg_mask, src_mask, p, blk=None):
    B, T, H = trg.shape
    S = enc_src.shape[1]
    blk = _pick_blk(B) if blk is None else blk
    assert B % blk == 0
    nb = B // blk

    # Compact additive float mask biases (wrapper-side; no per-head compare/select
    # inside the kernel, no T-fold pre-broadcast of the src bias).
    tbias = jnp.where(trg_mask[:, 0] == 0, NEG_INF, 0.0).astype(jnp.float32)   # (B, T, T)
    sbias = jnp.where(src_mask[:, 0] == 0, NEG_INF, 0.0).astype(jnp.float32)   # (B, 1, S)

    # Flatten batch into sublanes (layout plumbing outside the kernel).
    trg_flat = trg.reshape(B * T, H)
    enc_flat = enc_src.reshape(B * S, H)

    # Fused QKV weights/biases; separate output projection.
    def fuse(W, b):
        wqkv = jnp.concatenate([W[0], W[1], W[2]], axis=1)       # (H, 3H) = [Wq|Wk|Wv]
        bqkv = b[0:3].reshape(1, 3 * H)                          # (1, 3H)
        return wqkv, bqkv, W[3], b[3:4]
    sa_wqkv, sa_bqkv, sa_wo, sa_bo = fuse(p["saW"], p["sab"])
    ea_wqkv, ea_bqkv, ea_wo, ea_bo = fuse(p["eaW"], p["eab"])

    # Explicit VMEM budget from the chosen blk (double-buffered I/O + weights +
    # scratch + headroom), clamped so it fits every generation (v7x: 64 MiB phys).
    f32 = 4
    per_step_io = f32 * (blk * T * H + blk * S * H + blk * T * T + blk * S
                         + blk * T * H + blk * N_HEADS * T * S)
    weight_bytes = f32 * (3 * 2 * H + 2 * (H * 3 * H + 3 * H + H * H + H)
                          + H * PF + PF + PF * H + H)
    scratch_bytes = f32 * blk * T * H
    vmem_limit = int(min(64 << 20,
                         max(16 << 20,
                             2 * per_step_io + weight_bytes + scratch_bytes + (8 << 20))))

    out_shapes = (
        jax.ShapeDtypeStruct((B * T, H), jnp.float32),
        jax.ShapeDtypeStruct((B * N_HEADS, T, S), jnp.float32),
    )
    grid_spec = pltpu.PrefetchScalarGridSpec(
        num_scalar_prefetch=0,
        grid=(nb,),
        in_specs=[
            pl.BlockSpec((blk * T, H), lambda b: (b, 0)),
            pl.BlockSpec((blk * S, H), lambda b: (b, 0)),
            pl.BlockSpec((blk, T, T), lambda b: (b, 0, 0)),
            pl.BlockSpec((blk, 1, S), lambda b: (b, 0, 0)),
            pl.BlockSpec((3, 2, H), lambda b: (0, 0, 0)),
            pl.BlockSpec((H, 3 * H), lambda b: (0, 0)),
            pl.BlockSpec((1, 3 * H), lambda b: (0, 0)),
            pl.BlockSpec((H, H), lambda b: (0, 0)),
            pl.BlockSpec((1, H), lambda b: (0, 0)),
            pl.BlockSpec((H, 3 * H), lambda b: (0, 0)),
            pl.BlockSpec((1, 3 * H), lambda b: (0, 0)),
            pl.BlockSpec((H, H), lambda b: (0, 0)),
            pl.BlockSpec((1, H), lambda b: (0, 0)),
            pl.BlockSpec((H, PF), lambda b: (0, 0)),
            pl.BlockSpec((1, PF), lambda b: (0, 0)),
            pl.BlockSpec((PF, H), lambda b: (0, 0)),
            pl.BlockSpec((1, H), lambda b: (0, 0)),
        ],
        out_specs=[
            pl.BlockSpec((blk * T, H), lambda b: (b, 0)),
            pl.BlockSpec((blk * N_HEADS, T, S), lambda b: (b, 0, 0)),
        ],
        scratch_shapes=[pltpu.VMEM((blk * T, H), jnp.float32)],
    )
    out_flat, attn_flat = pl.pallas_call(
        decoder_layer_kernel,
        out_shape=out_shapes,
        grid_spec=grid_spec,
        compiler_params=pltpu.CompilerParams(
            dimension_semantics=("parallel",),
            vmem_limit_bytes=vmem_limit),
    )(trg_flat, enc_flat, tbias, sbias,
      p["ln"], sa_wqkv, sa_bqkv, sa_wo, sa_bo, ea_wqkv, ea_bqkv, ea_wo, ea_bo,
      p["w1"], p["b1"], p["w2"], p["b2"])
    return out_flat.reshape(B, T, H), attn_flat.reshape(B, N_HEADS, T, S)


def init_params(key):
    ks = jax.random.split(key, 8)

    def lin(k, fan_in, shape):
        bound = 1.0 / (fan_in ** 0.5)
        return jax.random.uniform(k, shape, jnp.float32, -bound, bound)

    p = {
        "saW": lin(ks[0], HID, (4, HID, HID)),
        "sab": lin(ks[1], HID, (4, HID)),
        "eaW": lin(ks[2], HID, (4, HID, HID)),
        "eab": lin(ks[3], HID, (4, HID)),
        "w1": lin(ks[4], HID, (HID, PF)),
        "b1": lin(ks[5], HID, (1, PF)),
        "w2": lin(ks[6], PF, (PF, HID)),
        "b2": lin(ks[7], PF, (1, HID)),
        # LayerNorm default init: gamma=1, beta=0; stacked [self_attn, enc_attn, ff]
        "ln": jnp.stack([jnp.ones((3, HID), jnp.float32),
                         jnp.zeros((3, HID), jnp.float32)], axis=1),  # (3, 2, H)
    }
    return p


def reference(trg, enc_src, trg_mask, src_mask, p):
    """Plain-JAX reference mirroring the PyTorch forward (eval mode)."""
    def ln(x, g, b):
        mu = x.mean(-1, keepdims=True)
        var = ((x - mu) ** 2).mean(-1, keepdims=True)
        return (x - mu) / jnp.sqrt(var + LN_EPS) * g + b

    def mha(q_in, kv_in, mask, W, b):
        B, Tq, H = q_in.shape
        Tk = kv_in.shape[1]
        q = (q_in @ W[0] + b[0]).reshape(B, Tq, N_HEADS, HEAD_DIM).transpose(0, 2, 1, 3)
        k = (kv_in @ W[1] + b[1]).reshape(B, Tk, N_HEADS, HEAD_DIM).transpose(0, 2, 1, 3)
        v = (kv_in @ W[2] + b[2]).reshape(B, Tk, N_HEADS, HEAD_DIM).transpose(0, 2, 1, 3)
        energy = q @ k.transpose(0, 1, 3, 2) / (float(HEAD_DIM) ** 0.5)
        energy = jnp.where(mask == 0, NEG_INF, energy)
        attn = jax.nn.softmax(energy, axis=-1)
        x = (attn @ v).transpose(0, 2, 1, 3).reshape(B, Tq, H)
        return x @ W[3] + b[3], attn

    x, _ = mha(trg, trg, trg_mask, p["saW"], p["sab"])
    t1 = ln(trg + x, p["ln"][0, 0], p["ln"][0, 1])
    x, attn = mha(t1, enc_src, src_mask, p["eaW"], p["eab"])
    t2 = ln(t1 + x, p["ln"][1, 0], p["ln"][1, 1])
    h = jnp.maximum(t2 @ p["w1"] + p["b1"], 0.0) @ p["w2"] + p["b2"]
    t3 = ln(t2 + h, p["ln"][2, 0], p["ln"][2, 1])
    return t3, attn


if __name__ == "__main__":
    key = jax.random.PRNGKey(0)
    kt, ke, kp = jax.random.split(key, 3)

    B, T, S = 8, 8, 12            # B=8 -> blk=2, 4 grid steps (even: v7x two cores)
    trg = jax.random.normal(kt, (B, T, HID), jnp.float32)
    enc_src = jax.random.normal(ke, (B, S, HID), jnp.float32)

    # causal mask for self attention, padding mask for cross attention
    trg_mask = (jnp.tril(jnp.ones((T, T), jnp.int32))[None, None]
                * jnp.ones((B, 1, 1, 1), jnp.int32))                      # (B,1,T,T)
    src_lens = jnp.array([S, S - 3, S - 1, S - 2, S, S - 4, S - 5, S], jnp.int32)
    src_mask = (jnp.arange(S)[None, :] < src_lens[:, None]
                ).astype(jnp.int32)[:, None, None, :]                     # (B,1,1,S)

    params = init_params(kp)

    out, attn = transformer_decoder_layer(trg, enc_src, trg_mask, src_mask, params)
    jax.block_until_ready((out, attn))

    ref_out, ref_attn = reference(trg, enc_src, trg_mask, src_mask, params)
    assert out.shape == (B, T, HID) and attn.shape == (B, N_HEADS, T, S)
    assert float(jnp.max(jnp.abs(out - ref_out))) < 1e-3
    assert float(jnp.max(jnp.abs(attn - ref_attn))) < 1e-3

    print("KERNEL_OK")
</pallas_src>

<mosaic_0001>
module attributes {stable_mosaic.version = 11 : i64} {
  func.func @decoder_layer_kernel(%arg0: i32, %arg1: memref<16x32xf32, #tpu.memory_space<vmem>>, %arg2: memref<24x32xf32, #tpu.memory_space<vmem>>, %arg3: memref<2x8x8xf32, #tpu.memory_space<vmem>>, %arg4: memref<2x1x12xf32, #tpu.memory_space<vmem>>, %arg5: memref<3x2x32xf32, #tpu.memory_space<vmem>>, %arg6: memref<32x96xf32, #tpu.memory_space<vmem>>, %arg7: memref<1x96xf32, #tpu.memory_space<vmem>>, %arg8: memref<32x32xf32, #tpu.memory_space<vmem>>, %arg9: memref<1x32xf32, #tpu.memory_space<vmem>>, %arg10: memref<32x96xf32, #tpu.memory_space<vmem>>, %arg11: memref<1x96xf32, #tpu.memory_space<vmem>>, %arg12: memref<32x32xf32, #tpu.memory_space<vmem>>, %arg13: memref<1x32xf32, #tpu.memory_space<vmem>>, %arg14: memref<32x64xf32, #tpu.memory_space<vmem>>, %arg15: memref<1x64xf32, #tpu.memory_space<vmem>>, %arg16: memref<64x32xf32, #tpu.memory_space<vmem>>, %arg17: memref<1x32xf32, #tpu.memory_space<vmem>>, %arg18: memref<16x32xf32, #tpu.memory_space<vmem>>, %arg19: memref<8x8x12xf32, #tpu.memory_space<vmem>>, %arg20: memref<16x32xf32, #tpu.memory_space<vmem>>) attributes {dimension_semantics = [#tpu.dimension_semantics<parallel>], iteration_bounds = array<i64: 4>, scalar_prefetch = 0 : i64, scratch_operands = 1 : i64, tpu.core_type = #tpu.core_type<tc>, window_params = [{transform_indices = @transform_0, window_bounds = array<i64: 16, 32>}, {transform_indices = @transform_1, window_bounds = array<i64: 24, 32>}, {transform_indices = @transform_2, window_bounds = array<i64: 2, 8, 8>}, {transform_indices = @transform_3, window_bounds = array<i64: 2, 1, 12>}, {pipeline_mode = #tpu.pipeline_mode<synchronous>, transform_indices = @transform_4, window_bounds = array<i64: 3, 2, 32>}, {pipeline_mode = #tpu.pipeline_mode<synchronous>, transform_indices = @transform_5, window_bounds = array<i64: 32, 96>}, {pipeline_mode = #tpu.pipeline_mode<synchronous>, transform_indices = @transform_6, window_bounds = array<i64: 1, 96>}, {pipeline_mode = #tpu.pipeline_mode<synchronous>, transform_indices = @transform_7, window_bounds = array<i64: 32, 32>}, {pipeline_mode = #tpu.pipeline_mode<synchronous>, transform_indices = @transform_8, window_bounds = array<i64: 1, 32>}, {pipeline_mode = #tpu.pipeline_mode<synchronous>, transform_indices = @transform_9, window_bounds = array<i64: 32, 96>}, {pipeline_mode = #tpu.pipeline_mode<synchronous>, transform_indices = @transform_10, window_bounds = array<i64: 1, 96>}, {pipeline_mode = #tpu.pipeline_mode<synchronous>, transform_indices = @transform_11, window_bounds = array<i64: 32, 32>}, {pipeline_mode = #tpu.pipeline_mode<synchronous>, transform_indices = @transform_12, window_bounds = array<i64: 1, 32>}, {pipeline_mode = #tpu.pipeline_mode<synchronous>, transform_indices = @transform_13, window_bounds = array<i64: 32, 64>}, {pipeline_mode = #tpu.pipeline_mode<synchronous>, transform_indices = @transform_14, window_bounds = array<i64: 1, 64>}, {pipeline_mode = #tpu.pipeline_mode<synchronous>, transform_indices = @transform_15, window_bounds = array<i64: 64, 32>}, {pipeline_mode = #tpu.pipeline_mode<synchronous>, transform_indices = @transform_16, window_bounds = array<i64: 1, 32>}, {transform_indices = @transform_17, window_bounds = array<i64: 16, 32>}, {transform_indices = @transform_18, window_bounds = array<i64: 8, 8, 12>}]} {
    %c0 = arith.constant 0 : index
    %c0_0 = arith.constant 0 : index
    %0 = vector.load %arg1[%c0, %c0_0] : memref<16x32xf32, #tpu.memory_space<vmem>>, vector<16x32xf32>
    %c0_1 = arith.constant 0 : index
    %c0_2 = arith.constant 0 : index
    %1 = vector.load %arg2[%c0_1, %c0_2] : memref<24x32xf32, #tpu.memory_space<vmem>>, vector<24x32xf32>
    %c0_3 = arith.constant 0 : index
    %c0_4 = arith.constant 0 : index
    %c0_5 = arith.constant 0 : index
    %2 = vector.load %arg3[%c0_3, %c0_4, %c0_5] : memref<2x8x8xf32, #tpu.memory_space<vmem>>, vector<2x8x8xf32>
    %c0_6 = arith.constant 0 : index
    %c0_7 = arith.constant 0 : index
    %c0_8 = arith.constant 0 : index
    %3 = vector.load %arg4[%c0_6, %c0_7, %c0_8] : memref<2x1x12xf32, #tpu.memory_space<vmem>>, vector<2x1x12xf32>
    %c0_9 = arith.constant 0 : index
    %c0_10 = arith.constant 0 : index
    %c0_11 = arith.constant 0 : index
    %4 = vector.load %arg5[%c0_9, %c0_10, %c0_11] : memref<3x2x32xf32, #tpu.memory_space<vmem>>, vector<3x2x32xf32>
    %c0_12 = arith.constant 0 : index
    %c0_13 = arith.constant 0 : index
    %5 = vector.load %arg6[%c0_12, %c0_13] : memref<32x96xf32, #tpu.memory_space<vmem>>, vector<32x96xf32>
    %c0_14 = arith.constant 0 : index
    %c0_15 = arith.constant 0 : index
    %6 = vector.load %arg7[%c0_14, %c0_15] : memref<1x96xf32, #tpu.memory_space<vmem>>, vector<1x96xf32>
    %c0_16 = arith.constant 0 : index
    %c0_17 = arith.constant 0 : index
    %7 = vector.load %arg8[%c0_16, %c0_17] : memref<32x32xf32, #tpu.memory_space<vmem>>, vector<32x32xf32>
    %c0_18 = arith.constant 0 : index
    %c0_19 = arith.constant 0 : index
    %8 = vector.load %arg9[%c0_18, %c0_19] : memref<1x32xf32, #tpu.memory_space<vmem>>, vector<1x32xf32>
    %c0_20 = arith.constant 0 : index
    %c0_21 = arith.constant 0 : index
    %9 = vector.load %arg10[%c0_20, %c0_21] : memref<32x96xf32, #tpu.memory_space<vmem>>, vector<32x96xf32>
    %c0_22 = arith.constant 0 : index
    %c0_23 = arith.constant 0 : index
    %10 = vector.load %arg11[%c0_22, %c0_23] : memref<1x96xf32, #tpu.memory_space<vmem>>, vector<1x96xf32>
    %c0_24 = arith.constant 0 : index
    %c0_25 = arith.constant 0 : index
    %11 = vector.load %arg12[%c0_24, %c0_25] : memref<32x32xf32, #tpu.memory_space<vmem>>, vector<32x32xf32>
    %c0_26 = arith.constant 0 : index
    %c0_27 = arith.constant 0 : index
    %12 = vector.load %arg13[%c0_26, %c0_27] : memref<1x32xf32, #tpu.memory_space<vmem>>, vector<1x32xf32>
    %cst = arith.constant dense<0.000000e+00> : vector<16x96xf32>
    %13 = tpu.matmul %0, %5, %cst {dimension_numbers = #tpu.dot_dimension_numbers<[1], [0], [0], [1], [0, 0, 1, 1], [], []>} : vector<16x32xf32>, vector<32x96xf32>, vector<16x96xf32> -> vector<16x96xf32>
    %14 = vector.broadcast %6 : vector<1x96xf32> to vector<16x96xf32>
    %15 = arith.addf %13, %14 : vector<16x96xf32>
    %16 = vector.extract_strided_slice %15 {offsets = [0, 0], sizes = [16, 32], strides = [1, 1]} : vector<16x96xf32> to vector<16x32xf32>
    %17 = vector.extract_strided_slice %15 {offsets = [0, 32], sizes = [16, 32], strides = [1, 1]} : vector<16x96xf32> to vector<16x32xf32>
    %18 = vector.extract_strided_slice %15 {offsets = [0, 64], sizes = [16, 32], strides = [1, 1]} : vector<16x96xf32> to vector<16x32xf32>
    %19 = vector.extract_strided_slice %18 {offsets = [0, 0], sizes = [16, 8], strides = [1, 1]} : vector<16x32xf32> to vector<16x8xf32>
    %20 = vector.extract_strided_slice %7 {offsets = [0, 0], sizes = [8, 32], strides = [1, 1]} : vector<32x32xf32> to vector<8x32xf32>
    %cst_28 = arith.constant dense<0.000000e+00> : vector<16x32xf32>
    %21 = tpu.matmul %19, %20, %cst_28 {dimension_numbers = #tpu.dot_dimension_numbers<[1], [0], [0], [1], [0, 0, 1, 1], [], []>} : vector<16x8xf32>, vector<8x32xf32>, vector<16x32xf32> -> vector<16x32xf32>
    %22 = vector.extract_strided_slice %18 {offsets = [0, 8], sizes = [16, 8], strides = [1, 1]} : vector<16x32xf32> to vector<16x8xf32>
    %23 = vector.extract_strided_slice %7 {offsets = [8, 0], sizes = [8, 32], strides = [1, 1]} : vector<32x32xf32> to vector<8x32xf32>
    %cst_29 = arith.constant dense<0.000000e+00> : vector<16x32xf32>
    %24 = tpu.matmul %22, %23, %cst_29 {dimension_numbers = #tpu.dot_dimension_numbers<[1], [0], [0], [1], [0, 0, 1, 1], [], []>} : vector<16x8xf32>, vector<8x32xf32>, vector<16x32xf32> -> vector<16x32xf32>
    %25 = vector.extract_strided_slice %18 {offsets = [0, 16], sizes = [16, 8], strides = [1, 1]} : vector<16x32xf32> to vector<16x8xf32>
    %26 = vector.extract_strided_slice %7 {offsets = [16, 0], sizes = [8, 32], strides = [1, 1]} : vector<32x32xf32> to vector<8x32xf32>
    %cst_30 = arith.constant dense<0.000000e+00> : vector<16x32xf32>
    %27 = tpu.matmul %25, %26, %cst_30 {dimension_numbers = #tpu.dot_dimension_numbers<[1], [0], [0], [1], [0, 0, 1, 1], [], []>} : vector<16x8xf32>, vector<8x32xf32>, vector<16x32xf32> -> vector<16x32xf32>
    %28 = vector.extract_strided_slice %18 {offsets = [0, 24], sizes = [16, 8], strides = [1, 1]} : vector<16x32xf32> to vector<16x8xf32>
    %29 = vector.extract_strided_slice %7 {offsets = [24, 0], sizes = [8, 32], strides = [1, 1]} : vector<32x32xf32> to vector<8x32xf32>
    %cst_31 = arith.constant dense<0.000000e+00> : vector<16x32xf32>
    %30 = tpu.matmul %28, %29, %cst_31 {dimension_numbers = #tpu.dot_dimension_numbers<[1], [0], [0], [1], [0, 0, 1, 1], [], []>} : vector<16x8xf32>, vector<8x32xf32>, vector<16x32xf32> -> vector<16x32xf32>
    %31 = vector.extract_strided_slice %16 {offsets = [0, 0], sizes = [8, 32], strides = [1, 1]} : vector<16x32xf32> to vector<8x32xf32>
    %32 = vector.extract_strided_slice %17 {offsets = [0, 0], sizes = [8, 32], strides = [1, 1]} : vector<16x32xf32> to vector<8x32xf32>
    %33 = vector.extract_strided_slice %2 {offsets = [0, 0, 0], sizes = [1, 8, 8], strides = [1, 1, 1]} : vector<2x8x8xf32> to vector<1x8x8xf32>
    %34 = vector.shape_cast %33 : vector<1x8x8xf32> to vector<8x8xf32>
    %35 = vector.extract_strided_slice %31 {offsets = [0, 0], sizes = [8, 8], strides = [1, 1]} : vector<8x32xf32> to vector<8x8xf32>
    %36 = vector.extract_strided_slice %32 {offsets = [0, 0], sizes = [8, 8], strides = [1, 1]} : vector<8x32xf32> to vector<8x8xf32>
    %cst_32 = arith.constant dense<0.000000e+00> : vector<8x8xf32>
    %37 = tpu.matmul %35, %36, %cst_32 {dimension_numbers = #tpu.dot_dimension_numbers<[1], [1], [0], [0], [0, 0, 1, 0], [], []>} : vector<8x8xf32>, vector<8x8xf32>, vector<8x8xf32> -> vector<8x8xf32>
    %cst_33 = arith.constant 0.353553385 : f32
    %38 = vector.broadcast %cst_33 : f32 to vector<8x8xf32>
    %39 = arith.mulf %37, %38 : vector<8x8xf32>
    %40 = arith.addf %39, %34 : vector<8x8xf32>
    %cst_34 = arith.constant dense<0xFF800000> : vector<8xf32>
    %41 = vector.multi_reduction <maximumf>, %40, %cst_34 [1] : vector<8x8xf32> to vector<8xf32>
    %42 = vector.shape_cast %41 : vector<8xf32> to vector<8x1xf32>
    %43 = vector.broadcast %42 : vector<8x1xf32> to vector<8x8xf32>
    %44 = arith.subf %40, %43 : vector<8x8xf32>
    %45 = math.exp %44 : vector<8x8xf32>
    %cst_35 = arith.constant dense<0.000000e+00> : vector<8xf32>
    %46 = vector.multi_reduction <add>, %45, %cst_35 [1] : vector<8x8xf32> to vector<8xf32>
    %47 = vector.shape_cast %46 : vector<8xf32> to vector<8x1xf32>
    %48 = tpu.reciprocal %47 : vector<8x1xf32> -> vector<8x1xf32>
    %49 = vector.broadcast %48 : vector<8x1xf32> to vector<8x8xf32>
    %50 = arith.mulf %45, %49 : vector<8x8xf32>
    %51 = vector.extract_strided_slice %21 {offsets = [0, 0], sizes = [8, 32], strides = [1, 1]} : vector<16x32xf32> to vector<8x32xf32>
    %cst_36 = arith.constant dense<0.000000e+00> : vector<8x32xf32>
    %52 = tpu.matmul %50, %51, %cst_36 {dimension_numbers = #tpu.dot_dimension_numbers<[1], [0], [0], [1], [0, 0, 1, 1], [], []>} : vector<8x8xf32>, vector<8x32xf32>, vector<8x32xf32> -> vector<8x32xf32>
    %53 = vector.extract_strided_slice %31 {offsets = [0, 8], sizes = [8, 8], strides = [1, 1]} : vector<8x32xf32> to vector<8x8xf32>
    %54 = vector.extract_strided_slice %32 {offsets = [0, 8], sizes = [8, 8], strides = [1, 1]} : vector<8x32xf32> to vector<8x8xf32>
    %cst_37 = arith.constant dense<0.000000e+00> : vector<8x8xf32>
    %55 = tpu.matmul %53, %54, %cst_37 {dimension_numbers = #tpu.dot_dimension_numbers<[1], [1], [0], [0], [0, 0, 1, 0], [], []>} : vector<8x8xf32>, vector<8x8xf32>, vector<8x8xf32> -> vector<8x8xf32>
    %cst_38 = arith.constant 0.353553385 : f32
    %56 = vector.broadcast %cst_38 : f32 to vector<8x8xf32>
    %57 = arith.mulf %55, %56 : vector<8x8xf32>
    %58 = arith.addf %57, %34 : vector<8x8xf32>
    %cst_39 = arith.constant dense<0xFF800000> : vector<8xf32>
    %59 = vector.multi_reduction <maximumf>, %58, %cst_39 [1] : vector<8x8xf32> to vector<8xf32>
    %60 = vector.shape_cast %59 : vector<8xf32> to vector<8x1xf32>
    %61 = vector.broadcast %60 : vector<8x1xf32> to vector<8x8xf32>
    %62 = arith.subf %58, %61 : vector<8x8xf32>
    %63 = math.exp %62 : vector<8x8xf32>
    %cst_40 = arith.constant dense<0.000000e+00> : vector<8xf32>
    %64 = vector.multi_reduction <add>, %63, %cst_40 [1] : vector<8x8xf32> to vector<8xf32>
    %65 = vector.shape_cast %64 : vector<8xf32> to vector<8x1xf32>
    %66 = tpu.reciprocal %65 : vector<8x1xf32> -> vector<8x1xf32>
    %67 = vector.broadcast %66 : vector<8x1xf32> to vector<8x8xf32>
    %68 = arith.mulf %63, %67 : vector<8x8xf32>
    %69 = vector.extract_strided_slice %24 {offsets = [0, 0], sizes = [8, 32], strides = [1, 1]} : vector<16x32xf32> to vector<8x32xf32>
    %cst_41 = arith.constant dense<0.000000e+00> : vector<8x32xf32>
    %70 = tpu.matmul %68, %69, %cst_41 {dimension_numbers = #tpu.dot_dimension_numbers<[1], [0], [0], [1], [0, 0, 1, 1], [], []>} : vector<8x8xf32>, vector<8x32xf32>, vector<8x32xf32> -> vector<8x32xf32>
    %71 = arith.addf %52, %70 : vector<8x32xf32>
    %72 = vector.extract_strided_slice %31 {offsets = [0, 16], sizes = [8, 8], strides = [1, 1]} : vector<8x32xf32> to vector<8x8xf32>
    %73 = vector.extract_strided_slice %32 {offsets = [0, 16], sizes = [8, 8], strides = [1, 1]} : vector<8x32xf32> to vector<8x8xf32>
    %cst_42 = arith.constant dense<0.000000e+00> : vector<8x8xf32>
    %74 = tpu.matmul %72, %73, %cst_42 {dimension_numbers = #tpu.dot_dimension_numbers<[1], [1], [0], [0], [0, 0, 1, 0], [], []>} : vector<8x8xf32>, vector<8x8xf32>, vector<8x8xf32> -> vector<8x8xf32>
    %cst_43 = arith.constant 0.353553385 : f32
    %75 = vector.broadcast %cst_43 : f32 to vector<8x8xf32>
    %76 = arith.mulf %74, %75 : vector<8x8xf32>
    %77 = arith.addf %76, %34 : vector<8x8xf32>
    %cst_44 = arith.constant dense<0xFF800000> : vector<8xf32>
    %78 = vector.multi_reduction <maximumf>, %77, %cst_44 [1] : vector<8x8xf32> to vector<8xf32>
    %79 = vector.shape_cast %78 : vector<8xf32> to vector<8x1xf32>
    %80 = vector.broadcast %79 : vector<8x1xf32> to vector<8x8xf32>
    %81 = arith.subf %77, %80 : vector<8x8xf32>
    %82 = math.exp %81 : vector<8x8xf32>
    %cst_45 = arith.constant dense<0.000000e+00> : vector<8xf32>
    %83 = vector.multi_reduction <add>, %82, %cst_45 [1] : vector<8x8xf32> to vector<8xf32>
    %84 = vector.shape_cast %83 : vector<8xf32> to vector<8x1xf32>
    %85 = tpu.reciprocal %84 : vector<8x1xf32> -> vector<8x1xf32>
    %86 = vector.broadcast %85 : vector<8x1xf32> to vector<8x8xf32>
    %87 = arith.mulf %82, %86 : vector<8x8xf32>
    %88 = vector.extract_strided_slice %27 {offsets = [0, 0], sizes = [8, 32], strides = [1, 1]} : vector<16x32xf32> to vector<8x32xf32>
    %cst_46 = arith.constant dense<0.000000e+00> : vector<8x32xf32>
    %89 = tpu.matmul %87, %88, %cst_46 {dimension_numbers = #tpu.dot_dimension_numbers<[1], [0], [0], [1], [0, 0, 1, 1], [], []>} : vector<8x8xf32>, vector<8x32xf32>, vector<8x32xf32> -> vector<8x32xf32>
    %90 = arith.addf %71, %89 : vector<8x32xf32>
    %91 = vector.extract_strided_slice %31 {offsets = [0, 24], sizes = [8, 8], strides = [1, 1]} : vector<8x32xf32> to vector<8x8xf32>
    %92 = vector.extract_strided_slice %32 {offsets = [0, 24], sizes = [8, 8], strides = [1, 1]} : vector<8x32xf32> to vector<8x8xf32>
    %cst_47 = arith.constant dense<0.000000e+00> : vector<8x8xf32>
    %93 = tpu.matmul %91, %92, %cst_47 {dimension_numbers = #tpu.dot_dimension_numbers<[1], [1], [0], [0], [0, 0, 1, 0], [], []>} : vector<8x8xf32>, vector<8x8xf32>, vector<8x8xf32> -> vector<8x8xf32>
    %cst_48 = arith.constant 0.353553385 : f32
    %94 = vector.broadcast %cst_48 : f32 to vector<8x8xf32>
    %95 = arith.mulf %93, %94 : vector<8x8xf32>
    %96 = arith.addf %95, %34 : vector<8x8xf32>
    %cst_49 = arith.constant dense<0xFF800000> : vector<8xf32>
    %97 = vector.multi_reduction <maximumf>, %96, %cst_49 [1] : vector<8x8xf32> to vector<8xf32>
    %98 = vector.shape_cast %97 : vector<8xf32> to vector<8x1xf32>
    %99 = vector.broadcast %98 : vector<8x1xf32> to vector<8x8xf32>
    %100 = arith.subf %96, %99 : vector<8x8xf32>
    %101 = math.exp %100 : vector<8x8xf32>
    %cst_50 = arith.constant dense<0.000000e+00> : vector<8xf32>
    %102 = vector.multi_reduction <add>, %101, %cst_50 [1] : vector<8x8xf32> to vector<8xf32>
    %103 = vector.shape_cast %102 : vector<8xf32> to vector<8x1xf32>
    %104 = tpu.reciprocal %103 : vector<8x1xf32> -> vector<8x1xf32>
    %105 = vector.broadcast %104 : vector<8x1xf32> to vector<8x8xf32>
    %106 = arith.mulf %101, %105 : vector<8x8xf32>
    %107 = vector.extract_strided_slice %30 {offsets = [0, 0], sizes = [8, 32], strides = [1, 1]} : vector<16x32xf32> to vector<8x32xf32>
    %cst_51 = arith.constant dense<0.000000e+00> : vector<8x32xf32>
    %108 = tpu.matmul %106, %107, %cst_51 {dimension_numbers = #tpu.dot_dimension_numbers<[1], [0], [0], [1], [0, 0, 1, 1], [], []>} : vector<8x8xf32>, vector<8x32xf32>, vector<8x32xf32> -> vector<8x32xf32>
    %109 = arith.addf %90, %108 : vector<8x32xf32>
    %110 = vector.broadcast %8 : vector<1x32xf32> to vector<8x32xf32>
    %111 = arith.addf %109, %110 : vector<8x32xf32>
    %c0_52 = arith.constant 0 : index
    %c0_53 = arith.constant 0 : index
    %112 = vector.load %arg20[%c0_52, %c0_53] : memref<16x32xf32, #tpu.memory_space<vmem>>, vector<8x32xf32>
    tpu.vector_store %arg20[%c0_52, %c0_53], %111 {strides = array<i32>} : memref<16x32xf32, #tpu.memory_space<vmem>>, vector<8x32xf32>,
    %113 = vector.extract_strided_slice %16 {offsets = [8, 0], sizes = [8, 32], strides = [1, 1]} : vector<16x32xf32> to vector<8x32xf32>
    %114 = vector.extract_strided_slice %17 {offsets = [8, 0], sizes = [8, 32], strides = [1, 1]} : vector<16x32xf32> to vector<8x32xf32>
    %115 = vector.extract_strided_slice %2 {offsets = [1, 0, 0], sizes = [1, 8, 8], strides = [1, 1, 1]} : vector<2x8x8xf32> to vector<1x8x8xf32>
    %116 = vector.shape_cast %115 : vector<1x8x8xf32> to vector<8x8xf32>
    %117 = vector.extract_strided_slice %113 {offsets = [0, 0], sizes = [8, 8], strides = [1, 1]} : vector<8x32xf32> to vector<8x8xf32>
    %118 = vector.extract_strided_slice %114 {offsets = [0, 0], sizes = [8, 8], strides = [1, 1]} : vector<8x32xf32> to vector<8x8xf32>
    %cst_54 = arith.constant dense<0.000000e+00> : vector<8x8xf32>
    %119 = tpu.matmul %117, %118, %cst_54 {dimension_numbers = #tpu.dot_dimension_numbers<[1], [1], [0], [0], [0, 0, 1, 0], [], []>} : vector<8x8xf32>, vector<8x8xf32>, vector<8x8xf32> -> vector<8x8xf32>
    %cst_55 = arith.constant 0.353553385 : f32
    %120 = vector.broadcast %cst_55 : f32 to vector<8x8xf32>
    %121 = arith.mulf %119, %120 : vector<8x8xf32>
    %122 = arith.addf %121, %116 : vector<8x8xf32>
    %cst_56 = arith.constant dense<0xFF800000> : vector<8xf32>
    %123 = vector.multi_reduction <maximumf>, %122, %cst_56 [1] : vector<8x8xf32> to vector<8xf32>
    %124 = vector.shape_cast %123 : vector<8xf32> to vector<8x1xf32>
    %125 = vector.broadcast %124 : vector<8x1xf32> to vector<8x8xf32>
    %126 = arith.subf %122, %125 : vector<8x8xf32>
    %127 = math.exp %126 : vector<8x8xf32>
    %cst_57 = arith.constant dense<0.000000e+00> : vector<8xf32>
    %128 = vector.multi_reduction <add>, %127, %cst_57 [1] : vector<8x8xf32> to vector<8xf32>
    %129 = vector.shape_cast %128 : vector<8xf32> to vector<8x1xf32>
    %130 = tpu.reciprocal %129 : vector<8x1xf32> -> vector<8x1xf32>
    %131 = vector.broadcast %130 : vector<8x1xf32> to vector<8x8xf32>
    %132 = arith.mulf %127, %131 : vector<8x8xf32>
    %133 = vector.extract_strided_slice %21 {offsets = [8, 0], sizes = [8, 32], strides = [1, 1]} : vector<16x32xf32> to vector<8x32xf32>
    %cst_58 = arith.constant dense<0.000000e+00> : vector<8x32xf32>
    %134 = tpu.matmul %132, %133, %cst_58 {dimension_numbers = #tpu.dot_dimension_numbers<[1], [0], [0], [1], [0, 0, 1, 1], [], []>} : vector<8x8xf32>, vector<8x32xf32>, vector<8x32xf32> -> vector<8x32xf32>
    %135 = vector.extract_strided_slice %113 {offsets = [0, 8], sizes = [8, 8], strides = [1, 1]} : vector<8x32xf32> to vector<8x8xf32>
    %136 = vector.extract_strided_slice %114 {offsets = [0, 8], sizes = [8, 8], strides = [1, 1]} : vector<8x32xf32> to vector<8x8xf32>
    %cst_59 = arith.constant dense<0.000000e+00> : vector<8x8xf32>
    %137 = tpu.matmul %135, %136, %cst_59 {dimension_numbers = #tpu.dot_dimension_numbers<[1], [1], [0], [0], [0, 0, 1, 0], [], []>} : vector<8x8xf32>, vector<8x8xf32>, vector<8x8xf32> -> vector<8x8xf32>
    %cst_60 = arith.constant 0.353553385 : f32
    %138 = vector.broadcast %cst_60 : f32 to vector<8x8xf32>
    %139 = arith.mulf %137, %138 : vector<8x8xf32>
    %140 = arith.addf %139, %116 : vector<8x8xf32>
    %cst_61 = arith.constant dense<0xFF800000> : vector<8xf32>
    %141 = vector.multi_reduction <maximumf>, %140, %cst_61 [1] : vector<8x8xf32> to vector<8xf32>
    %142 = vector.shape_cast %141 : vector<8xf32> to vector<8x1xf32>
    %143 = vector.broadcast %142 : vector<8x1xf32> to vector<8x8xf32>
    %144 = arith.subf %140, %143 : vector<8x8xf32>
    %145 = math.exp %144 : vector<8x8xf32>
    %cst_62 = arith.constant dense<0.000000e+00> : vector<8xf32>
    %146 = vector.multi_reduction <add>, %145, %cst_62 [1] : vector<8x8xf32> to vector<8xf32>
    %147 = vector.shape_cast %146 : vector<8xf32> to vector<8x1xf32>
    %148 = tpu.reciprocal %147 : vector<8x1xf32> -> vector<8x1xf32>
    %149 = vector.broadcast %148 : vector<8x1xf32> to vector<8x8xf32>
    %150 = arith.mulf %145, %149 : vector<8x8xf32>
    %151 = vector.extract_strided_slice %24 {offsets = [8, 0], sizes = [8, 32], strides = [1, 1]} : vector<16x32xf32> to vector<8x32xf32>
    %cst_63 = arith.constant dense<0.000000e+00> : vector<8x32xf32>
    %152 = tpu.matmul %150, %151, %cst_63 {dimension_numbers = #tpu.dot_dimension_numbers<[1], [0], [0], [1], [0, 0, 1, 1], [], []>} : vector<8x8xf32>, vector<8x32xf32>, vector<8x32xf32> -> vector<8x32xf32>
    %153 = arith.addf %134, %152 : vector<8x32xf32>
    %154 = vector.extract_strided_slice %113 {offsets = [0, 16], sizes = [8, 8], strides = [1, 1]} : vector<8x32xf32> to vector<8x8xf32>
    %155 = vector.extract_strided_slice %114 {offsets = [0, 16], sizes = [8, 8], strides = [1, 1]} : vector<8x32xf32> to vector<8x8xf32>
    %cst_64 = arith.constant dense<0.000000e+00> : vector<8x8xf32>
    %156 = tpu.matmul %154, %155, %cst_64 {dimension_numbers = #tpu.dot_dimension_numbers<[1], [1], [0], [0], [0, 0, 1, 0], [], []>} : vector<8x8xf32>, vector<8x8xf32>, vector<8x8xf32> -> vector<8x8xf32>
    %cst_65 = arith.constant 0.353553385 : f32
    %157 = vector.broadcast %cst_65 : f32 to vector<8x8xf32>
    %158 = arith.mulf %156, %157 : vector<8x8xf32>
    %159 = arith.addf %158, %116 : vector<8x8xf32>
    %cst_66 = arith.constant dense<0xFF800000> : vector<8xf32>
    %160 = vector.multi_reduction <maximumf>, %159, %cst_66 [1] : vector<8x8xf32> to vector<8xf32>
    %161 = vector.shape_cast %160 : vector<8xf32> to vector<8x1xf32>
    %162 = vector.broadcast %161 : vector<8x1xf32> to vector<8x8xf32>
    %163 = arith.subf %159, %162 : vector<8x8xf32>
    %164 = math.exp %163 : vector<8x8xf32>
    %cst_67 = arith.constant dense<0.000000e+00> : vector<8xf32>
    %165 = vector.multi_reduction <add>, %164, %cst_67 [1] : vector<8x8xf32> to vector<8xf32>
    %166 = vector.shape_cast %165 : vector<8xf32> to vector<8x1xf32>
    %167 = tpu.reciprocal %166 : vector<8x1xf32> -> vector<8x1xf32>
    %168 = vector.broadcast %167 : vector<8x1xf32> to vector<8x8xf32>
    %169 = arith.mulf %164, %168 : vector<8x8xf32>
    %170 = vector.extract_strided_slice %27 {offsets = [8, 0], sizes = [8, 32], strides = [1, 1]} : vector<16x32xf32> to vector<8x32xf32>
    %cst_68 = arith.constant dense<0.000000e+00> : vector<8x32xf32>
    %171 = tpu.matmul %169, %170, %cst_68 {dimension_numbers = #tpu.dot_dimension_numbers<[1], [0], [0], [1], [0, 0, 1, 1], [], []>} : vector<8x8xf32>, vector<8x32xf32>, vector<8x32xf32> -> vector<8x32xf32>
    %172 = arith.addf %153, %171 : vector<8x32xf32>
    %173 = vector.extract_strided_slice %113 {offsets = [0, 24], sizes = [8, 8], strides = [1, 1]} : vector<8x32xf32> to vector<8x8xf32>
    %174 = vector.extract_strided_slice %114 {offsets = [0, 24], sizes = [8, 8], strides = [1, 1]} : vector<8x32xf32> to vector<8x8xf32>
    %cst_69 = arith.constant dense<0.000000e+00> : vector<8x8xf32>
    %175 = tpu.matmul %173, %174, %cst_69 {dimension_numbers = #tpu.dot_dimension_numbers<[1], [1], [0], [0], [0, 0, 1, 0], [], []>} : vector<8x8xf32>, vector<8x8xf32>, vector<8x8xf32> -> vector<8x8xf32>
    %cst_70 = arith.constant 0.353553385 : f32
    %176 = vector.broadcast %cst_70 : f32 to vector<8x8xf32>
    %177 = arith.mulf %175, %176 : vector<8x8xf32>
    %178 = arith.addf %177, %116 : vector<8x8xf32>
    %cst_71 = arith.constant dense<0xFF800000> : vector<8xf32>
    %179 = vector.multi_reduction <maximumf>, %178, %cst_71 [1] : vector<8x8xf32> to vector<8xf32>
    %180 = vector.shape_cast %179 : vector<8xf32> to vector<8x1xf32>
    %181 = vector.broadcast %180 : vector<8x1xf32> to vector<8x8xf32>
    %182 = arith.subf %178, %181 : vector<8x8xf32>
    %183 = math.exp %182 : vector<8x8xf32>
    %cst_72 = arith.constant dense<0.000000e+00> : vector<8xf32>
    %184 = vector.multi_reduction <add>, %183, %cst_72 [1] : vector<8x8xf32> to vector<8xf32>
    %185 = vector.shape_cast %184 : vector<8xf32> to vector<8x1xf32>
    %186 = tpu.reciprocal %185 : vector<8x1xf32> -> vector<8x1xf32>
    %187 = vector.broadcast %186 : vector<8x1xf32> to vector<8x8xf32>
    %188 = arith.mulf %183, %187 : vector<8x8xf32>
    %189 = vector.extract_strided_slice %30 {offsets = [8, 0], sizes = [8, 32], strides = [1, 1]} : vector<16x32xf32> to vector<8x32xf32>
    %cst_73 = arith.constant dense<0.000000e+00> : vector<8x32xf32>
    %190 = tpu.matmul %188, %189, %cst_73 {dimension_numbers = #tpu.dot_dimension_numbers<[1], [0], [0], [1], [0, 0, 1, 1], [], []>} : vector<8x8xf32>, vector<8x32xf32>, vector<8x32xf32> -> vector<8x32xf32>
    %191 = arith.addf %172, %190 : vector<8x32xf32>
    %192 = vector.broadcast %8 : vector<1x32xf32> to vector<8x32xf32>
    %193 = arith.addf %191, %192 : vector<8x32xf32>
    %c8 = arith.constant 8 : index
    %c0_74 = arith.constant 0 : index
    %194 = vector.load %arg20[%c8, %c0_74] : memref<16x32xf32, #tpu.memory_space<vmem>>, vector<8x32xf32>
    tpu.vector_store %arg20[%c8, %c0_74], %193 {strides = array<i32>} : memref<16x32xf32, #tpu.memory_space<vmem>>, vector<8x32xf32>,
    %c0_75 = arith.constant 0 : index
    %c0_76 = arith.constant 0 : index
    %195 = vector.load %arg20[%c0_75, %c0_76] : memref<16x32xf32, #tpu.memory_space<vmem>>, vector<16x32xf32>
    %196 = arith.addf %0, %195 : vector<16x32xf32>
    %197 = vector.extract_strided_slice %4 {offsets = [0, 0, 0], sizes = [1, 1, 32], strides = [1, 1, 1]} : vector<3x2x32xf32> to vector<1x1x32xf32>
    %198 = vector.shape_cast %197 : vector<1x1x32xf32> to vector<1x32xf32>
    %199 = vector.extract_strided_slice %4 {offsets = [0, 1, 0], sizes = [1, 1, 32], strides = [1, 1, 1]} : vector<3x2x32xf32> to vector<1x1x32xf32>
    %200 = vector.shape_cast %199 : vector<1x1x32xf32> to vector<1x32xf32>
    %cst_77 = arith.constant dense<0.000000e+00> : vector<16xf32>
    %201 = vector.multi_reduction <add>, %196, %cst_77 [1] : vector<16x32xf32> to vector<16xf32>
    %202 = vector.shape_cast %201 : vector<16xf32> to vector<16x1xf32>
    %cst_78 = arith.constant 3.200000e+01 : f32
    %203 = vector.broadcast %cst_78 : f32 to vector<16x1xf32>
    %204 = arith.divf %202, %203 : vector<16x1xf32>
    %205 = vector.broadcast %204 : vector<16x1xf32> to vector<16x32xf32>
    %206 = arith.subf %196, %205 : vector<16x32xf32>
    %207 = arith.mulf %206, %206 : vector<16x32xf32>
    %cst_79 = arith.constant dense<0.000000e+00> : vector<16xf32>
    %208 = vector.multi_reduction <add>, %207, %cst_79 [1] : vector<16x32xf32> to vector<16xf32>
    %209 = vector.shape_cast %208 : vector<16xf32> to vector<16x1xf32>
    %cst_80 = arith.constant 3.200000e+01 : f32
    %210 = vector.broadcast %cst_80 : f32 to vector<16x1xf32>
    %211 = arith.divf %209, %210 : vector<16x1xf32>
    %212 = vector.broadcast %204 : vector<16x1xf32> to vector<16x32xf32>
    %213 = arith.subf %196, %212 : vector<16x32xf32>
    %cst_81 = arith.constant 9.99999974E-6 : f32
    %214 = vector.broadcast %cst_81 : f32 to vector<16x1xf32>
    %215 = arith.addf %211, %214 : vector<16x1xf32>
    %216 = math.rsqrt %215 : vector<16x1xf32>
    %217 = vector.broadcast %216 : vector<16x1xf32> to vector<16x32xf32>
    %218 = arith.mulf %213, %217 : vector<16x32xf32>
    %219 = vector.broadcast %198 : vector<1x32xf32> to vector<16x32xf32>
    %220 = arith.mulf %218, %219 : vector<16x32xf32>
    %221 = vector.broadcast %200 : vector<1x32xf32> to vector<16x32xf32>
    %222 = arith.addf %220, %221 : vector<16x32xf32>
    %223 = vector.extract_strided_slice %9 {offsets = [0, 0], sizes = [32, 32], strides = [1, 1]} : vector<32x96xf32> to vector<32x32xf32>
    %cst_82 = arith.constant dense<0.000000e+00> : vector<16x32xf32>
    %224 = tpu.matmul %222, %223, %cst_82 {dimension_numbers = #tpu.dot_dimension_numbers<[1], [0], [0], [1], [0, 0, 1, 1], [], []>} : vector<16x32xf32>, vector<32x32xf32>, vector<16x32xf32> -> vector<16x32xf32>
    %225 = vector.extract_strided_slice %10 {offsets = [0, 0], sizes = [1, 32], strides = [1, 1]} : vector<1x96xf32> to vector<1x32xf32>
    %226 = vector.broadcast %225 : vector<1x32xf32> to vector<16x32xf32>
    %227 = arith.addf %224, %226 : vector<16x32xf32>
    %228 = vector.extract_strided_slice %9 {offsets = [0, 32], sizes = [32, 64], strides = [1, 1]} : vector<32x96xf32> to vector<32x64xf32>
    %cst_83 = arith.constant dense<0.000000e+00> : vector<24x64xf32>
    %229 = tpu.matmul %1, %228, %cst_83 {dimension_numbers = #tpu.dot_dimension_numbers<[1], [0], [0], [1], [0, 0, 1, 1], [], []>} : vector<24x32xf32>, vector<32x64xf32>, vector<24x64xf32> -> vector<24x64xf32>
    %230 = vector.extract_strided_slice %10 {offsets = [0, 32], sizes = [1, 64], strides = [1, 1]} : vector<1x96xf32> to vector<1x64xf32>
    %231 = vector.broadcast %230 : vector<1x64xf32> to vector<24x64xf32>
    %232 = arith.addf %229, %231 : vector<24x64xf32>
    %233 = vector.extract_strided_slice %232 {offsets = [0, 0], sizes = [24, 32], strides = [1, 1]} : vector<24x64xf32> to vector<24x32xf32>
    %234 = vector.extract_strided_slice %232 {offsets = [0, 32], sizes = [24, 32], strides = [1, 1]} : vector<24x64xf32> to vector<24x32xf32>
    %235 = vector.extract_strided_slice %234 {offsets = [0, 0], sizes = [24, 8], strides = [1, 1]} : vector<24x32xf32> to vector<24x8xf32>
    %236 = vector.extract_strided_slice %11 {offsets = [0, 0], sizes = [8, 32], strides = [1, 1]} : vector<32x32xf32> to vector<8x32xf32>
    %cst_84 = arith.constant dense<0.000000e+00> : vector<24x32xf32>
    %237 = tpu.matmul %235, %236, %cst_84 {dimension_numbers = #tpu.dot_dimension_numbers<[1], [0], [0], [1], [0, 0, 1, 1], [], []>} : vector<24x8xf32>, vector<8x32xf32>, vector<24x32xf32> -> vector<24x32xf32>
    %238 = vector.extract_strided_slice %234 {offsets = [0, 8], sizes = [24, 8], strides = [1, 1]} : vector<24x32xf32> to vector<24x8xf32>
    %239 = vector.extract_strided_slice %11 {offsets = [8, 0], sizes = [8, 32], strides = [1, 1]} : vector<32x32xf32> to vector<8x32xf32>
    %cst_85 = arith.constant dense<0.000000e+00> : vector<24x32xf32>
    %240 = tpu.matmul %238, %239, %cst_85 {dimension_numbers = #tpu.dot_dimension_numbers<[1], [0], [0], [1], [0, 0, 1, 1], [], []>} : vector<24x8xf32>, vector<8x32xf32>, vector<24x32xf32> -> vector<24x32xf32>
    %241 = vector.extract_strided_slice %234 {offsets = [0, 16], sizes = [24, 8], strides = [1, 1]} : vector<24x32xf32> to vector<24x8xf32>
    %242 = vector.extract_strided_slice %11 {offsets = [16, 0], sizes = [8, 32], strides = [1, 1]} : vector<32x32xf32> to vector<8x32xf32>
    %cst_86 = arith.constant dense<0.000000e+00> : vector<24x32xf32>
    %243 = tpu.matmul %241, %242, %cst_86 {dimension_numbers = #tpu.dot_dimension_numbers<[1], [0], [0], [1], [0, 0, 1, 1], [], []>} : vector<24x8xf32>, vector<8x32xf32>, vector<24x32xf32> -> vector<24x32xf32>
    %244 = vector.extract_strided_slice %234 {offsets = [0, 24], sizes = [24, 8], strides = [1, 1]} : vector<24x32xf32> to vector<24x8xf32>
    %245 = vector.extract_strided_slice %11 {offsets = [24, 0], sizes = [8, 32], strides = [1, 1]} : vector<32x32xf32> to vector<8x32xf32>
    %cst_87 = arith.constant dense<0.000000e+00> : vector<24x32xf32>
    %246 = tpu.matmul %244, %245, %cst_87 {dimension_numbers = #tpu.dot_dimension_numbers<[1], [0], [0], [1], [0, 0, 1, 1], [], []>} : vector<24x8xf32>, vector<8x32xf32>, vector<24x32xf32> -> vector<24x32xf32>
    %247 = vector.extract_strided_slice %227 {offsets = [0, 0], sizes = [8, 32], strides = [1, 1]} : vector<16x32xf32> to vector<8x32xf32>
    %248 = vector.extract_strided_slice %233 {offsets = [0, 0], sizes = [12, 32], strides = [1, 1]} : vector<24x32xf32> to vector<12x32xf32>
    %249 = vector.extract_strided_slice %3 {offsets = [0, 0, 0], sizes = [1, 1, 12], strides = [1, 1, 1]} : vector<2x1x12xf32> to vector<1x1x12xf32>
    %250 = vector.shape_cast %249 : vector<1x1x12xf32> to vector<1x12xf32>
    %251 = vector.extract_strided_slice %247 {offsets = [0, 0], sizes = [8, 8], strides = [1, 1]} : vector<8x32xf32> to vector<8x8xf32>
    %252 = vector.extract_strided_slice %248 {offsets = [0, 0], sizes = [12, 8], strides = [1, 1]} : vector<12x32xf32> to vector<12x8xf32>
    %cst_88 = arith.constant dense<0.000000e+00> : vector<8x12xf32>
    %253 = tpu.matmul %251, %252, %cst_88 {dimension_numbers = #tpu.dot_dimension_numbers<[1], [1], [0], [0], [0, 0, 1, 0], [], []>} : vector<8x8xf32>, vector<12x8xf32>, vector<8x12xf32> -> vector<8x12xf32>
    %cst_89 = arith.constant 0.353553385 : f32
    %254 = vector.broadcast %cst_89 : f32 to vector<8x12xf32>
    %255 = arith.mulf %253, %254 : vector<8x12xf32>
    %256 = vector.broadcast %250 : vector<1x12xf32> to vector<8x12xf32>
    %257 = arith.addf %255, %256 : vector<8x12xf32>
    %cst_90 = arith.constant dense<0xFF800000> : vector<8xf32>
    %258 = vector.multi_reduction <maximumf>, %257, %cst_90 [1] : vector<8x12xf32> to vector<8xf32>
    %259 = vector.shape_cast %258 : vector<8xf32> to vector<8x1xf32>
    %260 = vector.broadcast %259 : vector<8x1xf32> to vector<8x12xf32>
    %261 = arith.subf %257, %260 : vector<8x12xf32>
    %262 = math.exp %261 : vector<8x12xf32>
    %cst_91 = arith.constant dense<0.000000e+00> : vector<8xf32>
    %263 = vector.multi_reduction <add>, %262, %cst_91 [1] : vector<8x12xf32> to vector<8xf32>
    %264 = vector.shape_cast %263 : vector<8xf32> to vector<8x1xf32>
    %265 = tpu.reciprocal %264 : vector<8x1xf32> -> vector<8x1xf32>
    %266 = vector.broadcast %265 : vector<8x1xf32> to vector<8x12xf32>
    %267 = arith.mulf %262, %266 : vector<8x12xf32>
    %c0_92 = arith.constant 0 : index
    %c0_93 = arith.constant 0 : index
    %c0_94 = arith.constant 0 : index
    %268 = vector.load %arg19[%c0_92, %c0_93, %c0_94] : memref<8x8x12xf32, #tpu.memory_space<vmem>>, vector<1x8x12xf32>
    %269 = vector.shape_cast %268 : vector<1x8x12xf32> to vector<8x12xf32>
    %270 = vector.shape_cast %267 : vector<8x12xf32> to vector<1x8x12xf32>
    tpu.vector_store %arg19[%c0_92, %c0_93, %c0_94], %270 {strides = array<i32>} : memref<8x8x12xf32, #tpu.memory_space<vmem>>, vector<1x8x12xf32>,
    %271 = vector.extract_strided_slice %237 {offsets = [0, 0], sizes = [12, 32], strides = [1, 1]} : vector<24x32xf32> to vector<12x32xf32>
    %cst_95 = arith.constant dense<0.000000e+00> : vector<8x32xf32>
    %272 = tpu.matmul %267, %271, %cst_95 {dimension_numbers = #tpu.dot_dimension_numbers<[1], [0], [0], [1], [0, 0, 1, 1], [], []>} : vector<8x12xf32>, vector<12x32xf32>, vector<8x32xf32> -> vector<8x32xf32>
    %273 = vector.extract_strided_slice %247 {offsets = [0, 8], sizes = [8, 8], strides = [1, 1]} : vector<8x32xf32> to vector<8x8xf32>
    %274 = vector.extract_strided_slice %248 {offsets = [0, 8], sizes = [12, 8], strides = [1, 1]} : vector<12x32xf32> to vector<12x8xf32>
    %cst_96 = arith.constant dense<0.000000e+00> : vector<8x12xf32>
    %275 = tpu.matmul %273, %274, %cst_96 {dimension_numbers = #tpu.dot_dimension_numbers<[1], [1], [0], [0], [0, 0, 1, 0], [], []>} : vector<8x8xf32>, vector<12x8xf32>, vector<8x12xf32> -> vector<8x12xf32>
    %cst_97 = arith.constant 0.353553385 : f32
    %276 = vector.broadcast %cst_97 : f32 to vector<8x12xf32>
    %277 = arith.mulf %275, %276 : vector<8x12xf32>
    %278 = vector.broadcast %250 : vector<1x12xf32> to vector<8x12xf32>
    %279 = arith.addf %277, %278 : vector<8x12xf32>
    %cst_98 = arith.constant dense<0xFF800000> : vector<8xf32>
    %280 = vector.multi_reduction <maximumf>, %279, %cst_98 [1] : vector<8x12xf32> to vector<8xf32>
    %281 = vector.shape_cast %280 : vector<8xf32> to vector<8x1xf32>
    %282 = vector.broadcast %281 : vector<8x1xf32> to vector<8x12xf32>
    %283 = arith.subf %279, %282 : vector<8x12xf32>
    %284 = math.exp %283 : vector<8x12xf32>
    %cst_99 = arith.constant dense<0.000000e+00> : vector<8xf32>
    %285 = vector.multi_reduction <add>, %284, %cst_99 [1] : vector<8x12xf32> to vector<8xf32>
    %286 = vector.shape_cast %285 : vector<8xf32> to vector<8x1xf32>
    %287 = tpu.reciprocal %286 : vector<8x1xf32> -> vector<8x1xf32>
    %288 = vector.broadcast %287 : vector<8x1xf32> to vector<8x12xf32>
    %289 = arith.mulf %284, %288 : vector<8x12xf32>
    %c1 = arith.constant 1 : index
    %c0_100 = arith.constant 0 : index
    %c0_101 = arith.constant 0 : index
    %290 = vector.load %arg19[%c1, %c0_100, %c0_101] : memref<8x8x12xf32, #tpu.memory_space<vmem>>, vector<1x8x12xf32>
    %291 = vector.shape_cast %290 : vector<1x8x12xf32> to vector<8x12xf32>
    %292 = vector.shape_cast %289 : vector<8x12xf32> to vector<1x8x12xf32>
    tpu.vector_store %arg19[%c1, %c0_100, %c0_101], %292 {strides = array<i32>} : memref<8x8x12xf32, #tpu.memory_space<vmem>>, vector<1x8x12xf32>,
    %293 = vector.extract_strided_slice %240 {offsets = [0, 0], sizes = [12, 32], strides = [1, 1]} : vector<24x32xf32> to vector<12x32xf32>
    %cst_102 = arith.constant dense<0.000000e+00> : vector<8x32xf32>
    %294 = tpu.matmul %289, %293, %cst_102 {dimension_numbers = #tpu.dot_dimension_numbers<[1], [0], [0], [1], [0, 0, 1, 1], [], []>} : vector<8x12xf32>, vector<12x32xf32>, vector<8x32xf32> -> vector<8x32xf32>
    %295 = arith.addf %272, %294 : vector<8x32xf32>
    %296 = vector.extract_strided_slice %247 {offsets = [0, 16], sizes = [8, 8], strides = [1, 1]} : vector<8x32xf32> to vector<8x8xf32>
    %297 = vector.extract_strided_slice %248 {offsets = [0, 16], sizes = [12, 8], strides = [1, 1]} : vector<12x32xf32> to vector<12x8xf32>
    %cst_103 = arith.constant dense<0.000000e+00> : vector<8x12xf32>
    %298 = tpu.matmul %296, %297, %cst_103 {dimension_numbers = #tpu.dot_dimension_numbers<[1], [1], [0], [0], [0, 0, 1, 0], [], []>} : vector<8x8xf32>, vector<12x8xf32>, vector<8x12xf32> -> vector<8x12xf32>
    %cst_104 = arith.constant 0.353553385 : f32
    %299 = vector.broadcast %cst_104 : f32 to vector<8x12xf32>
    %300 = arith.mulf %298, %299 : vector<8x12xf32>
    %301 = vector.broadcast %250 : vector<1x12xf32> to vector<8x12xf32>
    %302 = arith.addf %300, %301 : vector<8x12xf32>
    %cst_105 = arith.constant dense<0xFF800000> : vector<8xf32>
    %303 = vector.multi_reduction <maximumf>, %302, %cst_105 [1] : vector<8x12xf32> to vector<8xf32>
    %304 = vector.shape_cast %303 : vector<8xf32> to vector<8x1xf32>
    %305 = vector.broadcast %304 : vector<8x1xf32> to vector<8x12xf32>
    %306 = arith.subf %302, %305 : vector<8x12xf32>
    %307 = math.exp %306 : vector<8x12xf32>
    %cst_106 = arith.constant dense<0.000000e+00> : vector<8xf32>
    %308 = vector.multi_reduction <add>, %307, %cst_106 [1] : vector<8x12xf32> to vector<8xf32>
    %309 = vector.shape_cast %308 : vector<8xf32> to vector<8x1xf32>
    %310 = tpu.reciprocal %309 : vector<8x1xf32> -> vector<8x1xf32>
    %311 = vector.broadcast %310 : vector<8x1xf32> to vector<8x12xf32>
    %312 = arith.mulf %307, %311 : vector<8x12xf32>
    %c2 = arith.constant 2 : index
    %c0_107 = arith.constant 0 : index
    %c0_108 = arith.constant 0 : index
    %313 = vector.load %arg19[%c2, %c0_107, %c0_108] : memref<8x8x12xf32, #tpu.memory_space<vmem>>, vector<1x8x12xf32>
    %314 = vector.shape_cast %313 : vector<1x8x12xf32> to vector<8x12xf32>
    %315 = vector.shape_cast %312 : vector<8x12xf32> to vector<1x8x12xf32>
    tpu.vector_store %arg19[%c2, %c0_107, %c0_108], %315 {strides = array<i32>} : memref<8x8x12xf32, #tpu.memory_space<vmem>>, vector<1x8x12xf32>,
    %316 = vector.extract_strided_slice %243 {offsets = [0, 0], sizes = [12, 32], strides = [1, 1]} : vector<24x32xf32> to vector<12x32xf32>
    %cst_109 = arith.constant dense<0.000000e+00> : vector<8x32xf32>
    %317 = tpu.matmul %312, %316, %cst_109 {dimension_numbers = #tpu.dot_dimension_numbers<[1], [0], [0], [1], [0, 0, 1, 1], [], []>} : vector<8x12xf32>, vector<12x32xf32>, vector<8x32xf32> -> vector<8x32xf32>
    %318 = arith.addf %295, %317 : vector<8x32xf32>
    %319 = vector.extract_strided_slice %247 {offsets = [0, 24], sizes = [8, 8], strides = [1, 1]} : vector<8x32xf32> to vector<8x8xf32>
    %320 = vector.extract_strided_slice %248 {offsets = [0, 24], sizes = [12, 8], strides = [1, 1]} : vector<12x32xf32> to vector<12x8xf32>
    %cst_110 = arith.constant dense<0.000000e+00> : vector<8x12xf32>
    %321 = tpu.matmul %319, %320, %cst_110 {dimension_numbers = #tpu.dot_dimension_numbers<[1], [1], [0], [0], [0, 0, 1, 0], [], []>} : vector<8x8xf32>, vector<12x8xf32>, vector<8x12xf32> -> vector<8x12xf32>
    %cst_111 = arith.constant 0.353553385 : f32
    %322 = vector.broadcast %cst_111 : f32 to vector<8x12xf32>
    %323 = arith.mulf %321, %322 : vector<8x12xf32>
    %324 = vector.broadcast %250 : vector<1x12xf32> to vector<8x12xf32>
    %325 = arith.addf %323, %324 : vector<8x12xf32>
    %cst_112 = arith.constant dense<0xFF800000> : vector<8xf32>
    %326 = vector.multi_reduction <maximumf>, %325, %cst_112 [1] : vector<8x12xf32> to vector<8xf32>
    %327 = vector.shape_cast %326 : vector<8xf32> to vector<8x1xf32>
    %328 = vector.broadcast %327 : vector<8x1xf32> to vector<8x12xf32>
    %329 = arith.subf %325, %328 : vector<8x12xf32>
    %330 = math.exp %329 : vector<8x12xf32>
    %cst_113 = arith.constant dense<0.000000e+00> : vector<8xf32>
    %331 = vector.multi_reduction <add>, %330, %cst_113 [1] : vector<8x12xf32> to vector<8xf32>
    %332 = vector.shape_cast %331 : vector<8xf32> to vector<8x1xf32>
    %333 = tpu.reciprocal %332 : vector<8x1xf32> -> vector<8x1xf32>
    %334 = vector.broadcast %333 : vector<8x1xf32> to vector<8x12xf32>
    %335 = arith.mulf %330, %334 : vector<8x12xf32>
    %c3 = arith.constant 3 : index
    %c0_114 = arith.constant 0 : index
    %c0_115 = arith.constant 0 : index
    %336 = vector.load %arg19[%c3, %c0_114, %c0_115] : memref<8x8x12xf32, #tpu.memory_space<vmem>>, vector<1x8x12xf32>
    %337 = vector.shape_cast %336 : vector<1x8x12xf32> to vector<8x12xf32>
    %338 = vector.shape_cast %335 : vector<8x12xf32> to vector<1x8x12xf32>
    tpu.vector_store %arg19[%c3, %c0_114, %c0_115], %338 {strides = array<i32>} : memref<8x8x12xf32, #tpu.memory_space<vmem>>, vector<1x8x12xf32>,
    %339 = vector.extract_strided_slice %246 {offsets = [0, 0], sizes = [12, 32], strides = [1, 1]} : vector<24x32xf32> to vector<12x32xf32>
    %cst_116 = arith.constant dense<0.000000e+00> : vector<8x32xf32>
    %340 = tpu.matmul %335, %339, %cst_116 {dimension_numbers = #tpu.dot_dimension_numbers<[1], [0], [0], [1], [0, 0, 1, 1], [], []>} : vector<8x12xf32>, vector<12x32xf32>, vector<8x32xf32> -> vector<8x32xf32>
    %341 = arith.addf %318, %340 : vector<8x32xf32>
    %342 = vector.broadcast %12 : vector<1x32xf32> to vector<8x32xf32>
    %343 = arith.addf %341, %342 : vector<8x32xf32>
    %c0_117 = arith.constant 0 : index
    %c0_118 = arith.constant 0 : index
    %344 = vector.load %arg20[%c0_117, %c0_118] : memref<16x32xf32, #tpu.memory_space<vmem>>, vector<8x32xf32>
    tpu.vector_store %arg20[%c0_117, %c0_118], %343 {strides = array<i32>} : memref<16x32xf32, #tpu.memory_space<vmem>>, vector<8x32xf32>,
    %345 = vector.extract_strided_slice %227 {offsets = [8, 0], sizes = [8, 32], strides = [1, 1]} : vector<16x32xf32> to vector<8x32xf32>
    %346 = vector.extract_strided_slice %233 {offsets = [12, 0], sizes = [12, 32], strides = [1, 1]} : vector<24x32xf32> to vector<12x32xf32>
    %347 = vector.extract_strided_slice %3 {offsets = [1, 0, 0], sizes = [1, 1, 12], strides = [1, 1, 1]} : vector<2x1x12xf32> to vector<1x1x12xf32>
    %348 = vector.shape_cast %347 : vector<1x1x12xf32> to vector<1x12xf32>
    %349 = vector.extract_strided_slice %345 {offsets = [0, 0], sizes = [8, 8], strides = [1, 1]} : vector<8x32xf32> to vector<8x8xf32>
    %350 = vector.extract_strided_slice %346 {offsets = [0, 0], sizes = [12, 8], strides = [1, 1]} : vector<12x32xf32> to vector<12x8xf32>
    %cst_119 = arith.constant dense<0.000000e+00> : vector<8x12xf32>
    %351 = tpu.matmul %349, %350, %cst_119 {dimension_numbers = #tpu.dot_dimension_numbers<[1], [1], [0], [0], [0, 0, 1, 0], [], []>} : vector<8x8xf32>, vector<12x8xf32>, vector<8x12xf32> -> vector<8x12xf32>
    %cst_120 = arith.constant 0.353553385 : f32
    %352 = vector.broadcast %cst_120 : f32 to vector<8x12xf32>
    %353 = arith.mulf %351, %352 : vector<8x12xf32>
    %354 = vector.broadcast %348 : vector<1x12xf32> to vector<8x12xf32>
    %355 = arith.addf %353, %354 : vector<8x12xf32>
    %cst_121 = arith.constant dense<0xFF800000> : vector<8xf32>
    %356 = vector.multi_reduction <maximumf>, %355, %cst_121 [1] : vector<8x12xf32> to vector<8xf32>
    %357 = vector.shape_cast %356 : vector<8xf32> to vector<8x1xf32>
    %358 = vector.broadcast %357 : vector<8x1xf32> to vector<8x12xf32>
    %359 = arith.subf %355, %358 : vector<8x12xf32>
    %360 = math.exp %359 : vector<8x12xf32>
    %cst_122 = arith.constant dense<0.000000e+00> : vector<8xf32>
    %361 = vector.multi_reduction <add>, %360, %cst_122 [1] : vector<8x12xf32> to vector<8xf32>
    %362 = vector.shape_cast %361 : vector<8xf32> to vector<8x1xf32>
    %363 = tpu.reciprocal %362 : vector<8x1xf32> -> vector<8x1xf32>
    %364 = vector.broadcast %363 : vector<8x1xf32> to vector<8x12xf32>
    %365 = arith.mulf %360, %364 : vector<8x12xf32>
    %c4 = arith.constant 4 : index
    %c0_123 = arith.constant 0 : index
    %c0_124 = arith.constant 0 : index
    %366 = vector.load %arg19[%c4, %c0_123, %c0_124] : memref<8x8x12xf32, #tpu.memory_space<vmem>>, vector<1x8x12xf32>
    %367 = vector.shape_cast %366 : vector<1x8x12xf32> to vector<8x12xf32>
    %368 = vector.shape_cast %365 : vector<8x12xf32> to vector<1x8x12xf32>
    tpu.vector_store %arg19[%c4, %c0_123, %c0_124], %368 {strides = array<i32>} : memref<8x8x12xf32, #tpu.memory_space<vmem>>, vector<1x8x12xf32>,
    %369 = vector.extract_strided_slice %237 {offsets = [12, 0], sizes = [12, 32], strides = [1, 1]} : vector<24x32xf32> to vector<12x32xf32>
    %cst_125 = arith.constant dense<0.000000e+00> : vector<8x32xf32>
    %370 = tpu.matmul %365, %369, %cst_125 {dimension_numbers = #tpu.dot_dimension_numbers<[1], [0], [0], [1], [0, 0, 1, 1], [], []>} : vector<8x12xf32>, vector<12x32xf32>, vector<8x32xf32> -> vector<8x32xf32>
    %371 = vector.extract_strided_slice %345 {offsets = [0, 8], sizes = [8, 8], strides = [1, 1]} : vector<8x32xf32> to vector<8x8xf32>
    %372 = vector.extract_strided_slice %346 {offsets = [0, 8], sizes = [12, 8], strides = [1, 1]} : vector<12x32xf32> to vector<12x8xf32>
    %cst_126 = arith.constant dense<0.000000e+00> : vector<8x12xf32>
    %373 = tpu.matmul %371, %372, %cst_126 {dimension_numbers = #tpu.dot_dimension_numbers<[1], [1], [0], [0], [0, 0, 1, 0], [], []>} : vector<8x8xf32>, vector<12x8xf32>, vector<8x12xf32> -> vector<8x12xf32>
    %cst_127 = arith.constant 0.353553385 : f32
    %374 = vector.broadcast %cst_127 : f32 to vector<8x12xf32>
    %375 = arith.mulf %373, %374 : vector<8x12xf32>
    %376 = vector.broadcast %348 : vector<1x12xf32> to vector<8x12xf32>
    %377 = arith.addf %375, %376 : vector<8x12xf32>
    %cst_128 = arith.constant dense<0xFF800000> : vector<8xf32>
    %378 = vector.multi_reduction <maximumf>, %377, %cst_128 [1] : vector<8x12xf32> to vector<8xf32>
    %379 = vector.shape_cast %378 : vector<8xf32> to vector<8x1xf32>
    %380 = vector.broadcast %379 : vector<8x1xf32> to vector<8x12xf32>
    %381 = arith.subf %377, %380 : vector<8x12xf32>
    %382 = math.exp %381 : vector<8x12xf32>
    %cst_129 = arith.constant dense<0.000000e+00> : vector<8xf32>
    %383 = vector.multi_reduction <add>, %382, %cst_129 [1] : vector<8x12xf32> to vector<8xf32>
    %384 = vector.shape_cast %383 : vector<8xf32> to vector<8x1xf32>
    %385 = tpu.reciprocal %384 : vector<8x1xf32> -> vector<8x1xf32>
    %386 = vector.broadcast %385 : vector<8x1xf32> to vector<8x12xf32>
    %387 = arith.mulf %382, %386 : vector<8x12xf32>
    %c5 = arith.constant 5 : index
    %c0_130 = arith.constant 0 : index
    %c0_131 = arith.constant 0 : index
    %388 = vector.load %arg19[%c5, %c0_130, %c0_131] : memref<8x8x12xf32, #tpu.memory_space<vmem>>, vector<1x8x12xf32>
    %389 = vector.shape_cast %388 : vector<1x8x12xf32> to vector<8x12xf32>
    %390 = vector.shape_cast %387 : vector<8x12xf32> to vector<1x8x12xf32>
    tpu.vector_store %arg19[%c5, %c0_130, %c0_131], %390 {strides = array<i32>} : memref<8x8x12xf32, #tpu.memory_space<vmem>>, vector<1x8x12xf32>,
    %391 = vector.extract_strided_slice %240 {offsets = [12, 0], sizes = [12, 32], strides = [1, 1]} : vector<24x32xf32> to vector<12x32xf32>
    %cst_132 = arith.constant dense<0.000000e+00> : vector<8x32xf32>
    %392 = tpu.matmul %387, %391, %cst_132 {dimension_numbers = #tpu.dot_dimension_numbers<[1], [0], [0], [1], [0, 0, 1, 1], [], []>} : vector<8x12xf32>, vector<12x32xf32>, vector<8x32xf32> -> vector<8x32xf32>
    %393 = arith.addf %370, %392 : vector<8x32xf32>
    %394 = vector.extract_strided_slice %345 {offsets = [0, 16], sizes = [8, 8], strides = [1, 1]} : vector<8x32xf32> to vector<8x8xf32>
    %395 = vector.extract_strided_slice %346 {offsets = [0, 16], sizes = [12, 8], strides = [1, 1]} : vector<12x32xf32> to vector<12x8xf32>
    %cst_133 = arith.constant dense<0.000000e+00> : vector<8x12xf32>
    %396 = tpu.matmul %394, %395, %cst_133 {dimension_numbers = #tpu.dot_dimension_numbers<[1], [1], [0], [0], [0, 0, 1, 0], [], []>} : vector<8x8xf32>, vector<12x8xf32>, vector<8x12xf32> -> vector<8x12xf32>
    %cst_134 = arith.constant 0.353553385 : f32
    %397 = vector.broadcast %cst_134 : f32 to vector<8x12xf32>
    %398 = arith.mulf %396, %397 : vector<8x12xf32>
    %399 = vector.broadcast %348 : vector<1x12xf32> to vector<8x12xf32>
    %400 = arith.addf %398, %399 : vector<8x12xf32>
    %cst_135 = arith.constant dense<0xFF800000> : vector<8xf32>
    %401 = vector.multi_reduction <maximumf>, %400, %cst_135 [1] : vector<8x12xf32> to vector<8xf32>
    %402 = vector.shape_cast %401 : vector<8xf32> to vector<8x1xf32>
    %403 = vector.broadcast %402 : vector<8x1xf32> to vector<8x12xf32>
    %404 = arith.subf %400, %403 : vector<8x12xf32>
    %405 = math.exp %404 : vector<8x12xf32>
    %cst_136 = arith.constant dense<0.000000e+00> : vector<8xf32>
    %406 = vector.multi_reduction <add>, %405, %cst_136 [1] : vector<8x12xf32> to vector<8xf32>
    %407 = vector.shape_cast %406 : vector<8xf32> to vector<8x1xf32>
    %408 = tpu.reciprocal %407 : vector<8x1xf32> -> vector<8x1xf32>
    %409 = vector.broadcast %408 : vector<8x1xf32> to vector<8x12xf32>
    %410 = arith.mulf %405, %409 : vector<8x12xf32>
    %c6 = arith.constant 6 : index
    %c0_137 = arith.constant 0 : index
    %c0_138 = arith.constant 0 : index
    %411 = vector.load %arg19[%c6, %c0_137, %c0_138] : memref<8x8x12xf32, #tpu.memory_space<vmem>>, vector<1x8x12xf32>
    %412 = vector.shape_cast %411 : vector<1x8x12xf32> to vector<8x12xf32>
    %413 = vector.shape_cast %410 : vector<8x12xf32> to vector<1x8x12xf32>
    tpu.vector_store %arg19[%c6, %c0_137, %c0_138], %413 {strides = array<i32>} : memref<8x8x12xf32, #tpu.memory_space<vmem>>, vector<1x8x12xf32>,
    %414 = vector.extract_strided_slice %243 {offsets = [12, 0], sizes = [12, 32], strides = [1, 1]} : vector<24x32xf32> to vector<12x32xf32>
    %cst_139 = arith.constant dense<0.000000e+00> : vector<8x32xf32>
    %415 = tpu.matmul %410, %414, %cst_139 {dimension_numbers = #tpu.dot_dimension_numbers<[1], [0], [0], [1], [0, 0, 1, 1], [], []>} : vector<8x12xf32>, vector<12x32xf32>, vector<8x32xf32> -> vector<8x32xf32>
    %416 = arith.addf %393, %415 : vector<8x32xf32>
    %417 = vector.extract_strided_slice %345 {offsets = [0, 24], sizes = [8, 8], strides = [1, 1]} : vector<8x32xf32> to vector<8x8xf32>
    %418 = vector.extract_strided_slice %346 {offsets = [0, 24], sizes = [12, 8], strides = [1, 1]} : vector<12x32xf32> to vector<12x8xf32>
    %cst_140 = arith.constant dense<0.000000e+00> : vector<8x12xf32>
    %419 = tpu.matmul %417, %418, %cst_140 {dimension_numbers = #tpu.dot_dimension_numbers<[1], [1], [0], [0], [0, 0, 1, 0], [], []>} : vector<8x8xf32>, vector<12x8xf32>, vector<8x12xf32> -> vector<8x12xf32>
    %cst_141 = arith.constant 0.353553385 : f32
    %420 = vector.broadcast %cst_141 : f32 to vector<8x12xf32>
    %421 = arith.mulf %419, %420 : vector<8x12xf32>
    %422 = vector.broadcast %348 : vector<1x12xf32> to vector<8x12xf32>
    %423 = arith.addf %421, %422 : vector<8x12xf32>
    %cst_142 = arith.constant dense<0xFF800000> : vector<8xf32>
    %424 = vector.multi_reduction <maximumf>, %423, %cst_142 [1] : vector<8x12xf32> to vector<8xf32>
    %425 = vector.shape_cast %424 : vector<8xf32> to vector<8x1xf32>
    %426 = vector.broadcast %425 : vector<8x1xf32> to vector<8x12xf32>
    %427 = arith.subf %423, %426 : vector<8x12xf32>
    %428 = math.exp %427 : vector<8x12xf32>
    %cst_143 = arith.constant dense<0.000000e+00> : vector<8xf32>
    %429 = vector.multi_reduction <add>, %428, %cst_143 [1] : vector<8x12xf32> to vector<8xf32>
    %430 = vector.shape_cast %429 : vector<8xf32> to vector<8x1xf32>
    %431 = tpu.reciprocal %430 : vector<8x1xf32> -> vector<8x1xf32>
    %432 = vector.broadcast %431 : vector<8x1xf32> to vector<8x12xf32>
    %433 = arith.mulf %428, %432 : vector<8x12xf32>
    %c7 = arith.constant 7 : index
    %c0_144 = arith.constant 0 : index
    %c0_145 = arith.constant 0 : index
    %434 = vector.load %arg19[%c7, %c0_144, %c0_145] : memref<8x8x12xf32, #tpu.memory_space<vmem>>, vector<1x8x12xf32>
    %435 = vector.shape_cast %434 : vector<1x8x12xf32> to vector<8x12xf32>
    %436 = vector.shape_cast %433 : vector<8x12xf32> to vector<1x8x12xf32>
    tpu.vector_store %arg19[%c7, %c0_144, %c0_145], %436 {strides = array<i32>} : memref<8x8x12xf32, #tpu.memory_space<vmem>>, vector<1x8x12xf32>,
    %437 = vector.extract_strided_slice %246 {offsets = [12, 0], sizes = [12, 32], strides = [1, 1]} : vector<24x32xf32> to vector<12x32xf32>
    %cst_146 = arith.constant dense<0.000000e+00> : vector<8x32xf32>
    %438 = tpu.matmul %433, %437, %cst_146 {dimension_numbers = #tpu.dot_dimension_numbers<[1], [0], [0], [1], [0, 0, 1, 1], [], []>} : vector<8x12xf32>, vector<12x32xf32>, vector<8x32xf32> -> vector<8x32xf32>
    %439 = arith.addf %416, %438 : vector<8x32xf32>
    %440 = vector.broadcast %12 : vector<1x32xf32> to vector<8x32xf32>
    %441 = arith.addf %439, %440 : vector<8x32xf32>
    %c8_147 = arith.constant 8 : index
    %c0_148 = arith.constant 0 : index
    %442 = vector.load %arg20[%c8_147, %c0_148] : memref<16x32xf32, #tpu.memory_space<vmem>>, vector<8x32xf32>
    tpu.vector_store %arg20[%c8_147, %c0_148], %441 {strides = array<i32>} : memref<16x32xf32, #tpu.memory_space<vmem>>, vector<8x32xf32>,
    %c0_149 = arith.constant 0 : index
    %c0_150 = arith.constant 0 : index
    %443 = vector.load %arg20[%c0_149, %c0_150] : memref<16x32xf32, #tpu.memory_space<vmem>>, vector<16x32xf32>
    %444 = arith.addf %222, %443 : vector<16x32xf32>
    %445 = vector.extract_strided_slice %4 {offsets = [1, 0, 0], sizes = [1, 1, 32], strides = [1, 1, 1]} : vector<3x2x32xf32> to vector<1x1x32xf32>
    %446 = vector.shape_cast %445 : vector<1x1x32xf32> to vector<1x32xf32>
    %447 = vector.extract_strided_slice %4 {offsets = [1, 1, 0], sizes = [1, 1, 32], strides = [1, 1, 1]} : vector<3x2x32xf32> to vector<1x1x32xf32>
    %448 = vector.shape_cast %447 : vector<1x1x32xf32> to vector<1x32xf32>
    %cst_151 = arith.constant dense<0.000000e+00> : vector<16xf32>
    %449 = vector.multi_reduction <add>, %444, %cst_151 [1] : vector<16x32xf32> to vector<16xf32>
    %450 = vector.shape_cast %449 : vector<16xf32> to vector<16x1xf32>
    %cst_152 = arith.constant 3.200000e+01 : f32
    %451 = vector.broadcast %cst_152 : f32 to vector<16x1xf32>
    %452 = arith.divf %450, %451 : vector<16x1xf32>
    %453 = vector.broadcast %452 : vector<16x1xf32> to vector<16x32xf32>
    %454 = arith.subf %444, %453 : vector<16x32xf32>
    %455 = arith.mulf %454, %454 : vector<16x32xf32>
    %cst_153 = arith.constant dense<0.000000e+00> : vector<16xf32>
    %456 = vector.multi_reduction <add>, %455, %cst_153 [1] : vector<16x32xf32> to vector<16xf32>
    %457 = vector.shape_cast %456 : vector<16xf32> to vector<16x1xf32>
    %cst_154 = arith.constant 3.200000e+01 : f32
    %458 = vector.broadcast %cst_154 : f32 to vector<16x1xf32>
    %459 = arith.divf %457, %458 : vector<16x1xf32>
    %460 = vector.broadcast %452 : vector<16x1xf32> to vector<16x32xf32>
    %461 = arith.subf %444, %460 : vector<16x32xf32>
    %cst_155 = arith.constant 9.99999974E-6 : f32
    %462 = vector.broadcast %cst_155 : f32 to vector<16x1xf32>
    %463 = arith.addf %459, %462 : vector<16x1xf32>
    %464 = math.rsqrt %463 : vector<16x1xf32>
    %465 = vector.broadcast %464 : vector<16x1xf32> to vector<16x32xf32>
    %466 = arith.mulf %461, %465 : vector<16x32xf32>
    %467 = vector.broadcast %446 : vector<1x32xf32> to vector<16x32xf32>
    %468 = arith.mulf %466, %467 : vector<16x32xf32>
    %469 = vector.broadcast %448 : vector<1x32xf32> to vector<16x32xf32>
    %470 = arith.addf %468, %469 : vector<16x32xf32>
    %c0_156 = arith.constant 0 : index
    %c0_157 = arith.constant 0 : index
    %471 = vector.load %arg14[%c0_156, %c0_157] : memref<32x64xf32, #tpu.memory_space<vmem>>, vector<32x64xf32>
    %cst_158 = arith.constant dense<0.000000e+00> : vector<16x64xf32>
    %472 = tpu.matmul %470, %471, %cst_158 {dimension_numbers = #tpu.dot_dimension_numbers<[1], [0], [0], [1], [0, 0, 1, 1], [], []>} : vector<16x32xf32>, vector<32x64xf32>, vector<16x64xf32> -> vector<16x64xf32>
    %c0_159 = arith.constant 0 : index
    %c0_160 = arith.constant 0 : index
    %473 = vector.load %arg15[%c0_159, %c0_160] : memref<1x64xf32, #tpu.memory_space<vmem>>, vector<1x64xf32>
    %474 = vector.broadcast %473 : vector<1x64xf32> to vector<16x64xf32>
    %475 = arith.addf %472, %474 : vector<16x64xf32>
    %cst_161 = arith.constant 0.000000e+00 : f32
    %476 = vector.broadcast %cst_161 : f32 to vector<16x64xf32>
    %477 = arith.maximumf %475, %476 : vector<16x64xf32>
    %c0_162 = arith.constant 0 : index
    %c0_163 = arith.constant 0 : index
    %478 = vector.load %arg16[%c0_162, %c0_163] : memref<64x32xf32, #tpu.memory_space<vmem>>, vector<64x32xf32>
    %cst_164 = arith.constant dense<0.000000e+00> : vector<16x32xf32>
    %479 = tpu.matmul %477, %478, %cst_164 {dimension_numbers = #tpu.dot_dimension_numbers<[1], [0], [0], [1], [0, 0, 1, 1], [], []>} : vector<16x64xf32>, vector<64x32xf32>, vector<16x32xf32> -> vector<16x32xf32>
    %c0_165 = arith.constant 0 : index
    %c0_166 = arith.constant 0 : index
    %480 = vector.load %arg17[%c0_165, %c0_166] : memref<1x32xf32, #tpu.memory_space<vmem>>, vector<1x32xf32>
    %481 = vector.broadcast %480 : vector<1x32xf32> to vector<16x32xf32>
    %482 = arith.addf %479, %481 : vector<16x32xf32>
    %483 = arith.addf %470, %482 : vector<16x32xf32>
    %484 = vector.extract_strided_slice %4 {offsets = [2, 0, 0], sizes = [1, 1, 32], strides = [1, 1, 1]} : vector<3x2x32xf32> to vector<1x1x32xf32>
    %485 = vector.shape_cast %484 : vector<1x1x32xf32> to vector<1x32xf32>
    %486 = vector.extract_strided_slice %4 {offsets = [2, 1, 0], sizes = [1, 1, 32], strides = [1, 1, 1]} : vector<3x2x32xf32> to vector<1x1x32xf32>
    %487 = vector.shape_cast %486 : vector<1x1x32xf32> to vector<1x32xf32>
    %cst_167 = arith.constant dense<0.000000e+00> : vector<16xf32>
    %488 = vector.multi_reduction <add>, %483, %cst_167 [1] : vector<16x32xf32> to vector<16xf32>
    %489 = vector.shape_cast %488 : vector<16xf32> to vector<16x1xf32>
    %cst_168 = arith.constant 3.200000e+01 : f32
    %490 = vector.broadcast %cst_168 : f32 to vector<16x1xf32>
    %491 = arith.divf %489, %490 : vector<16x1xf32>
    %492 = vector.broadcast %491 : vector<16x1xf32> to vector<16x32xf32>
    %493 = arith.subf %483, %492 : vector<16x32xf32>
    %494 = arith.mulf %493, %493 : vector<16x32xf32>
    %cst_169 = arith.constant dense<0.000000e+00> : vector<16xf32>
    %495 = vector.multi_reduction <add>, %494, %cst_169 [1] : vector<16x32xf32> to vector<16xf32>
    %496 = vector.shape_cast %495 : vector<16xf32> to vector<16x1xf32>
    %cst_170 = arith.constant 3.200000e+01 : f32
    %497 = vector.broadcast %cst_170 : f32 to vector<16x1xf32>
    %498 = arith.divf %496, %497 : vector<16x1xf32>
    %499 = vector.broadcast %491 : vector<16x1xf32> to vector<16x32xf32>
    %500 = arith.subf %483, %499 : vector<16x32xf32>
    %cst_171 = arith.constant 9.99999974E-6 : f32
    %501 = vector.broadcast %cst_171 : f32 to vector<16x1xf32>
    %502 = arith.addf %498, %501 : vector<16x1xf32>
    %503 = math.rsqrt %502 : vector<16x1xf32>
    %504 = vector.broadcast %503 : vector<16x1xf32> to vector<16x32xf32>
    %505 = arith.mulf %500, %504 : vector<16x32xf32>
    %506 = vector.broadcast %485 : vector<1x32xf32> to vector<16x32xf32>
    %507 = arith.mulf %505, %506 : vector<16x32xf32>
    %508 = vector.broadcast %487 : vector<1x32xf32> to vector<16x32xf32>
    %509 = arith.addf %507, %508 : vector<16x32xf32>
    %c0_172 = arith.constant 0 : index
    %c0_173 = arith.constant 0 : index
    %510 = vector.load %arg18[%c0_172, %c0_173] : memref<16x32xf32, #tpu.memory_space<vmem>>, vector<16x32xf32>
    tpu.vector_store %arg18[%c0_172, %c0_173], %509 {strides = array<i32>} : memref<16x32xf32, #tpu.memory_space<vmem>>, vector<16x32xf32>,
    return
  }
  func.func @transform_0(%arg0: i32) -> (i32, i32) {
    %c0_i32 = arith.constant 0 : i32
    %c0_i32_0 = arith.constant 0 : i32
    return %arg0, %c0_i32 : i32, i32
  }
  func.func @transform_1(%arg0: i32) -> (i32, i32) {
    %c0_i32 = arith.constant 0 : i32
    %c0_i32_0 = arith.constant 0 : i32
    return %arg0, %c0_i32 : i32, i32
  }
  func.func @transform_2(%arg0: i32) -> (i32, i32, i32) {
    %c0_i32 = arith.constant 0 : i32
    %c0_i32_0 = arith.constant 0 : i32
    %c0_i32_1 = arith.constant 0 : i32
    return %arg0, %c0_i32, %c0_i32_0 : i32, i32, i32
  }
  func.func @transform_3(%arg0: i32) -> (i32, i32, i32) {
    %c0_i32 = arith.constant 0 : i32
    %c0_i32_0 = arith.constant 0 : i32
    %c0_i32_1 = arith.constant 0 : i32
    return %arg0, %c0_i32, %c0_i32_0 : i32, i32, i32
  }
  func.func @transform_4(%arg0: i32) -> (i32, i32, i32) {
    %c0_i32 = arith.constant 0 : i32
    %c0_i32_0 = arith.constant 0 : i32
    %c0_i32_1 = arith.constant 0 : i32
    %c0_i32_2 = arith.constant 0 : i32
    return %c0_i32, %c0_i32_0, %c0_i32_1 : i32, i32, i32
  }
  func.func @transform_5(%arg0: i32) -> (i32, i32) {
    %c0_i32 = arith.constant 0 : i32
    %c0_i32_0 = arith.constant 0 : i32
    %c0_i32_1 = arith.constant 0 : i32
    return %c0_i32, %c0_i32_0 : i32, i32
  }
  func.func @transform_6(%arg0: i32) -> (i32, i32) {
    %c0_i32 = arith.constant 0 : i32
    %c0_i32_0 = arith.constant 0 : i32
    %c0_i32_1 = arith.constant 0 : i32
    return %c0_i32, %c0_i32_0 : i32, i32
  }
  func.func @transform_7(%arg0: i32) -> (i32, i32) {
    %c0_i32 = arith.constant 0 : i32
    %c0_i32_0 = arith.constant 0 : i32
    %c0_i32_1 = arith.constant 0 : i32
    return %c0_i32, %c0_i32_0 : i32, i32
  }
  func.func @transform_8(%arg0: i32) -> (i32, i32) {
    %c0_i32 = arith.constant 0 : i32
    %c0_i32_0 = arith.constant 0 : i32
    %c0_i32_1 = arith.constant 0 : i32
    return %c0_i32, %c0_i32_0 : i32, i32
  }
  func.func @transform_9(%arg0: i32) -> (i32, i32) {
    %c0_i32 = arith.constant 0 : i32
    %c0_i32_0 = arith.constant 0 : i32
    %c0_i32_1 = arith.constant 0 : i32
    return %c0_i32, %c0_i32_0 : i32, i32
  }
  func.func @transform_10(%arg0: i32) -> (i32, i32) {
    %c0_i32 = arith.constant 0 : i32
    %c0_i32_0 = arith.constant 0 : i32
    %c0_i32_1 = arith.constant 0 : i32
    return %c0_i32, %c0_i32_0 : i32, i32
  }
  func.func @transform_11(%arg0: i32) -> (i32, i32) {
    %c0_i32 = arith.constant 0 : i32
    %c0_i32_0 = arith.constant 0 : i32
    %c0_i32_1 = arith.constant 0 : i32
    return %c0_i32, %c0_i32_0 : i32, i32
  }
  func.func @transform_12(%arg0: i32) -> (i32, i32) {
    %c0_i32 = arith.constant 0 : i32
    %c0_i32_0 = arith.constant 0 : i32
    %c0_i32_1 = arith.constant 0 : i32
    return %c0_i32, %c0_i32_0 : i32, i32
  }
  func.func @transform_13(%arg0: i32) -> (i32, i32) {
    %c0_i32 = arith.constant 0 : i32
    %c0_i32_0 = arith.constant 0 : i32
    %c0_i32_1 = arith.constant 0 : i32
    return %c0_i32, %c0_i32_0 : i32, i32
  }
  func.func @transform_14(%arg0: i32) -> (i32, i32) {
    %c0_i32 = arith.constant 0 : i32
    %c0_i32_0 = arith.constant 0 : i32
    %c0_i32_1 = arith.constant 0 : i32
    return %c0_i32, %c0_i32_0 : i32, i32
  }
  func.func @transform_15(%arg0: i32) -> (i32, i32) {
    %c0_i32 = arith.constant 0 : i32
    %c0_i32_0 = arith.constant 0 : i32
    %c0_i32_1 = arith.constant 0 : i32
    return %c0_i32, %c0_i32_0 : i32, i32
  }
  func.func @transform_16(%arg0: i32) -> (i32, i32) {
    %c0_i32 = arith.constant 0 : i32
    %c0_i32_0 = arith.constant 0 : i32
    %c0_i32_1 = arith.constant 0 : i32
    return %c0_i32, %c0_i32_0 : i32, i32
  }
  func.func @transform_17(%arg0: i32) -> (i32, i32) {
    %c0_i32 = arith.constant 0 : i32
    %c0_i32_0 = arith.constant 0 : i32
    return %arg0, %c0_i32 : i32, i32
  }
  func.func @transform_18(%arg0: i32) -> (i32, i32, i32) {
    %c0_i32 = arith.constant 0 : i32
    %c0_i32_0 = arith.constant 0 : i32
    %c0_i32_1 = arith.constant 0 : i32
    return %arg0, %c0_i32, %c0_i32_0 : i32, i32, i32
  }
}

</mosaic_0001>

<bundles_post_ra>
// kernel: tpu_custom_call.1
= control target key start
LH: loop header
LB: loop body
LE: loop exit
PB: predicated region body
PF: predicated region fallthrough
CT: control target
= control target key end

     0   :  { %s5822_s27 = smov 0   ;;  %s6551_s0 = inlined_call_operand.vmem [shape: f32[64,32], index: 0, kind: input, shape index: {}]   ;;  %s6552_s1 = inlined_call_operand.vmem [shape: f32[96,32], index: 1, kind: input, shape index: {}]   ;;  %s6553_s2 = inlined_call_operand.vmem [shape: f32[8,8,8], index: 2, kind: input, shape index: {}]   ;;  %s6554_s3 = inlined_call_operand.vmem [shape: f32[8,1,12], index: 3, kind: input, shape index: {}]   ;;  %s6555_s4 = inlined_call_operand.vmem [shape: f32[3,2,32], index: 4, kind: input, shape index: {}]   ;;  %s6556_s5 = inlined_call_operand.vmem [shape: f32[32,96], index: 5, kind: input, shape index: {}]   ;;  %s6557_s6 = inlined_call_operand.vmem [shape: f32[1,96], index: 6, kind: input, shape index: {}]   ;;  %s6558_s7 = inlined_call_operand.vmem [shape: f32[32,32], index: 7, kind: input, shape index: {}]   ;;  %s6559_s8 = inlined_call_operand.vmem [shape: f32[1,32], index: 8, kind: input, shape index: {}]   ;;  %s6560_s9 = inlined_call_operand.vmem [shape: f32[32,96], index: 9, kind: input, shape index: {}]   ;;  %s6561_s10 = inlined_call_operand.vmem [shape: f32[1,96], index: 10, kind: input, shape index: {}]   ;;  %s6562_s11 = inlined_call_operand.vmem [shape: f32[32,32], index: 11, kind: input, shape index: {}]   ;;  %s6563_s12 = inlined_call_operand.vmem [shape: f32[1,32], index: 12, kind: input, shape index: {}]   ;;  %s6564_s13 = inlined_call_operand.vmem [shape: f32[32,64], index: 13, kind: input, shape index: {}]   ;;  %s6565_s14 = inlined_call_operand.vmem [shape: f32[1,64], index: 14, kind: input, shape index: {}]   ;;  %s6566_s15 = inlined_call_operand.vmem [shape: f32[64,32], index: 15, kind: input, shape index: {}]   ;;  %s6567_s16 = inlined_call_operand.vmem [shape: f32[1,32], index: 16, kind: input, shape index: {}]   ;;  %s6568_s17 = inlined_call_operand.vmem [shape: f32[64,32], index: 17, kind: output, shape index: {0}]   ;;  %s6569_s18 = inlined_call_operand.vmem [shape: f32[32,8,12], index: 18, kind: output, shape index: {1}]  }
   0x1   :  { %6576 = sst [smem:[#allocation3_spill]] %s6551_s0 }
   0x2   :  { %6577 = sst [smem:[#allocation4_spill]] %s6552_s1 }
   0x3   :  { %6578 = sst [smem:[#allocation5_spill]] %s6553_s2 }
   0x4 LB: > { %s5828_s28 = sadd.s32 4294967295, %s5710_s27   ;;  %p4864_p0 = scmp.ge.s32.totalorder %s5710_s27, 1  ;;  %s5710_s27 = sphi %s5822_s27, %s29_s27  }
   0x5   : > { %p548_p1 = scmp.lt.s32.totalorder %s5710_s27, 5 }
   0x7   : > { %p549_p2 = pnand %p4864_p0, %p548_p1 }
   0x8   : > { %v668_v0 = vld [vmem:[%s6556_s5] sm:$0xff] (!%p549_p2)  ;;  %v669_v1 = vld [vmem:[%s6556_s5 + $0x8] sm:$0xff] (!%p549_p2)  ;;  %v670_v2 = vld [vmem:[%s6556_s5 + $0x10] sm:$0xff] (!%p549_p2)  ;;  %s4865_s21 = sshll.u32 (!%p549_p2), %s5828_s28, 1  ;;  %vm694_vm0 = vcmask (!%p549_p2), 261120   ;;  %s6579_s26 = sld [smem:[#allocation3_spill]] (!%p549_p2) }
   0x9   : > { %552 = sbr.rel (%p549_p2) target bundleno = 7376 (0x1cd0), region = 88  ;;  %v5455_v3 = vpack.c.bf16 (!%p549_p2), %v669_v1, %v668_v0  ;;  %v671_v4 = vld [vmem:[%s6556_s5 + $0x18] sm:$0xff] (!%p549_p2)  ;;  %p622_p3 = scmp.lt.s32.totalorder (!%p549_p2), %s4865_s21, 7  ;;  %v5712_v9 = vmov (!%p549_p2), 0.0   ;;  %v673_v10 = vld [vmem:[%s6558_s7] sm:$0xff] (!%p549_p2)  ;;  %v674_v13 = vld [vmem:[%s6558_s7 + $0x8] sm:$0xff] (!%p549_p2) }
   0xa   : > { %v5459_v5 = vpack.c.bf16 (!%p549_p2), %v671_v4, %v670_v2  ;;  %v676_v8 = vld [vmem:[%s6558_s7 + $0x18] sm:$0xff] (!%p549_p2)  ;;  %5141 = vmatprep.subr.mxu1 (!%p549_p2), %v673_v10  ;;  %v4875_v11 = vld [vmem:[%s6557_s6] ss:$0 sm:$0xff] (!%p549_p2)  ;;  %s5713_s25 = smov (!%p549_p2), 88   ;;  %s5716_s30 = smov (!%p549_p2), 64   ;;  %vm782_vm1 = vcmask (!%p549_p2), 64512  }
   0xb   : > { %5456 = vmatprep.subr.bf16.mxu0 (!%p549_p2), %v5455_v3  ;;  %5142 = vmatpush3.msra.mxu1 (!%p549_p2), %v673_v10  ;;  %s5717_s0 = smov (!%p549_p2), 56   ;;  %s5718_s19 = smov (!%p549_p2), 48   ;;  %vm5720_vm2 = vmmov (!%p549_p2), 0   ;;  %v675_v37 = vld [vmem:[%s6558_s7 + $0x10] sm:$0xff] (!%p549_p2)  ;;  %vm3240_vm3 = vcmask (!%p549_p2), 1043456   ;;  %vm6211_vm4 = vmpackc.low (!%p549_p2), %vm782_vm1, %vm782_vm1  ;;  %vm5726_vm5 = vmmov (!%p549_p2), 1  }
   0xc   : > { %5458 = vmatpush3.bf16.msra.mxu0 (!%p549_p2), %v5455_v3  ;;  %5146 = vmatprep.subr.mxu1 (!%p549_p2), %v674_v13  ;;  %s5719_s1 = smov (!%p549_p2), 80   ;;  %s6580_s2 = sld [smem:[#allocation5_spill]] (!%p549_p2)  ;;  %vm6241_vm6 = vmpackc.low (!%p549_p2), %vm3240_vm3, %vm5726_vm5  ;;  %vm3127_vm7 = vcmask (!%p549_p2), 97280   ;;  %vm4613_vm8 = vcmask (!%p549_p2), 523264  }
   0xd   : > { %5460 = vmatprep.subr.bf16.mxu0 (!%p549_p2), %v5459_v5  ;;  %s6572_s20 = smov (!%p549_p2), 112   ;;  %s6570_s22 = smov (!%p549_p2), 104  }
  0x10   : > { %s6590_s21 = smov (!%p622_p3, %s4865_s21), 7  ;;  %5462 = vmatpush3.bf16.msra.mxu0 %v5459_v5 }
  0x11   : > { %s5848_s23 = sshll.u32 %s6590_s21, 3  ;;  %5156 = vmatprep.subr.mxu0 %v676_v8 }
  0x12   : > { %s625_s29 = scalar_lea.vmem %s6579_s26, %s5848_s23  ;;  %s5714_s26 = smov 40  }
  0x13   : > { %v5854_v6 = vld [vmem:[%s625_s29] sm:$0xff]  ;;  %v5856_v7 = vld [vmem:[%s625_s29 + $0x8] sm:$0xff]  ;;  %s5715_s29 = smov 120   ;;  %s5912_s24 = scalar_lea.vmem %s6580_s2, %s5848_s23 }
  0x14   : > { %5138 = vmatprep.mubr.msk.f32.mxu0 %vm694_vm0, %v5854_v6  ;;  %v5917_v28 = vld [vmem:[%s5912_s24] sm:$0xff]  ;;  %s627_s2 = smul.u32 3, %s5828_s28 }
  0x15   : > { %5139 = vmatmul.mubr.msk.f32.vlgmr.msra.gmra.mrb[0].mxu0 %vm694_vm0, %v5856_v7 }
  0x16   : > { %5157 = vmatpush3.msra.mxu0 %v676_v8  ;;  %p628_p4 = scmp.lt.s32.totalorder %s627_s2, 11 }
  0x17   : > { %5166 = vmatprep.subr.mxu0 %v5712_v9 }
  0x18   : > { %s6592_s2 = smov (!%p628_p4, %s627_s2), 11 }
  0xe8   : > { %v5140_v12 = vpop.f32.mrb[0].mxu0 }
  0xe9   : > { %v767_v14 = vpop.f32.mrb[1].mxu0  ;;  %v5880_v16 = vadd.f32 %v5140_v12, %v4875_v11 }
  0xea   : > { %v5875_v15 = vadd.f32 %v4875_v11, %v767_v14 }
  0xec   : > { %1202 = vrot.lane.b32.xlu1 %v5875_v15, %s5713_s25  ;;  %1028 = vrot.lane.b32.xlu0 %v5875_v15, %s5714_s26 }
  0xf0   : > { %1200 = vrot.lane.b32.xlu1 %v5875_v15, %s5715_s29  ;;  %1030 = vrot.lane.b32.xlu0 %v5880_v16, %s5714_s26  ;;  %s4867_s26 = sshll.u32 %s6592_s2, 3 }
  0xf4   : > { %780 = vrot.lane.b32.xlu1 %v5880_v16, %s5716_s30  ;;  %778 = vrot.lane.b32.xlu0 %v5875_v15, %s5716_s30  ;;  %s4873_s30 = sshll.u32 %s5828_s28, 3 }
  0xf5   : > { %p651_p5 = scmp.lt.s32.totalorder %s4873_s30, 31 }
  0xf7   : > { %s6594_s30 = smov (!%p651_p5, %s4873_s30), 31 }
  0xf8   : > { %864 = vrot.lane.b32.xlu1 %v5880_v16, %s5717_s0  ;;  %862 = vrot.lane.b32.xlu0 %v5875_v15, %s5717_s0  ;;  %s5721_s0 = smov 96   ;;  %s4874_s2 = sshll.u32 %s6594_s30, 3 }
  0xfc   : > { %947 = vrot.lane.b32.xlu1 %v5880_v16, %s5718_s19 }
 0x100   : > { %1439 = vrot.lane.b32.xlu1 %v5875_v15, %s5719_s1 }
 0x15e   : > { %v1203_v17 = vpop.permute.xlu1 %1202  ;;  %v1029_v18 = vpop.permute.xlu0 %1028 }
 0x15f   : > { %5158 = vmatprep.mubr.msk.f32.mxu0 %vm782_vm1, %v1029_v18 }
 0x162   : > { %v1201_v19 = vpop.permute.xlu1 %1200  ;;  %v1031_v20 = vpop.permute.xlu0 %1030 }
 0x163   : > { %5159 = vmatmul.mubr.msk.f32.vlgmr.msra.gmra.mrb[2].mxu0 %vm782_vm1, %v1031_v20 }
 0x164   : > { %5167 = vmatpush3.xpose.msk.msra.mxu0 %vm782_vm1, %v1203_v17  ;;  %5168 = vmatprep.mubr.msk.f32.mxu0 %vm5720_vm2, %v5712_v9 }
 0x165   : > { %5176 = vmatprep.subr.mxu0 %v5712_v9 }
 0x166   : > { %v781_v21 = vpop.permute.xlu1 %780  ;;  %v779_v22 = vpop.permute.xlu0 %778 }
 0x167   : > { %5143 = vmatprep.mubr.msk.f32.mxu1 %vm782_vm1, %v779_v22  ;;  %5169 = vmatmul.mubr.msk.f32.vlgmr.msra.gmra.mrb[4].mxu0 %vm782_vm1, %v1201_v19 }
 0x168   : > { %5144 = vmatmul.mubr.msk.f32.vlgmr.msra.gmra.mrb[0].mxu1 %vm782_vm1, %v781_v21  ;;  %5178 = vmatprep.mubr.msk.f32.mxu0 %vm5720_vm2, %v5712_v9 }
 0x169   : > { %5147 = vmatpush3.msra.mxu1 %v674_v13 }
 0x16a   : > { %v865_v23 = vpop.permute.xlu1 %864  ;;  %v863_v24 = vpop.permute.xlu0 %862  ;;  %5151 = vmatprep.subr.mxu1 %v675_v37 }
 0x16b   : > { %5148 = vmatprep.mubr.msk.f32.mxu1 %vm782_vm1, %v863_v24 }
 0x16c   : > { %5149 = vmatmul.mubr.msk.f32.vlgmr.msra.gmra.mrb[2].mxu1 %vm782_vm1, %v865_v23 }
 0x16d   : > { %5152 = vmatpush3.msra.mxu1 %v675_v37 }
 0x16e   : > { %5161 = vmatprep.subr.mxu1 %v5712_v9  ;;  %v948_v42 = vpop.permute.xlu1 %947 }
 0x172   : > { %v1440_v46 = vpop.permute.xlu1 %1439 }
 0x236   : > { %v5906_v25 = vpop.f32.mrb[2].mxu0 }
 0x237   : > { %v5914_v26 = vpop.f32.mrb[3].mxu0 }
 0x23a   : > { %v1274_v27 = vpop.f32.mrb[4].mxu0 }
 0x23b   : > { %v1278_v29 = vmul.f32 0.35355338, %v1274_v27  ;;  %v5919_v30 = vpop.f32.mrb[0].mxu1  ;;  %v5170_v31 = vpop.f32.mrb[5].mxu0 }
 0x23c   : > { %v853_v32 = vpop.f32.mrb[1].mxu1 }
 0x23d   : > { %5177 = vmatpush3.msra.mxu0 %v853_v32  ;;  %v1279_v33 = vadd.f32 %v1278_v29, %v5917_v28 }
 0x23e   : > { %5186 = vmatprep.subr.mxu0 %v5712_v9 }
 0x23f   : > { %v5923_v34 = vpop.f32.mrb[2].mxu1  ;;  %v1280_v35 = vsel %vm782_vm1, %v1279_v33, -inf }
 0x240   : > { %1281 = vmax.xlane.f32.xlu0 %v1280_v35  ;;  %v936_v36 = vpop.f32.mrb[3].mxu1 }
 0x256   : > { %945 = vrot.lane.b32.xlu0 %v5875_v15, %s5718_s19  ;;  %s6574_s19 = smov 72  }
 0x25a   : > { %1111 = vrot.lane.b32.xlu0 %v5875_v15, %s5721_s0 }
 0x25e   : > { %1437 = vrot.lane.b32.xlu0 %v5875_v15, %s6572_s20 }
 0x262   : > { %1602 = vrot.lane.b32.xlu0 %v5875_v15, %s6570_s22 }
 0x2cd   : > { %v1282_v38 = vpop.xlane.xlu0 %1281 }
 0x2ce   : > { %v1283_v39 = vsub.f32 %v1279_v33, %v1282_v38 }
 0x2d0   : > { %v1284_v40 = vmul.f32 1.442695, %v1283_v39 }
 0x2d1   : > { %v946_v41 = vpop.permute.xlu0 %945 }
 0x2d2   : > { %5628 = vpow2.f32 %v1284_v40  ;;  %5153 = vmatprep.mubr.msk.f32.mxu1 %vm782_vm1, %v946_v41 }
 0x2d3   : > { %5154 = vmatmul.mubr.msk.f32.vlgmr.msra.gmra.mrb[4].mxu1 %vm782_vm1, %v948_v42 }
 0x2d4   : > { %5163 = vmatprep.mubr.msk.f32.mxu1 %vm5720_vm2, %v5712_v9 }
 0x2d5   : > { %v1112_v43 = vpop.permute.xlu0 %1111 }
 0x2d6   : > { %5162 = vmatpush3.xpose.msk.msra.mxu1 %vm782_vm1, %v1112_v43 }
 0x2d7   : > { %5171 = vmatprep.subr.mxu1 %v5712_v9 }
 0x2d9   : > { %5164 = vmatmul.mubr.msk.f32.vlgmr.msra.gmra.mrb[6].mxu1 %vm782_vm1, %v5875_v15  ;;  %v1438_v50 = vpop.permute.xlu0 %1437 }
 0x2da   : > { %5172 = vmatpush3.msra.mxu1 %v936_v36  ;;  %5173 = vmatprep.mubr.msk.f32.mxu1 %vm5720_vm2, %v5712_v9 }
 0x2db   : > { %5181 = vmatprep.subr.mxu1 %v5712_v9 }
 0x2dc   : > { %v5629_v44 = vpop.eup %5628 }
 0x2dd   : > { %v1286_v45 = vsel %vm782_vm1, %v5629_v44, 0.0  ;;  %v1603_v52 = vpop.permute.xlu0 %1602 }
 0x2de   : > { %1287 = vadd.xlane.f32.xlu1 %v1286_v45 }
 0x2ef   : > { %1604 = vrot.lane.b32.xlu1 %v5875_v15, %s6574_s19 }
 0x36b   : > { %v1288_v47 = vpop.xlane.xlu1 %1287 }
 0x36c   : > { %5630 = vrcp.f32 %v1288_v47  ;;  %v6005_v47 = vld [vmem:[%s6559_s8] ss:$0 sm:$0xff] }
 0x36f   : > { %v1605_v51 = vpop.permute.xlu1 %1604 }
 0x376   : > { %v5631_v48 = vpop.eup %5630 }
 0x377   : > { %v1290_v49 = vmul.f32 %v5631_v48, %v5629_v44 }
 0x379   : > { %5174 = vmatmul.mubr.msk.f32.vlgmr.msra.gmra.mrb[8].mxu1 %vm782_vm1, %v1290_v49 }
 0x37a   : > { %5182 = vmatpush3.xpose.msk.msra.mxu1 %vm782_vm1, %v1440_v46  ;;  %5183 = vmatprep.mubr.msk.f32.mxu1 %vm5720_vm2, %v5712_v9 }
 0x37b   : > { %5191 = vmatprep.subr.mxu1 %v5712_v9 }
 0x37d   : > { %5184 = vmatmul.mubr.msk.f32.vlgmr.msra.gmra.mrb[10].mxu1 %vm782_vm1, %v1438_v50 }
 0x37e   : > { %5192 = vmatpush3.xpose.msk.msra.mxu1 %vm782_vm1, %v1605_v51  ;;  %5193 = vmatprep.mubr.msk.f32.mxu1 %vm5720_vm2, %v5712_v9 }
 0x37f   : > { %5201 = vmatprep.subr.mxu1 %v5712_v9 }
 0x381   : > { %5194 = vmatmul.mubr.msk.f32.vlgmr.msra.gmra.mrb[12].mxu1 %vm782_vm1, %v1603_v52  ;;  %v662_v52 = vld [vmem:[%s5912_s24 + $0x8] sm:$0xff] }
 0x382   : > { %5203 = vmatprep.mubr.msk.f32.mxu1 %vm5720_vm2, %v5712_v9 }
 0x3a6   : > { %v5965_v53 = vpop.f32.mrb[4].mxu1 }
 0x3a7   : > { %v1019_v54 = vpop.f32.mrb[5].mxu1 }
 0x3ac   : > { %v1183_v55 = vpop.f32.mrb[6].mxu1 }
 0x3ad   : > { %v1187_v56 = vmul.f32 0.35355338, %v1183_v55  ;;  %v5165_v57 = vpop.f32.mrb[7].mxu1 }
 0x3af   : > { %v1188_v58 = vadd.f32 %v1187_v56, %v5917_v28 }
 0x3b1   : > { %v1189_v59 = vsel %vm782_vm1, %v1188_v58, -inf }
 0x3b2   : > { %1190 = vmax.xlane.f32.xlu1 %v1189_v59 }
 0x43f   : > { %v1191_v60 = vpop.xlane.xlu1 %1190 }
 0x440   : > { %v1192_v61 = vsub.f32 %v1188_v58, %v1191_v60 }
 0x442   : > { %v1193_v62 = vmul.f32 1.442695, %v1192_v61 }
 0x444   : > { %5632 = vpow2.f32 %v1193_v62 }
 0x44c   : > { %v5969_v63 = vpop.f32.mrb[8].mxu1 }
 0x44d   : > { %v5175_v0 = vpop.f32.mrb[9].mxu1 }
 0x44e   : > { %v5633_v1 = vpop.eup %5632 }
 0x44f   : > { %v1195_v2 = vsel %vm782_vm1, %v5633_v1, 0.0 }
 0x450   : > { %1196 = vadd.xlane.f32.xlu1 %v1195_v2  ;;  %v1511_v3 = vpop.f32.mrb[10].mxu1 }
 0x451   : > { %v1515_v4 = vmul.f32 0.35355338, %v1511_v3  ;;  %v5185_v5 = vpop.f32.mrb[11].mxu1 }
 0x453   : > { %v1516_v8 = vadd.f32 %v1515_v4, %v5917_v28 }
 0x454   : > { %v1676_v10 = vpop.f32.mrb[12].mxu1 }
 0x455   : > { %v1680_v11 = vmul.f32 0.35355338, %v1676_v10  ;;  %v5195_v12 = vpop.f32.mrb[13].mxu1  ;;  %v1517_v13 = vsel %vm782_vm1, %v1516_v8, -inf }
 0x456   : > { %1518 = vmax.xlane.f32.xlu0 %v1517_v13 }
 0x457   : > { %v1681_v14 = vadd.f32 %v1680_v11, %v5917_v28 }
 0x459   : > { %v1682_v15 = vsel %vm782_vm1, %v1681_v14, -inf }
 0x45a   : > { %1683 = vmax.xlane.f32.xlu0 %v1682_v15 }
 0x4dd   : > { %v1197_v17 = vpop.xlane.xlu1 %1196 }
 0x4de   : > { %5634 = vrcp.f32 %v1197_v17 }
 0x4e3   : > { %v1519_v18 = vpop.xlane.xlu0 %1518 }
 0x4e4   : > { %v1520_v19 = vsub.f32 %v1516_v8, %v1519_v18 }
 0x4e6   : > { %v1521_v20 = vmul.f32 1.442695, %v1520_v19 }
 0x4e7   : > { %v1684_v21 = vpop.xlane.xlu0 %1683 }
 0x4e8   : > { %v5635_v22 = vpop.eup %5634  ;;  %5636 = vpow2.f32 %v1521_v20  ;;  %v1685_v23 = vsub.f32 %v1681_v14, %v1684_v21 }
 0x4e9   : > { %v1199_v24 = vmul.f32 %v5635_v22, %v5633_v1 }
 0x4ea   : > { %v1686_v27 = vmul.f32 1.442695, %v1685_v23 }
 0x4eb   : > { %5179 = vmatmul.mubr.msk.f32.vlgmr.msra.gmra.mrb[6].mxu0 %vm782_vm1, %v1199_v24 }
 0x4ec   : > { %5638 = vpow2.f32 %v1686_v27  ;;  %5187 = vmatpush3.msra.mxu0 %v1019_v54  ;;  %5188 = vmatprep.mubr.msk.f32.mxu0 %vm5720_vm2, %v5712_v9 }
 0x4ed   : > { %5196 = vmatprep.subr.mxu0 %v5712_v9 }
 0x4f2   : > { %v5637_v28 = vpop.eup %5636 }
 0x4f3   : > { %v1523_v29 = vsel %vm782_vm1, %v5637_v28, 0.0 }
 0x4f4   : > { %1524 = vadd.xlane.f32.xlu0 %v1523_v29 }
 0x4f6   : > { %v5639_v31 = vpop.eup %5638 }
 0x4f7   : > { %v1688_v32 = vsel %vm782_vm1, %v5639_v31, 0.0 }
 0x4f8   : > { %1689 = vadd.xlane.f32.xlu1 %v1688_v32 }
 0x509   : > { %1864 = vrot.lane.b32.xlu1 %v5880_v16, %s5715_s29 }
 0x50a   : > { %1866 = vrot.lane.b32.xlu0 %v5880_v16, %s5713_s25 }
 0x581   : > { %v1525_v33 = vpop.xlane.xlu0 %1524 }
 0x582   : > { %5640 = vrcp.f32 %v1525_v33 }
 0x585   : > { %v1690_v35 = vpop.xlane.xlu1 %1689  ;;  %v1867_v40 = vpop.permute.xlu0 %1866 }
 0x586   : > { %5642 = vrcp.f32 %v1690_v35 }
 0x589   : > { %v1865_v41 = vpop.permute.xlu1 %1864 }
 0x58c   : > { %v5641_v36 = vpop.eup %5640 }
 0x58d   : > { %v1527_v37 = vmul.f32 %v5641_v36, %v5637_v28 }
 0x58f   : > { %5189 = vmatmul.mubr.msk.f32.vlgmr.msra.gmra.mrb[8].mxu0 %vm782_vm1, %v1527_v37 }
 0x590   : > { %v5643_v38 = vpop.eup %5642  ;;  %5197 = vmatpush3.msra.mxu0 %v5914_v26  ;;  %5198 = vmatprep.mubr.msk.f32.mxu0 %vm5720_vm2, %v5712_v9 }
 0x591   : > { %v1692_v39 = vmul.f32 %v5643_v38, %v5639_v31  ;;  %5206 = vmatprep.subr.mxu0 %v5712_v9 }
 0x593   : > { %5199 = vmatmul.mubr.msk.f32.vlgmr.msra.gmra.mrb[10].mxu0 %vm782_vm1, %v1692_v39 }
 0x594   : > { %5208 = vmatprep.mubr.msk.f32.mxu0 %vm5720_vm2, %v5712_v9 }
 0x597   : > { %5207 = vmatpush3.xpose.msk.msra.mxu0 %vm782_vm1, %v1867_v40 }
 0x598   : > { %5216 = vmatprep.subr.mxu0 %v5712_v9 }
 0x59a   : > { %5209 = vmatmul.mubr.msk.f32.vlgmr.msra.gmra.mrb[12].mxu0 %vm782_vm1, %v1865_v41 }
 0x59b   : > { %5217 = vmatpush3.msra.mxu0 %v5919_v30  ;;  %5218 = vmatprep.mubr.msk.f32.mxu0 %vm5720_vm2, %v5712_v9 }
 0x59c   : > { %5226 = vmatprep.subr.mxu0 %v5712_v9 }
 0x5be   : > { %v1433_v26 = vpop.f32.mrb[6].mxu0 }
 0x5bf   : > { %v1434_v42 = vadd.f32 %v1433_v26, %v5969_v63  ;;  %v5180_v43 = vpop.f32.mrb[7].mxu0 }
 0x662   : > { %v1597_v44 = vpop.f32.mrb[8].mxu0 }
 0x663   : > { %v1601_v45 = vadd.f32 %v1597_v44, %v1434_v42  ;;  %v5190_v46 = vpop.f32.mrb[9].mxu0 }
 0x666   : > { %v1762_v48 = vpop.f32.mrb[10].mxu0 }
 0x667   : > { %v1766_v30 = vadd.f32 %v1762_v48, %v1601_v45  ;;  %v5200_v49 = vpop.f32.mrb[11].mxu0 }
 0x669   : > { %v1773_v50 = vadd.f32 %v6005_v47, %v1766_v30 }
 0x66b   : > { %1774 = vst.msk [vmem:[#allocation2] sm:$0xff] %vm694_vm0, %v1773_v50 }
 0x66d   : > { %v1938_v51 = vpop.f32.mrb[12].mxu0 }
 0x66e   : > { %v1942_v54 = vmul.f32 0.35355338, %v1938_v51  ;;  %v5210_v55 = vpop.f32.mrb[13].mxu0 }
 0x670   : > { %v1943_v56 = vadd.f32 %v1942_v54, %v662_v52 }
 0x672   : > { %v1944_v57 = vsel %vm782_vm1, %v1943_v56, -inf  ;;  %v2433_v41 = vld [vmem:[#allocation2] sm:$0xff] }
 0x673   : > { %1945 = vmax.xlane.f32.xlu1 %v1944_v57  ;;  %v2435_v43 = vadd.f32 %v2433_v41, %v5854_v6  ;;  %v5725_v41 = vmov 0.0|0.0  }
 0x675   : > { %v2437_v46 = vsel %vm694_vm0, %v2435_v43, 0.0 }
 0x684   : > { %2103 = vrot.lane.b32.xlu1 %v5880_v16, %s5719_s1 }
 0x688   : > { %2101 = vrot.lane.b32.xlu1 %v5880_v16, %s6572_s20  ;;  %s6262_s20 = scalar_lea.vmem %s6554_s3, %s6590_s21  ;;  %s6586_s21 = smov 72  }
 0x68c   : > { %2266 = vrot.lane.b32.xlu1 %v5880_v16, %s6570_s22 }
 0x700   : > { %v1946_v58 = vpop.xlane.xlu1 %1945 }
 0x701   : > { %v1947_v59 = vsub.f32 %v1943_v56, %v1946_v58 }
 0x703   : > { %v1948_v60 = vmul.f32 1.442695, %v1947_v59 }
 0x704   : > { %v2104_v1 = vpop.permute.xlu1 %2103 }
 0x705   : > { %5644 = vpow2.f32 %v1948_v60 }
 0x708   : > { %v2102_v4 = vpop.permute.xlu1 %2101 }
 0x70f   : > { %v5645_v61 = vpop.eup %5644 }
 0x710   : > { %v1950_v62 = vsel %vm782_vm1, %v5645_v61, 0.0 }
 0x711   : > { %1951 = vadd.xlane.f32.xlu0 %v1950_v62  ;;  %v2464_v62 = vlaneseq }
 0x727   : > { %1775 = vrot.lane.b32.xlu0 %v5880_v16, %s5721_s0 }
 0x72b   : > { %2268 = vrot.lane.b32.xlu0 %v5880_v16, %s6574_s19  ;;  %s6581_s19 = sld [smem:[#allocation4_spill]] }
 0x731   : > { %s631_s22 = scalar_lea.vmem %s6581_s19, %s4867_s26  ;;  %s6587_s19 = smov 112  }
 0x732   : > { %s6310_s26 = scalar_lea.vmem %s6569_s18, %s4874_s2 }
 0x79e   : > { %v1952_v63 = vpop.xlane.xlu0 %1951 }
 0x79f   : > { %5646 = vrcp.f32 %v1952_v63 }
 0x7a2   : > { %v1776_v0 = vpop.permute.xlu0 %1775 }
 0x7a3   : > { %5202 = vmatpush3.xpose.msk.msra.mxu1 %vm782_vm1, %v1776_v0  ;;  %v2465_v0 = vshrl.u32 %v2464_v62, 7 }
 0x7a4   : > { %5211 = vmatprep.subr.mxu1 %v5712_v9 }
 0x7a6   : > { %5204 = vmatmul.mubr.msk.f32.vlgmr.msra.gmra.mrb[14].mxu1 %vm782_vm1, %v5880_v16  ;;  %v2269_v16 = vpop.permute.xlu0 %2268 }
 0x7a7   : > { %5212 = vmatpush3.msra.mxu1 %v5923_v34  ;;  %5213 = vmatprep.mubr.msk.f32.mxu1 %vm5720_vm2, %v5712_v9  ;;  %v2267_v34 = vpop.permute.xlu1 %2266 }
 0x7a8   : > { %5221 = vmatprep.subr.mxu1 %v5712_v9 }
 0x7a9   : > { %v5647_v2 = vpop.eup %5646 }
 0x7aa   : > { %v1954_v3 = vmul.f32 %v5647_v2, %v5645_v61  ;;  %v6068_v2 = vsub.s32 1, %v2465_v0 }
 0x7ac   : > { %5214 = vmatmul.mubr.msk.f32.vlgmr.msra.gmra.mrb[16].mxu1 %vm782_vm1, %v1954_v3 }
 0x7ad   : > { %5223 = vmatprep.mubr.msk.f32.mxu1 %vm5720_vm2, %v5712_v9 }
 0x7ae   : > { %5222 = vmatpush3.xpose.msk.msra.mxu1 %vm782_vm1, %v2104_v1  ;;  %v6063_v1 = vsub.s32 0, %v2465_v0 }
 0x7af   : > { %5231 = vmatprep.subr.mxu1 %v5712_v9 }
 0x7b1   : > { %5224 = vmatmul.mubr.msk.f32.vlgmr.msra.gmra.mrb[18].mxu1 %vm782_vm1, %v2102_v4 }
 0x7b2   : > { %5232 = vmatpush3.xpose.msk.msra.mxu1 %vm782_vm1, %v2269_v16  ;;  %5233 = vmatprep.mubr.msk.f32.mxu1 %vm5720_vm2, %v5712_v9 }
 0x7b5   : > { %5234 = vmatmul.mubr.msk.f32.vlgmr.msra.gmra.mrb[20].mxu1 %vm782_vm1, %v2267_v34 }
 0x879   : > { %v1847_v5 = vpop.f32.mrb[14].mxu1 }
 0x87a   : > { %v1851_v8 = vmul.f32 0.35355338, %v1847_v5  ;;  %v5205_v10 = vpop.f32.mrb[15].mxu1 }
 0x87c   : > { %v1852_v11 = vadd.f32 %v1851_v8, %v662_v52 }
 0x87e   : > { %v1853_v12 = vsel %vm782_vm1, %v1852_v11, -inf }
 0x87f   : > { %1854 = vmax.xlane.f32.xlu0 %v1853_v12  ;;  %v6041_v13 = vpop.f32.mrb[16].mxu1 }
 0x880   : > { %v5215_v14 = vpop.f32.mrb[17].mxu1 }
 0x884   : > { %v2175_v15 = vpop.f32.mrb[18].mxu1 }
 0x885   : > { %v2179_v17 = vmul.f32 0.35355338, %v2175_v15  ;;  %v5225_v18 = vpop.f32.mrb[19].mxu1 }
 0x887   : > { %v2180_v19 = vadd.f32 %v2179_v17, %v662_v52 }
 0x888   : > { %v2340_v20 = vpop.f32.mrb[20].mxu1 }
 0x889   : > { %v2344_v21 = vmul.f32 0.35355338, %v2340_v20  ;;  %v5235_v22 = vpop.f32.mrb[21].mxu1  ;;  %v2181_v23 = vsel %vm782_vm1, %v2180_v19, -inf }
 0x88a   : > { %2182 = vmax.xlane.f32.xlu1 %v2181_v23 }
 0x88b   : > { %v2345_v24 = vadd.f32 %v2344_v21, %v662_v52 }
 0x88d   : > { %v2346_v27 = vsel %vm782_vm1, %v2345_v24, -inf }
 0x88e   : > { %2347 = vmax.xlane.f32.xlu0 %v2346_v27  ;;  %v679_v27 = vld [vmem:[%s6560_s9 + $0x8] sm:$0xff] }
 0x90c   : > { %v1855_v28 = vpop.xlane.xlu0 %1854 }
 0x90d   : > { %v1856_v29 = vsub.f32 %v1852_v11, %v1855_v28 }
 0x90f   : > { %v1857_v31 = vmul.f32 1.442695, %v1856_v29 }
 0x911   : > { %5648 = vpow2.f32 %v1857_v31 }
 0x917   : > { %v2183_v32 = vpop.xlane.xlu1 %2182 }
 0x918   : > { %v2184_v33 = vsub.f32 %v2180_v19, %v2183_v32 }
 0x91a   : > { %v2185_v35 = vmul.f32 1.442695, %v2184_v33 }
 0x91b   : > { %v5649_v36 = vpop.eup %5648  ;;  %v2348_v37 = vpop.xlane.xlu0 %2347 }
 0x91c   : > { %5650 = vpow2.f32 %v2185_v35  ;;  %v2349_v38 = vsub.f32 %v2345_v24, %v2348_v37  ;;  %v1859_v39 = vsel %vm782_vm1, %v5649_v36, 0.0  ;;  %v680_v37 = vld [vmem:[%s6560_s9 + $0x10] sm:$0xff] }
 0x91d   : > { %1860 = vadd.xlane.f32.xlu0 %v1859_v39 }
 0x91e   : > { %v2350_v40 = vmul.f32 1.442695, %v2349_v38  ;;  %v681_v38 = vld [vmem:[%s6560_s9 + $0x18] sm:$0xff] }
 0x920   : > { %5652 = vpow2.f32 %v2350_v40  ;;  %v5593_v40 = vpack.i.bf16 %v681_v38, %v680_v37 }
 0x926   : > { %v5651_v26 = vpop.eup %5650 }
 0x927   : > { %v2187_v42 = vsel %vm782_vm1, %v5651_v26, 0.0 }
 0x928   : > { %2188 = vadd.xlane.f32.xlu1 %v2187_v42  ;;  %v5467_v42 = vpack.c.bf16 %v681_v38, %v680_v37 }
 0x92a   : > { %v5653_v44 = vpop.eup %5652 }
 0x92b   : > { %v2352_v45 = vsel %vm782_vm1, %v5653_v44, 0.0 }
 0x92c   : > { %2353 = vadd.xlane.f32.xlu0 %v2352_v45  ;;  %2438 = vadd.xlane.f32.xlu1 %v2437_v46 }
 0x9aa   : > { %v1861_v48 = vpop.xlane.xlu0 %1860 }
 0x9ab   : > { %5654 = vrcp.f32 %v1861_v48 }
 0x9b5   : > { %v5655_v30 = vpop.eup %5654  ;;  %v2189_v49 = vpop.xlane.xlu1 %2188 }
 0x9b6   : > { %v1863_v50 = vmul.f32 %v5655_v30, %v5649_v36  ;;  %5656 = vrcp.f32 %v2189_v49 }
 0x9b8   : > { %5219 = vmatmul.mubr.msk.f32.vlgmr.msra.gmra.mrb[14].mxu0 %vm782_vm1, %v1863_v50 }
 0x9b9   : > { %5227 = vmatpush3.msra.mxu0 %v5965_v53  ;;  %v2354_v51 = vpop.xlane.xlu0 %2353  ;;  %v2439_v6 = vpop.xlane.xlu1 %2438  ;;  %5228 = vmatprep.mubr.msk.f32.mxu0 %vm5720_vm2, %v5712_v9 }
 0x9ba   : > { %5658 = vrcp.f32 %v2354_v51  ;;  %v2444_v52 = vmul.f32 0.03125, %v2439_v6  ;;  %5236 = vmatprep.subr.mxu0 %v5712_v9  ;;  %v658_v51 = vld [vmem:[%s631_s22] sm:$0xff]  ;;  %v659_v6 = vld [vmem:[%s631_s22 + $0x8] sm:$0xff] }
 0x9bc   : > { %v2446_v54 = vsub.f32 %v2435_v43, %v2444_v52  ;;  %v6108_v43 = vld [vmem:[%s6561_s10] ss:$0 sm:$0xff] }
 0x9be   : > { %v2448_v55 = vmul.f32 %v2446_v54, %v2446_v54 }
 0x9c0   : > { %v5657_v56 = vpop.eup %5656  ;;  %v2450_v57 = vsel %vm694_vm0, %v2448_v55, 0.0  ;;  %v660_v55 = vld [vmem:[%s631_s22 + $0x10] sm:$0xff] }
 0x9c1   : > { %v2191_v58 = vmul.f32 %v5657_v56, %v5651_v26  ;;  %2451 = vadd.xlane.f32.xlu1 %v2450_v57 }
 0x9c3   : > { %5229 = vmatmul.mubr.msk.f32.vlgmr.msra.gmra.mrb[16].mxu0 %vm782_vm1, %v2191_v58  ;;  %v683_v58 = vld [vmem:[%s6562_s11] sm:$0xff] }
 0x9c4   : > { %v5659_v59 = vpop.eup %5658  ;;  %5237 = vmatpush3.msra.mxu0 %v5906_v25  ;;  %5238 = vmatprep.mubr.msk.f32.mxu0 %vm5720_vm2, %v5712_v9  ;;  %v665_v25 = vld [vmem:[%s6555_s4] sm:$0x3] }
 0x9c5   : > { %v2356_v53 = vmul.f32 %v5659_v59, %v5653_v44  ;;  %v6071_v3 = vrot.slane %v665_v25, %v6063_v1  ;;  %v6074_v34 = vrot.slane %v665_v25, %v6068_v2  ;;  %5471 = vmatprep.subr.bf16.mxu0 %v5725_v41  ;;  %v684_v25 = vld [vmem:[%s6562_s11 + $0x8] sm:$0xff] }
 0x9c7   : > { %5239 = vmatmul.mubr.msk.f32.vlgmr.msra.gmra.mrb[18].mxu0 %vm782_vm1, %v2356_v53 }
 0x9c8   : > { %5260 = vmatprep.mubr.msk.f32.mxu0 %vm5720_vm2, %v5712_v9 }
 0xa4e   : > { %v2452_v60 = vpop.xlane.xlu1 %2451 }
 0xa4f   : > { %v2456_v61 = vmul.f32 0.03125, %v2452_v60 }
 0xa51   : > { %v2458_v63 = vadd.f32 1e-05, %v2456_v61 }
 0xa53   : > { %5660 = vrsqrt.f32 %v2458_v63 }
 0xa5d   : > { %v5661_v4 = vpop.eup %5660 }
 0xa5e   : > { %v2462_v16 = vmul.f32 %v5661_v4, %v2446_v54 }
 0xa60   : > { %v2468_v5 = vmul.f32 %v6071_v3, %v2462_v16 }
 0xa62   : > { %v6078_v8 = vadd.f32 %v6074_v34, %v2468_v5 }
 0xa64   : > { %5249 = vmatprep.mubr.msk.f32.mxu1 %vm694_vm0, %v6078_v8 }
 0xa8b   : > { %v2097_v10 = vpop.f32.mrb[14].mxu0 }
 0xa8c   : > { %v2098_v11 = vadd.f32 %v2097_v10, %v6041_v13  ;;  %v5220_v12 = vpop.f32.mrb[15].mxu0  ;;  %v678_v13 = vld [vmem:[%s6560_s9] sm:$0xff] }
 0xa8d   : > { %v5588_v28 = vpack.i.bf16 %v679_v27, %v678_v13  ;;  %v5463_v26 = vpack.c.bf16 %v679_v27, %v678_v13 }
 0xa8f   : > { %5589 = vrot.lane.b32.xlu1 %v5588_v28, %s5721_s0  ;;  %5464 = vmatprep.subr.bf16.mxu1 %v5463_v26 }
 0xa90   : > { %5466 = vmatpush3.bf16.msra.mxu1 %v5463_v26 }
 0xa91   : > { %5468 = vmatprep.subr.bf16.mxu1 %v5467_v42 }
 0xa93   : > { %2579 = vrot.lane.b32.xlu1 %v6108_v43, %s5721_s0 }
 0xa94   : > { %5470 = vmatpush3.bf16.msra.mxu1 %v5467_v42 }
 0xa95   : > { %5269 = vmatprep.subr.mxu1 %v5712_v9 }
 0xa96   : > { %v2261_v14 = vpop.f32.mrb[16].mxu0 }
 0xa97   : > { %v2265_v15 = vadd.f32 %v2261_v14, %v2098_v11  ;;  %v5230_v17 = vpop.f32.mrb[17].mxu0 }
 0xa9a   : > { %v2426_v18 = vpop.f32.mrb[18].mxu0 }
 0xa9b   : > { %v2430_v19 = vadd.f32 %v2426_v18, %v2265_v15  ;;  %v5240_v20 = vpop.f32.mrb[19].mxu0 }
 0xa9d   : > { %v2431_v21 = vadd.f32 %v6005_v47, %v2430_v19  ;;  %v685_v19 = vld [vmem:[%s6562_s11 + $0x10] sm:$0xff] }
 0xa9f   : > { %2432 = vst.msk [vmem:[#allocation2 + $0x8] sm:$0xff] %vm694_vm0, %v2431_v21 }
 0xaa6   : > { %v2434_v22 = vld [vmem:[#allocation2 + $0x8] sm:$0xff] }
 0xaa7   : > { %v2436_v23 = vadd.f32 %v2434_v22, %v5856_v7 }
 0xaa9   : > { %v2440_v24 = vsel %vm694_vm0, %v2436_v23, 0.0 }
 0xaaa   : > { %2441 = vadd.xlane.f32.xlu0 %v2440_v24 }
 0xb01   : > { %v5590_v33 = vpop.permute.xlu1 %5589 }
 0xb02   : > { %v5592_v35 = vunpack.i.h.bf16 %v5590_v33  ;;  %v5591_v36 = vunpack.i.l.bf16 %v5590_v33 }
 0xb04   : > { %v5472_v39 = vpack.c.bf16 %v5592_v35, %v5591_v36  ;;  %v686_v36 = vld [vmem:[%s6562_s11 + $0x18] sm:$0xff] }
 0xb05   : > { %v2580_v59 = vpop.permute.xlu1 %2579 }
 0xb06   : > { %5473 = vmatpush3.bf16.msra.mxu0 %v5472_v39 }
 0xb07   : > { %5474 = vmatprep.subr.bf16.mxu0 %v5725_v41 }
 0xb37   : > { %v2442_v47 = vpop.xlane.xlu0 %2441 }
 0xb38   : > { %v2445_v29 = vmul.f32 0.03125, %v2442_v47 }
 0xb3a   : > { %v2447_v31 = vsub.f32 %v2436_v23, %v2445_v29 }
 0xb3c   : > { %v2449_v32 = vmul.f32 %v2447_v31, %v2447_v31 }
 0xb3e   : > { %v2453_v7 = vsel %vm694_vm0, %v2449_v32, 0.0 }
 0xb3f   : > { %2454 = vadd.xlane.f32.xlu0 %v2453_v7 }
 0xb55   : > { %5594 = vrot.lane.b32.xlu0 %v5593_v40, %s5721_s0 }
 0xbcc   : > { %v2455_v44 = vpop.xlane.xlu0 %2454 }
 0xbcd   : > { %v2457_v45 = vmul.f32 0.03125, %v2455_v44 }
 0xbcf   : > { %v2459_v46 = vadd.f32 1e-05, %v2457_v45 }
 0xbd0   : > { %v5595_v48 = vpop.permute.xlu0 %5594 }
 0xbd1   : > { %5662 = vrsqrt.f32 %v2459_v46  ;;  %v5597_v30 = vunpack.i.h.bf16 %v5595_v48  ;;  %v5596_v49 = vunpack.i.l.bf16 %v5595_v48 }
 0xbd3   : > { %v5475_v50 = vpack.c.bf16 %v5597_v30, %v5596_v49 }
 0xbd5   : > { %5476 = vmatpush3.bf16.msra.mxu0 %v5475_v50 }
 0xbd6   : > { %5280 = vmatprep.subr.mxu0 %v5712_v9 }
 0xbd8   : > { %5261 = vmatmul.mubr.msk.f32.vlgmr.msra.gmra.mrb[20].mxu0 %vm694_vm0, %v658_v51 }
 0xbd9   : > { %5263 = vmatprep.mubr.msk.f32.mxu0 %vm5720_vm2, %v5712_v9  ;;  %5281 = vmatpush3.msra.mxu0 %v684_v25 }
 0xbda   : > { %5302 = vmatprep.subr.mxu0 %v5712_v9 }
 0xbdb   : > { %v5663_v52 = vpop.eup %5662 }
 0xbdc   : > { %v2463_v54 = vmul.f32 %v5663_v52, %v2447_v31  ;;  %5264 = vmatmul.mubr.msk.f32.gmra.mrb[22].mxu0 %vm694_vm0, %v659_v6 }
 0xbdd   : > { %5266 = vmatprep.mubr.msk.f32.mxu0 %vm5720_vm2, %v5712_v9 }
 0xbde   : > { %v2469_v56 = vmul.f32 %v6071_v3, %v2463_v54 }
 0xbe0   : > { %5267 = vmatmul.mubr.msk.f32.gmra.mrb[24].mxu0 %vm694_vm0, %v660_v55  ;;  %v6126_v57 = vadd.f32 %v6074_v34, %v2469_v56 }
 0xbe1   : > { %5282 = vmatprep.mubr.msk.f32.mxu0 %vm5720_vm2, %v5712_v9 }
 0xbe2   : > { %5250 = vmatmul.mubr.msk.f32.vlgmr.msra.gmra.mrb[22].mxu1 %vm694_vm0, %v6126_v57 }
 0xbe3   : > { %5271 = vmatprep.mubr.msk.f32.mxu1 %vm5720_vm2, %v5712_v9  ;;  %5270 = vmatpush3.msra.mxu1 %v683_v58 }
 0xbe4   : > { %5291 = vmatprep.subr.mxu1 %v5712_v9 }
 0xcab   : > { %v2657_v53 = vpop.f32.mrb[20].mxu0 }
 0xcac   : > { %v6138_v60 = vadd.f32 %v2657_v53, %v2580_v59  ;;  %v5262_v61 = vpop.f32.mrb[21].mxu0 }
 0xcae   : > { %2674 = vrot.lane.b32.xlu1 %v6138_v60, %s5721_s0 }
 0xcaf   : > { %v2662_v62 = vpop.f32.mrb[22].mxu0 }
 0xcb0   : > { %v6142_v63 = vadd.f32 %v2662_v62, %v2580_v59  ;;  %v5265_v0 = vpop.f32.mrb[23].mxu0 }
 0xcb2   : > { %2676 = vrot.lane.b32.xlu0 %v6142_v63, %s5721_s0  ;;  %v3746_v11 = vrot.slane %v6142_v63, 4  ;;  %v6164_v12 = vpack.i.bf16 %v6142_v63, %v6138_v60 }
 0xcb3   : > { %v2667_v3 = vpop.f32.mrb[24].mxu0 }
 0xcb4   : > { %v6149_v4 = vadd.f32 %v2667_v3, %v2580_v59  ;;  %v5268_v16 = vpop.f32.mrb[25].mxu0 }
 0xcb5   : > { %v6152_v34 = vpop.f32.mrb[22].mxu1  ;;  %v6268_v16 = vld [vmem:[%s6262_s20] ss:$0 sm:$0xff] }
 0xcb6   : > { %v6155_v5 = vrot.slane %v6149_v4, 4  ;;  %v2554_v10 = vpop.f32.mrb[23].mxu1  ;;  %2858 = vrot.lane.b32.xlu0 %v6138_v60, %s5719_s1  ;;  %2678 = vrot.lane.b32.xlu1 %v6149_v4, %s5721_s0  ;;  %s648_s0 = scalar_lea.vmem %s6568_s17, %s5848_s23 }
 0xcb7   : > { %v6181_v18 = vadd.f32 %v6108_v43, %v2554_v10 }
 0xcb8   : > { %v6168_v14 = vsel %vm3240_vm3, %v3746_v11, %v6155_v5 }
 0xcb9   : > { %v6172_v15 = vpack.i.bf16 %v6155_v5, %v6168_v14  ;;  %v5510_v17 = vpack.c.bf16 %v6155_v5, %v6168_v14 }
 0xcba   : > { %2860 = vrot.lane.b32.xlu0 %v6142_v63, %s5719_s1  ;;  %5599 = vrot.lane.b32.xlu1 %v6164_v12, %s5715_s29 }
 0xcbe   : > { %3140 = vrot.lane.b32.xlu0 %v6181_v18, %s5715_s29  ;;  %2862 = vrot.lane.b32.xlu1 %v6149_v4, %s5719_s1 }
 0xcc2   : > { %2768 = vrot.lane.b32.xlu0 %v6142_v63, %s5713_s25  ;;  %2766 = vrot.lane.b32.xlu1 %v6138_v60, %s5713_s25 }
 0xcc6   : > { %2770 = vrot.lane.b32.xlu0 %v6149_v4, %s5713_s25  ;;  %s6588_s25 = smov 104  }
 0xd20   : > { %v2675_v20 = vpop.permute.xlu1 %2674 }
 0xd21   : > { %5272 = vmatmul.mubr.msk.f32.vlgmr.msra.gmra.mrb[24].mxu1 %vm782_vm1, %v2675_v20 }
 0xd22   : > { %5274 = vmatprep.mubr.msk.f32.mxu1 %vm5720_vm2, %v5712_v9  ;;  %5292 = vmatpush3.msra.mxu1 %v685_v19 }
 0xd23   : > { %5481 = vmatprep.subr.bf16.mxu1 %v5725_v41 }
 0xd24   : > { %v2677_v21 = vpop.permute.xlu0 %2676 }
 0xd25   : > { %5275 = vmatmul.mubr.msk.f32.gmra.mrb[26].mxu1 %vm782_vm1, %v2677_v21 }
 0xd26   : > { %5277 = vmatprep.mubr.msk.f32.mxu1 %vm5720_vm2, %v5712_v9 }
 0xd28   : > { %v2859_v22 = vpop.permute.xlu0 %2858  ;;  %v2679_v23 = vpop.permute.xlu1 %2678 }
 0xd29   : > { %5278 = vmatmul.mubr.msk.f32.gmra.mrb[28].mxu1 %vm782_vm1, %v2679_v23 }
 0xd2a   : > { %5293 = vmatprep.mubr.msk.f32.mxu1 %vm5720_vm2, %v5712_v9 }
 0xd2c   : > { %v2861_v24 = vpop.permute.xlu0 %2860  ;;  %v5600_v13 = vpop.permute.xlu1 %5599 }
 0xd2d   : > { %v5602_v27 = vunpack.i.h.bf16 %v5600_v13  ;;  %v5601_v28 = vunpack.i.l.bf16 %v5600_v13  ;;  %5294 = vmatmul.mubr.msk.f32.vlgmr.msra.gmra.mrb[30].mxu1 %vm782_vm1, %v2859_v22 }
 0xd2e   : > { %5296 = vmatprep.mubr.msk.f32.mxu1 %vm5720_vm2, %v5712_v9 }
 0xd2f   : > { %v5482_v47 = vpack.c.bf16 %v5602_v27, %v5601_v28 }
 0xd30   : > { %v3141_v31 = vpop.permute.xlu0 %3140  ;;  %v2863_v32 = vpop.permute.xlu1 %2862 }
 0xd31   : > { %5297 = vmatmul.mubr.msk.f32.gmra.mrb[32].mxu1 %vm782_vm1, %v2861_v24 }
 0xd32   : > { %5484 = vmatpush3.bf16.xpose.msk.msra.mxu1 %vm6211_vm4, %v5482_v47  ;;  %5299 = vmatprep.mubr.msk.f32.mxu1 %vm5720_vm2, %v5712_v9 }
 0xd33   : > { %5489 = vmatprep.subr.bf16.mxu1 %v5725_v41 }
 0xd34   : > { %v2767_v7 = vpop.permute.xlu1 %2766  ;;  %v2769_v33 = vpop.permute.xlu0 %2768 }
 0xd35   : > { %5283 = vmatmul.mubr.msk.f32.vlgmr.msra.gmra.mrb[26].mxu0 %vm782_vm1, %v2767_v7  ;;  %5300 = vmatmul.mubr.msk.f32.gmra.mrb[34].mxu1 %vm782_vm1, %v2863_v32 }
 0xd36   : > { %5285 = vmatprep.mubr.msk.f32.mxu0 %vm5720_vm2, %v5712_v9  ;;  %5324 = vmatprep.mubr.msk.f32.mxu1 %vm5720_vm2, %v5712_v9 }
 0xd37   : > { %5303 = vmatpush3.msra.mxu0 %v686_v36 }
 0xd38   : > { %v2771_v35 = vpop.permute.xlu0 %2770  ;;  %5477 = vmatprep.subr.bf16.mxu0 %v5725_v41 }
 0xd39   : > { %5286 = vmatmul.mubr.msk.f32.gmra.mrb[28].mxu0 %vm782_vm1, %v2769_v33  ;;  %5325 = vmatmul.mubr.msk.f32.vlgmr.msra.gmra.mrb[36].mxu1 %vm782_vm1, %v3141_v31 }
 0xd3a   : > { %5288 = vmatprep.mubr.msk.f32.mxu0 %vm5720_vm2, %v5712_v9  ;;  %5338 = vmatprep.mubr.msk.f32.mxu1 %vm5720_vm2, %v5712_v9 }
 0xd3d   : > { %5289 = vmatmul.mubr.msk.f32.gmra.mrb[30].mxu0 %vm782_vm1, %v2771_v35  ;;  %v5478_v35 = vpack.c.bf16 %v6142_v63, %v6138_v60 }
 0xd3e   : > { %5304 = vmatprep.mubr.msk.f32.mxu0 %vm5720_vm2, %v5712_v9 }
 0xdf4   : > { %v2752_v37 = vpop.f32.mrb[24].mxu1 }
 0xdf5   : > { %v5273_v38 = vpop.f32.mrb[25].mxu1 }
 0xdf8   : > { %v2757_v39 = vpop.f32.mrb[26].mxu1 }
 0xdf9   : > { %v5490_v26 = vpack.c.bf16 %v2757_v39, %v2752_v37  ;;  %v5276_v42 = vpop.f32.mrb[27].mxu1  ;;  %v4025_v45 = vrot.slane %v2757_v39, 4 }
 0xdfb   : > { %5492 = vmatpush3.bf16.msk.msra.mxu1 %vm6241_vm6, %v5490_v26 }
 0xdfc   : > { %v2762_v44 = vpop.f32.mrb[28].mxu1  ;;  %5497 = vmatprep.subr.bf16.mxu1 %v5725_v41 }
 0xdfd   : > { %v4026_v46 = vrot.slane %v2762_v44, 4  ;;  %v5279_v48 = vpop.f32.mrb[29].mxu1 }
 0xdff   : > { %v4027_v30 = vsel %vm3240_vm3, %v4025_v45, %v4026_v46 }
 0xe00   : > { %v6249_v49 = vpack.c.bf16 %v4026_v46, %v4027_v30  ;;  %v6251_v50 = vpop.f32.mrb[30].mxu1 }
 0xe01   : > { %v5295_v51 = vpop.f32.mrb[31].mxu1 }
 0xe04   : > { %v6253_v6 = vpop.f32.mrb[32].mxu1 }
 0xe05   : > { %v5498_v52 = vpack.c.bf16 %v6253_v6, %v6251_v50  ;;  %v5298_v54 = vpop.f32.mrb[33].mxu1  ;;  %v4202_v58 = vrot.slane %v6253_v6, 4 }
 0xe08   : > { %v2844_v55 = vpop.f32.mrb[26].mxu0  ;;  %v2946_v56 = vpop.f32.mrb[34].mxu1 }
 0xe09   : > { %v4203_v59 = vrot.slane %v2946_v56, 4  ;;  %v5284_v53 = vpop.f32.mrb[27].mxu0  ;;  %v5301_v61 = vpop.f32.mrb[35].mxu1 }
 0xe0b   : > { %v4204_v62 = vsel %vm3240_vm3, %v4202_v58, %v4203_v59 }
 0xe0c   : > { %v6265_v0 = vpack.c.bf16 %v4203_v59, %v4204_v62  ;;  %v2849_v25 = vpop.f32.mrb[28].mxu0  ;;  %v3218_v3 = vpop.f32.mrb[36].mxu1 }
 0xe0d   : > { %v5486_v10 = vpack.c.bf16 %v2849_v25, %v2844_v55  ;;  %v3222_v11 = vmul.f32 0.35355338, %v3218_v3  ;;  %v5287_v19 = vpop.f32.mrb[29].mxu0  ;;  %v5326_v20 = vpop.f32.mrb[37].mxu1  ;;  %v3945_v23 = vrot.slane %v2849_v25, 4 }
 0xe0f   : > { %v3223_v21 = vadd.f32 %v6268_v16, %v3222_v11 }
 0xe10   : > { %v2854_v22 = vpop.f32.mrb[30].mxu0 }
 0xe11   : > { %v3946_v24 = vrot.slane %v2854_v22, 4  ;;  %v5290_v13 = vpop.f32.mrb[31].mxu0  ;;  %v3224_v27 = vsel %vm3127_vm7, %v3223_v21, -inf }
 0xe12   : > { %3225 = vmax.xlane.f32.xlu1 %v3224_v27 }
 0xe13   : > { %v3947_v28 = vsel %vm3240_vm3, %v3945_v23, %v3946_v24 }
 0xe14   : > { %v6273_v47 = vpack.c.bf16 %v3946_v24, %v3947_v28 }
 0xe23   : > { %2950 = vrot.lane.b32.xlu1 %v6138_v60, %s6586_s21 }
 0xe27   : > { %2952 = vrot.lane.b32.xlu1 %v6142_v63, %s6586_s21 }
 0xe2b   : > { %5604 = vrot.lane.b32.xlu1 %v6164_v12, %s6587_s19 }
 0xe9f   : > { %v3226_v31 = vpop.xlane.xlu1 %3225 }
 0xea0   : > { %v3227_v32 = vsub.f32 %v3223_v21, %v3226_v31 }
 0xea2   : > { %v3228_v7 = vmul.f32 1.442695, %v3227_v32 }
 0xea3   : > { %v2951_v33 = vpop.permute.xlu1 %2950 }
 0xea4   : > { %5664 = vpow2.f32 %v3228_v7  ;;  %5305 = vmatmul.mubr.msk.f32.vlgmr.msra.gmra.mrb[32].mxu0 %vm782_vm1, %v2951_v33 }
 0xea5   : > { %5480 = vmatpush3.bf16.xpose.msk.msra.mxu0 %vm6211_vm4, %v5478_v35  ;;  %5307 = vmatprep.mubr.msk.f32.mxu0 %vm5720_vm2, %v5712_v9 }
 0xea6   : > { %5485 = vmatprep.subr.bf16.mxu0 %v5725_v41 }
 0xea7   : > { %v2953_v36 = vpop.permute.xlu1 %2952 }
 0xea8   : > { %5308 = vmatmul.mubr.msk.f32.gmra.mrb[34].mxu0 %vm782_vm1, %v2953_v36 }
 0xea9   : > { %5310 = vmatprep.mubr.msk.f32.mxu0 %vm5720_vm2, %v5712_v9 }
 0xeab   : > { %v5605_v39 = vpop.permute.xlu1 %5604 }
 0xeac   : > { %v5607_v42 = vunpack.i.h.bf16 %v5605_v39  ;;  %v5606_v44 = vunpack.i.l.bf16 %v5605_v39 }
 0xeae   : > { %v5665_v37 = vpop.eup %5664  ;;  %v5494_v45 = vpack.c.bf16 %v5607_v42, %v5606_v44 }
 0xeaf   : > { %v3230_v60 = vsel %vm3127_vm7, %v5665_v37, 0.0 }
 0xeb0   : > { %3231 = vadd.xlane.f32.xlu0 %v3230_v60 }
 0xec6   : > { %2954 = vrot.lane.b32.xlu0 %v6149_v4, %s6586_s21 }
 0xeca   : > { %3390 = vrot.lane.b32.xlu0 %v6181_v18, %s6587_s19 }
 0xf3d   : > { %v3232_v63 = vpop.xlane.xlu0 %3231 }
 0xf3e   : > { %5666 = vrcp.f32 %v3232_v63 }
 0xf41   : > { %v2955_v38 = vpop.permute.xlu0 %2954 }
 0xf42   : > { %5311 = vmatmul.mubr.msk.f32.gmra.mrb[36].mxu0 %vm782_vm1, %v2955_v38  ;;  %v6342_v38 = vadd.f32 %v6152_v34, %v6108_v43 }
 0xf43   : > { %5317 = vmatprep.mubr.msk.f32.mxu0 %vm5720_vm2, %v5712_v9 }
 0xf45   : > { %v3391_v46 = vpop.permute.xlu0 %3390 }
 0xf46   : > { %5318 = vmatmul.mubr.msk.f32.vlgmr.msra.gmra.mrb[38].mxu0 %vm782_vm1, %v6181_v18 }
 0xf47   : > { %5488 = vmatpush3.bf16.msk.msra.mxu0 %vm6241_vm6, %v5486_v10  ;;  %5331 = vmatprep.mubr.msk.f32.mxu0 %vm5720_vm2, %v5712_v9 }
 0xf48   : > { %v5667_v4 = vpop.eup %5666  ;;  %5493 = vmatprep.subr.bf16.mxu0 %v5725_v41 }
 0xf49   : > { %v3234_v26 = vmul.f32 %v5667_v4, %v5665_v37 }
 0xf4b   : > { %4936 = vst.msk [vmem:[%s6310_s26 + $0x8] sm:$0xff] %vm3127_vm7, %v3234_v26  ;;  %5332 = vmatmul.mubr.msk.f32.vlgmr.msra.gmra.mrb[40].mxu0 %vm3127_vm7, %v3234_v26 }
 0xf4c   : > { %5345 = vmatprep.mubr.msk.f32.mxu0 %vm5720_vm2, %v5712_v9 }
 0xf50   : > { %5496 = vmatpush3.bf16.xpose.msk.msra.mxu0 %vm6211_vm4, %v5494_v45 }
 0xf51   : > { %5505 = vmatprep.subr.bf16.mxu0 %v5725_v41 }
 0xf57   : > { %5346 = vmatmul.mubr.msk.f32.vlgmr.msra.gmra.mrb[42].mxu0 %vm782_vm1, %v3391_v46 }
 0xf58   : > { %5366 = vmatprep.mubr.msk.f32.mxu0 %vm5720_vm2, %v5712_v9 }
 0xf77   : > { %v3028_v48 = vpop.f32.mrb[32].mxu0 }
 0xf78   : > { %v5306_v30 = vpop.f32.mrb[33].mxu0 }
 0xf7b   : > { %v3033_v51 = vpop.f32.mrb[34].mxu0 }
 0xf7c   : > { %v5506_v54 = vpack.c.bf16 %v3033_v51, %v3028_v48  ;;  %v5309_v55 = vpop.f32.mrb[35].mxu0  ;;  %v4380_v58 = vrot.slane %v3033_v51, 4 }
 0xf7e   : > { %5508 = vmatpush3.bf16.msk.msra.mxu0 %vm6241_vm6, %v5506_v54 }
 0xf7f   : > { %5509 = vmatprep.subr.bf16.mxu0 %v5725_v41 }
0x1015   : > { %v3038_v56 = vpop.f32.mrb[36].mxu0 }
0x1016   : > { %v4381_v59 = vrot.slane %v3038_v56, 4  ;;  %v5312_v53 = vpop.f32.mrb[37].mxu0 }
0x1018   : > { %v4382_v61 = vsel %vm3240_vm3, %v4380_v58, %v4381_v59 }
0x1019   : > { %v6328_v62 = vpack.c.bf16 %v4381_v59, %v4382_v61  ;;  %v3115_v25 = vpop.f32.mrb[38].mxu0 }
0x101a   : > { %v3119_v3 = vmul.f32 0.35355338, %v3115_v25  ;;  %v5319_v10 = vpop.f32.mrb[39].mxu0 }
0x101c   : > { %v3126_v11 = vadd.f32 %v6268_v16, %v3119_v3 }
0x101e   : > { %v6331_v19 = vpop.f32.mrb[40].mxu0  ;;  %v3128_v20 = vsel %vm3127_vm7, %v3126_v11, -inf }
0x101f   : > { %3129 = vmax.xlane.f32.xlu1 %v3128_v20  ;;  %v5333_v21 = vpop.f32.mrb[41].mxu0 }
0x102a   : > { %v3468_v22 = vpop.f32.mrb[42].mxu0 }
0x102b   : > { %v3472_v23 = vmul.f32 0.35355338, %v3468_v22  ;;  %v5347_v24 = vpop.f32.mrb[43].mxu0 }
0x102d   : > { %v3473_v13 = vadd.f32 %v6268_v16, %v3472_v23 }
0x102f   : > { %v3474_v27 = vsel %vm3127_vm7, %v3473_v13, -inf }
0x1030   : > { %3475 = vmax.xlane.f32.xlu0 %v3474_v27 }
0x10ac   : > { %v3130_v28 = vpop.xlane.xlu1 %3129 }
0x10ad   : > { %v3131_v31 = vsub.f32 %v3126_v11, %v3130_v28  ;;  %v6388_v11 = vld [vmem:[%s6262_s20 + $0x1] ss:$0 sm:$0xff] }
0x10af   : > { %v3132_v32 = vmul.f32 1.442695, %v3131_v31 }
0x10b1   : > { %5668 = vpow2.f32 %v3132_v32 }
0x10bb   : > { %v5669_v7 = vpop.eup %5668 }
0x10bc   : > { %v3134_v33 = vsel %vm3127_vm7, %v5669_v7, 0.0 }
0x10bd   : > { %v3476_v35 = vpop.xlane.xlu0 %3475  ;;  %3135 = vadd.xlane.f32.xlu0 %v3134_v33 }
0x10be   : > { %v3477_v36 = vsub.f32 %v3473_v13, %v3476_v35 }
0x10c0   : > { %v3478_v37 = vmul.f32 1.442695, %v3477_v36 }
0x10c2   : > { %5670 = vpow2.f32 %v3478_v37 }
0x10cc   : > { %v5671_v60 = vpop.eup %5670 }
0x10cd   : > { %v3480_v63 = vsel %vm3127_vm7, %v5671_v60, 0.0 }
0x10ce   : > { %3481 = vadd.xlane.f32.xlu1 %v3480_v63 }
0x10d3   : > { %5609 = vrot.lane.b32.xlu0 %v6164_v12, %s6588_s25 }
0x10d7   : > { %3847 = vrot.lane.b32.xlu0 %v6342_v38, %s5715_s29 }
0x10df   : > { %3564 = vrot.lane.b32.xlu1 %v6181_v18, %s6588_s25 }
0x10e3   : > { %5614 = vrot.lane.b32.xlu1 %v6172_v15, %s5715_s29 }
0x114a   : > { %v3136_v39 = vpop.xlane.xlu0 %3135 }
0x114b   : > { %5672 = vrcp.f32 %v3136_v39 }
0x114e   : > { %v5610_v34 = vpop.permute.xlu0 %5609 }
0x114f   : > { %v5612_v18 = vunpack.i.h.bf16 %v5610_v34  ;;  %v5611_v42 = vunpack.i.l.bf16 %v5610_v34 }
0x1151   : > { %v5502_v46 = vpack.c.bf16 %v5612_v18, %v5611_v42 }
0x1152   : > { %v3848_v30 = vpop.permute.xlu0 %3847 }
0x1155   : > { %v5673_v4 = vpop.eup %5672 }
0x1156   : > { %v3138_v26 = vmul.f32 %v5673_v4, %v5669_v7 }
0x1158   : > { %3139 = vst.msk [vmem:[%s6310_s26] sm:$0xff] %vm3127_vm7, %v3138_v26  ;;  %5339 = vmatmul.mubr.msk.f32.vlgmr.msra.gmra.mrb[38].mxu1 %vm3127_vm7, %v3138_v26 }
0x1159   : > { %5500 = vmatpush3.bf16.msk.msra.mxu1 %vm6241_vm6, %v5498_v52  ;;  %5352 = vmatprep.mubr.msk.f32.mxu1 %vm5720_vm2, %v5712_v9 }
0x115a   : > { %5501 = vmatprep.subr.bf16.mxu1 %v5725_v41 }
0x115b   : > { %v3482_v43 = vpop.xlane.xlu1 %3481 }
0x115c   : > { %5674 = vrcp.f32 %v3482_v43 }
0x115f   : > { %v3565_v12 = vpop.permute.xlu1 %3564 }
0x1163   : > { %v5615_v50 = vpop.permute.xlu1 %5614 }
0x1164   : > { %v5617_v6 = vunpack.i.h.bf16 %v5615_v50  ;;  %v5616_v52 = vunpack.i.l.bf16 %v5615_v50 }
0x1166   : > { %v5675_v44 = vpop.eup %5674  ;;  %v5514_v48 = vpack.c.bf16 %v5617_v6, %v5616_v52 }
0x1167   : > { %v3484_v45 = vmul.f32 %v5675_v44, %v5671_v60 }
0x1169   : > { %4944 = vst.msk [vmem:[%s6310_s26 + $0x10] sm:$0xff] %vm3127_vm7, %v3484_v45  ;;  %5353 = vmatmul.mubr.msk.f32.vlgmr.msra.gmra.mrb[40].mxu1 %vm3127_vm7, %v3484_v45 }
0x116a   : > { %5504 = vmatpush3.bf16.xpose.msk.msra.mxu1 %vm6211_vm4, %v5502_v46  ;;  %5359 = vmatprep.mubr.msk.f32.mxu1 %vm5720_vm2, %v5712_v9 }
0x116b   : > { %5513 = vmatprep.subr.bf16.mxu1 %v5725_v41 }
0x1171   : > { %5360 = vmatmul.mubr.msk.f32.vlgmr.msra.gmra.mrb[42].mxu1 %vm782_vm1, %v3565_v12 }
0x1172   : > { %5516 = vmatpush3.bf16.xpose.msk.msra.mxu1 %vm6211_vm4, %v5514_v48  ;;  %5380 = vmatprep.mubr.msk.f32.mxu1 %vm5720_vm2, %v5712_v9 }
0x1173   : > { %5521 = vmatprep.subr.bf16.mxu1 %v5725_v41 }
0x1179   : > { %5381 = vmatmul.mubr.msk.f32.vlgmr.msra.gmra.mrb[44].mxu1 %vm782_vm1, %v3848_v30 }
0x117a   : > { %5524 = vmatpush3.bf16.msk.msra.mxu1 %vm6241_vm6, %v6249_v49  ;;  %5394 = vmatprep.mubr.msk.f32.mxu1 %vm5720_vm2, %v5712_v9 }
0x117b   : > { %5529 = vmatprep.subr.bf16.mxu1 %v5725_v41 }
0x122b   : > { %v3386_v51 = vpop.f32.mrb[38].mxu1 }
0x122c   : > { %v3387_v54 = vadd.f32 %v3386_v51, %v6331_v19  ;;  %v5340_v55 = vpop.f32.mrb[39].mxu1 }
0x123c   : > { %v3559_v56 = vpop.f32.mrb[40].mxu1 }
0x123d   : > { %v6383_v58 = vadd.f32 %v3559_v56, %v3387_v54  ;;  %v5354_v59 = vpop.f32.mrb[41].mxu1 }
0x1244   : > { %v3642_v53 = vpop.f32.mrb[42].mxu1 }
0x1245   : > { %v3646_v61 = vmul.f32 0.35355338, %v3642_v53  ;;  %v5361_v25 = vpop.f32.mrb[43].mxu1 }
0x1247   : > { %v3647_v3 = vadd.f32 %v6268_v16, %v3646_v61 }
0x1249   : > { %v3648_v49 = vsel %vm3127_vm7, %v3647_v3, -inf }
0x124a   : > { %3649 = vmax.xlane.f32.xlu1 %v3648_v49 }
0x124c   : > { %v3925_v10 = vpop.f32.mrb[44].mxu1 }
0x124d   : > { %v3929_v20 = vmul.f32 0.35355338, %v3925_v10  ;;  %v5382_v21 = vpop.f32.mrb[45].mxu1 }
0x124f   : > { %v3930_v19 = vadd.f32 %v6388_v11, %v3929_v20 }
0x1251   : > { %v3931_v22 = vsel %vm3127_vm7, %v3930_v19, -inf }
0x1252   : > { %3932 = vmax.xlane.f32.xlu0 %v3931_v22 }
0x12d7   : > { %v3650_v23 = vpop.xlane.xlu1 %3649 }
0x12d8   : > { %v3651_v24 = vsub.f32 %v3647_v3, %v3650_v23 }
0x12da   : > { %v3652_v13 = vmul.f32 1.442695, %v3651_v24 }
0x12dc   : > { %5676 = vpow2.f32 %v3652_v13 }
0x12df   : > { %v3933_v27 = vpop.xlane.xlu0 %3932 }
0x12e0   : > { %v3934_v28 = vsub.f32 %v3930_v19, %v3933_v27 }
0x12e2   : > { %v3935_v16 = vmul.f32 1.442695, %v3934_v28 }
0x12e4   : > { %5678 = vpow2.f32 %v3935_v16 }
0x12e6   : > { %v5677_v31 = vpop.eup %5676 }
0x12e7   : > { %v3654_v32 = vsel %vm3127_vm7, %v5677_v31, 0.0 }
0x12e8   : > { %3655 = vadd.xlane.f32.xlu0 %v3654_v32 }
0x12ee   : > { %v5679_v7 = vpop.eup %5678 }
0x12ef   : > { %v3937_v33 = vsel %vm3127_vm7, %v5679_v7, 0.0 }
0x12f0   : > { %3938 = vadd.xlane.f32.xlu1 %v3937_v33 }
0x12fe   : > { %5619 = vrot.lane.b32.xlu0 %v6172_v15, %s6587_s19 }
0x1301   : > { %4104 = vrot.lane.b32.xlu1 %v6342_v38, %s6587_s19 }
0x1375   : > { %v3656_v35 = vpop.xlane.xlu0 %3655 }
0x1376   : > { %5680 = vrcp.f32 %v3656_v35 }
0x1379   : > { %v5620_v4 = vpop.permute.xlu0 %5619 }
0x137a   : > { %v5622_v5 = vunpack.i.h.bf16 %v5620_v4  ;;  %v5621_v14 = vunpack.i.l.bf16 %v5620_v4 }
0x137d   : > { %v3939_v36 = vpop.xlane.xlu1 %3938 }
0x137e   : > { %5682 = vrcp.f32 %v3939_v36 }
0x1380   : > { %v5681_v37 = vpop.eup %5680 }
0x1381   : > { %v3658_v60 = vmul.f32 %v5681_v37, %v5677_v31  ;;  %v4105_v26 = vpop.permute.xlu1 %4104 }
0x1383   : > { %4950 = vst.msk [vmem:[%s6310_s26 + $0x18] sm:$0xff] %vm3127_vm7, %v3658_v60  ;;  %5367 = vmatmul.mubr.msk.f32.vlgmr.msra.gmra.mrb[44].mxu0 %vm3127_vm7, %v3658_v60 }
0x1384   : > { %5512 = vmatpush3.bf16.xpose.msk.msra.mxu0 %vm6211_vm4, %v5510_v17  ;;  %5373 = vmatprep.mubr.msk.f32.mxu0 %vm5720_vm2, %v5712_v9  ;;  %v5526_v17 = vpack.c.bf16 %v5622_v5, %v5621_v14 }
0x1385   : > { %5517 = vmatprep.subr.bf16.mxu0 %v5725_v41 }
0x1388   : > { %v5683_v63 = vpop.eup %5682 }
0x1389   : > { %v3941_v39 = vmul.f32 %v5683_v63, %v5679_v7 }
0x138b   : > { %4962 = vst.msk [vmem:[%s6310_s26 + $0x28] sm:$0xff] %vm3127_vm7, %v3941_v39  ;;  %5374 = vmatmul.mubr.msk.f32.vlgmr.msra.gmra.mrb[46].mxu0 %vm782_vm1, %v6342_v38 }
0x138c   : > { %5520 = vmatpush3.bf16.msk.msra.mxu0 %vm6241_vm6, %v6273_v47  ;;  %5387 = vmatprep.mubr.msk.f32.mxu0 %vm5720_vm2, %v5712_v9  ;;  %v6434_v47 = vld [vmem:[%s6563_s12] ss:$0 sm:$0xff] }
0x138d   : > { %5525 = vmatprep.subr.bf16.mxu0 %v5725_v41 }
0x138f   : > { %5388 = vmatmul.mubr.msk.f32.vlgmr.msra.gmra.mrb[48].mxu0 %vm3127_vm7, %v3941_v39 }
0x1390   : > { %5401 = vmatprep.mubr.msk.f32.mxu0 %vm5720_vm2, %v5712_v9 }
0x1395   : > { %5528 = vmatpush3.bf16.xpose.msk.msra.mxu0 %vm6211_vm4, %v5526_v17 }
0x1396   : > { %5537 = vmatprep.subr.bf16.mxu0 %v5725_v41 }
0x139c   : > { %5402 = vmatmul.mubr.msk.f32.vlgmr.msra.gmra.mrb[50].mxu0 %vm782_vm1, %v4105_v26 }
0x139d   : > { %5540 = vmatpush3.bf16.msk.msra.mxu0 %vm6241_vm6, %v6328_v62  ;;  %5422 = vmatprep.mubr.msk.f32.mxu0 %vm5720_vm2, %v5712_v9 }
0x1456   : > { %v3733_v43 = vpop.f32.mrb[44].mxu0 }
0x1457   : > { %v3737_v34 = vadd.f32 %v3733_v43, %v6383_v58  ;;  %v5368_v12 = vpop.f32.mrb[45].mxu0 }
0x1459   : > { %v3744_v18 = vadd.f32 %v6434_v47, %v3737_v34 }
0x145b   : > { %3745 = vst.msk [vmem:[#allocation2] sm:$0xff] %vm694_vm0, %v3744_v18 }
0x145e   : > { %v3822_v42 = vpop.f32.mrb[46].mxu0 }
0x145f   : > { %v3826_v44 = vmul.f32 0.35355338, %v3822_v42  ;;  %v5375_v45 = vpop.f32.mrb[47].mxu0 }
0x1461   : > { %v3833_v62 = vadd.f32 %v6388_v11, %v3826_v44 }
0x1462   : > { %v4020_v46 = vpop.f32.mrb[48].mxu0  ;;  %v4462_v63 = vld [vmem:[#allocation2] sm:$0xff] }
0x1463   : > { %v5389_v50 = vpop.f32.mrb[49].mxu0  ;;  %v3834_v6 = vsel %vm3127_vm7, %v3833_v62, -inf  ;;  %v4464_v5 = vadd.f32 %v4462_v63, %v6078_v8 }
0x1464   : > { %3835 = vmax.xlane.f32.xlu1 %v3834_v6 }
0x1465   : > { %v4466_v14 = vsel %vm694_vm0, %v4464_v5, 0.0 }
0x146f   : > { %v4182_v52 = vpop.f32.mrb[50].mxu0 }
0x1470   : > { %v4186_v48 = vmul.f32 0.35355338, %v4182_v52  ;;  %v5403_v30 = vpop.f32.mrb[51].mxu0 }
0x1472   : > { %v4187_v51 = vadd.f32 %v6388_v11, %v4186_v48 }
0x1474   : > { %v4188_v54 = vsel %vm3127_vm7, %v4187_v51, -inf }
0x1475   : > { %4189 = vmax.xlane.f32.xlu0 %v4188_v54 }
0x14f1   : > { %v3836_v55 = vpop.xlane.xlu1 %3835 }
0x14f2   : > { %v3837_v56 = vsub.f32 %v3833_v62, %v3836_v55  ;;  %v666_v62 = vld [vmem:[%s6555_s4 + $0x2] sm:$0x3] }
0x14f3   : > { %v4501_v52 = vrot.slane %v666_v62, %v6068_v2 }
0x14f4   : > { %v3838_v58 = vmul.f32 1.442695, %v3837_v56 }
0x14f6   : > { %5684 = vpow2.f32 %v3838_v58 }
0x1500   : > { %v5685_v59 = vpop.eup %5684 }
0x1501   : > { %v3840_v53 = vsel %vm3127_vm7, %v5685_v59, 0.0 }
0x1502   : > { %3841 = vadd.xlane.f32.xlu0 %v3840_v53  ;;  %v4190_v61 = vpop.xlane.xlu0 %4189 }
0x1503   : > { %v4191_v25 = vsub.f32 %v4187_v51, %v4190_v61 }
0x1505   : > { %v4192_v3 = vmul.f32 1.442695, %v4191_v25 }
0x1507   : > { %5686 = vpow2.f32 %v4192_v3 }
0x1511   : > { %v5687_v49 = vpop.eup %5686 }
0x1512   : > { %v4194_v10 = vsel %vm3127_vm7, %v5687_v49, 0.0 }
0x1513   : > { %4195 = vadd.xlane.f32.xlu1 %v4194_v10 }
0x1518   : > { %5624 = vrot.lane.b32.xlu0 %v6172_v15, %s6588_s25 }
0x1524   : > { %4282 = vrot.lane.b32.xlu1 %v6342_v38, %s6588_s25 }
0x158f   : > { %v3842_v20 = vpop.xlane.xlu0 %3841 }
0x1590   : > { %5688 = vrcp.f32 %v3842_v20  ;;  %v4504_v20 = vld [vmem:[%s6564_s13] sm:$0xff] }
0x1593   : > { %v5625_v38 = vpop.permute.xlu0 %5624 }
0x1594   : > { %v5627_v22 = vunpack.i.h.bf16 %v5625_v38  ;;  %v5626_v23 = vunpack.i.l.bf16 %v5625_v38  ;;  %v4598_v38 = vld [vmem:[%s6566_s15] sm:$0xff] }
0x1596   : > { %v5534_v27 = vpack.c.bf16 %v5627_v22, %v5626_v23  ;;  %v4599_v22 = vld [vmem:[%s6566_s15 + $0x8] sm:$0xff]  ;;  %v4600_v23 = vld [vmem:[%s6566_s15 + $0x10] sm:$0xff] }
0x159a   : > { %v5689_v21 = vpop.eup %5688 }
0x159b   : > { %v3844_v19 = vmul.f32 %v5689_v21, %v5685_v59 }
0x159d   : > { %4958 = vst.msk [vmem:[%s6310_s26 + $0x20] sm:$0xff] %vm3127_vm7, %v3844_v19  ;;  %5395 = vmatmul.mubr.msk.f32.vlgmr.msra.gmra.mrb[46].mxu1 %vm3127_vm7, %v3844_v19  ;;  %v4507_v19 = vld [vmem:[%s6564_s13 + $0x18] sm:$0xff] }
0x159e   : > { %5532 = vmatpush3.bf16.msk.msra.mxu1 %vm6241_vm6, %v6265_v0  ;;  %5408 = vmatprep.mubr.msk.f32.mxu1 %vm5720_vm2, %v5712_v9 }
0x159f   : > { %5533 = vmatprep.subr.bf16.mxu1 %v5725_v41 }
0x15a0   : > { %v4196_v15 = vpop.xlane.xlu1 %4195 }
0x15a1   : > { %5690 = vrcp.f32 %v4196_v15 }
0x15a4   : > { %v4283_v40 = vpop.permute.xlu1 %4282 }
0x15ab   : > { %v5691_v24 = vpop.eup %5690 }
0x15ac   : > { %v4198_v13 = vmul.f32 %v5691_v24, %v5687_v49  ;;  %v5549_v24 = vpack.c.bf16 %v4599_v22, %v4598_v38 }
0x15ae   : > { %4970 = vst.msk [vmem:[%s6310_s26 + $0x30] sm:$0xff] %vm3127_vm7, %v4198_v13  ;;  %5409 = vmatmul.mubr.msk.f32.vlgmr.msra.gmra.mrb[48].mxu1 %vm3127_vm7, %v4198_v13  ;;  %v4601_v13 = vld [vmem:[%s6566_s15 + $0x18] sm:$0xff] }
0x15af   : > { %5536 = vmatpush3.bf16.xpose.msk.msra.mxu1 %vm6211_vm4, %v5534_v27  ;;  %5415 = vmatprep.mubr.msk.f32.mxu1 %vm5720_vm2, %v5712_v9  ;;  %v5553_v27 = vpack.c.bf16 %v4601_v13, %v4600_v23 }
0x15b0   : > { %5550 = vmatprep.subr.bf16.mxu1 %v5549_v24 }
0x15b6   : > { %5416 = vmatmul.mubr.msk.f32.vlgmr.msra.gmra.mrb[50].mxu1 %vm782_vm1, %v4283_v40  ;;  %v4602_v40 = vld [vmem:[%s6566_s15 + $0x20] sm:$0xff] }
0x15b7   : > { %5552 = vmatpush3.bf16.msra.mxu1 %v5549_v24 }
0x15b8   : > { %5554 = vmatprep.subr.bf16.mxu1 %v5553_v27 }
0x15bb   : > { %5556 = vmatpush3.bf16.msra.mxu1 %v5553_v27 }
0x1670   : > { %v4100_v41 = vpop.f32.mrb[46].mxu1 }
0x1671   : > { %v4101_v0 = vadd.f32 %v4100_v41, %v4020_v46  ;;  %v5396_v28 = vpop.f32.mrb[47].mxu1  ;;  %v4495_v46 = vrot.slane %v666_v62, %v6063_v1  ;;  %v4603_v41 = vld [vmem:[%s6566_s15 + $0x28] sm:$0xff] }
0x1681   : > { %v4277_v16 = vpop.f32.mrb[48].mxu1 }
0x1682   : > { %v4281_v31 = vadd.f32 %v4277_v16, %v4101_v0  ;;  %v5410_v32 = vpop.f32.mrb[49].mxu1  ;;  %v5557_v0 = vpack.c.bf16 %v4603_v41, %v4602_v40 }
0x1684   : > { %5558 = vmatprep.subr.bf16.mxu1 %v5557_v0 }
0x1685   : > { %5560 = vmatpush3.bf16.msra.mxu1 %v5557_v0 }
0x1689   : > { %v4360_v7 = vpop.f32.mrb[50].mxu1 }
0x168a   : > { %v4364_v33 = vmul.f32 0.35355338, %v4360_v7  ;;  %v5417_v35 = vpop.f32.mrb[51].mxu1 }
0x168c   : > { %v4365_v36 = vadd.f32 %v6388_v11, %v4364_v33 }
0x168e   : > { %v4366_v29 = vsel %vm3127_vm7, %v4365_v36, -inf }
0x168f   : > { %4367 = vmax.xlane.f32.xlu1 %v4366_v29  ;;  %v4605_v29 = vld [vmem:[%s6566_s15 + $0x38] sm:$0xff] }
0x171c   : > { %v4368_v37 = vpop.xlane.xlu1 %4367 }
0x171d   : > { %v4369_v60 = vsub.f32 %v4365_v36, %v4368_v37  ;;  %v4604_v36 = vld [vmem:[%s6566_s15 + $0x30] sm:$0xff] }
0x171e   : > { %v5561_v37 = vpack.c.bf16 %v4605_v29, %v4604_v36 }
0x171f   : > { %v4370_v9 = vmul.f32 1.442695, %v4369_v60  ;;  %v4979_v60 = vld [vmem:[%s6565_s14] ss:$0 sm:$0xff] }
0x1720   : > { %5562 = vmatprep.subr.bf16.mxu1 %v5561_v37 }
0x1721   : > { %5692 = vpow2.f32 %v4370_v9  ;;  %5564 = vmatpush3.bf16.msra.mxu1 %v5561_v37 }
0x172b   : > { %v5693_v39 = vpop.eup %5692 }
0x172c   : > { %v4372_v4 = vsel %vm3127_vm7, %v5693_v39, 0.0 }
0x172d   : > { %4373 = vadd.xlane.f32.xlu0 %v4372_v4 }
0x1731   : > { %4467 = vadd.xlane.f32.xlu0 %v4466_v14 }
0x17ba   : > { %v4374_v17 = vpop.xlane.xlu0 %4373 }
0x17bb   : > { %5694 = vrcp.f32 %v4374_v17  ;;  %v4982_v17 = vld [vmem:[%s6567_s16] ss:$0 sm:$0xff] }
0x17be   : > { %v4468_v11 = vpop.xlane.xlu0 %4467 }
0x17bf   : > { %v4472_v26 = vmul.f32 0.03125, %v4468_v11 }
0x17c1   : > { %v4474_v43 = vsub.f32 %v4464_v5, %v4472_v26 }
0x17c3   : > { %v4476_v34 = vmul.f32 %v4474_v43, %v4474_v43 }
0x17c5   : > { %v5695_v12 = vpop.eup %5694  ;;  %v4478_v18 = vsel %vm694_vm0, %v4476_v34, 0.0 }
0x17c6   : > { %v4376_v42 = vmul.f32 %v5695_v12, %v5693_v39  ;;  %4479 = vadd.xlane.f32.xlu0 %v4478_v18 }
0x17c8   : > { %4976 = vst.msk [vmem:[%s6310_s26 + $0x38] sm:$0xff] %vm3127_vm7, %v4376_v42  ;;  %5423 = vmatmul.mubr.msk.f32.vlgmr.msra.gmra.mrb[52].mxu0 %vm3127_vm7, %v4376_v42 }
0x1853   : > { %v4480_v8 = vpop.xlane.xlu0 %4479 }
0x1854   : > { %v4484_v44 = vmul.f32 0.03125, %v4480_v8 }
0x1856   : > { %v4486_v45 = vadd.f32 1e-05, %v4484_v44 }
0x1858   : > { %5696 = vrsqrt.f32 %v4486_v45 }
0x1862   : > { %v5697_v50 = vpop.eup %5696 }
0x1863   : > { %v4490_v6 = vmul.f32 %v5697_v50, %v4474_v43 }
0x1865   : > { %v4496_v48 = vmul.f32 %v4495_v46, %v4490_v6 }
0x1867   : > { %v6480_v30 = vadd.f32 %v4501_v52, %v4496_v48 }
0x1869   : > { %5433 = vmatprep.mubr.msk.f32.mxu0 %vm694_vm0, %v6480_v30 }
0x189b   : > { %v4455_v51 = vpop.f32.mrb[52].mxu0 }
0x189c   : > { %v4459_v54 = vadd.f32 %v4455_v51, %v4281_v31  ;;  %v5424_v55 = vpop.f32.mrb[53].mxu0 }
0x189e   : > { %v4460_v56 = vadd.f32 %v6434_v47, %v4459_v54  ;;  %v4505_v47 = vld [vmem:[%s6564_s13 + $0x8] sm:$0xff] }
0x189f   : > { %v5541_v21 = vpack.c.bf16 %v4505_v47, %v4504_v20 }
0x18a0   : > { %4461 = vst.msk [vmem:[#allocation2 + $0x8] sm:$0xff] %vm694_vm0, %v4460_v56 }
0x18a1   : > { %5542 = vmatprep.subr.bf16.mxu0 %v5541_v21 }
0x18a2   : > { %5544 = vmatpush3.bf16.msra.mxu0 %v5541_v21 }
0x18a7   : > { %v4463_v58 = vld [vmem:[#allocation2 + $0x8] sm:$0xff] }
0x18a8   : > { %v4465_v59 = vadd.f32 %v4463_v58, %v6126_v57  ;;  %v4506_v57 = vld [vmem:[%s6564_s13 + $0x10] sm:$0xff] }
0x18a9   : > { %v5545_v15 = vpack.c.bf16 %v4507_v19, %v4506_v57 }
0x18aa   : > { %v4469_v53 = vsel %vm694_vm0, %v4465_v59, 0.0 }
0x18ab   : > { %4470 = vadd.xlane.f32.xlu1 %v4469_v53  ;;  %5546 = vmatprep.subr.bf16.mxu0 %v5545_v15 }
0x18ac   : > { %5548 = vmatpush3.bf16.msra.mxu0 %v5545_v15 }
0x1938   : > { %v4471_v61 = vpop.xlane.xlu1 %4470 }
0x1939   : > { %v4473_v25 = vmul.f32 0.03125, %v4471_v61  ;;  %v667_v61 = vld [vmem:[%s6555_s4 + $0x4] sm:$0x3] }
0x193a   : > { %v4732_v20 = vrot.slane %v667_v61, %v6068_v2 }
0x193b   : > { %v4475_v3 = vsub.f32 %v4465_v59, %v4473_v25  ;;  %v4726_v25 = vrot.slane %v667_v61, %v6063_v1 }
0x193d   : > { %v4477_v49 = vmul.f32 %v4475_v3, %v4475_v3 }
0x193f   : > { %v4481_v10 = vsel %vm694_vm0, %v4477_v49, 0.0 }
0x1940   : > { %4482 = vadd.xlane.f32.xlu1 %v4481_v10 }
0x19cd   : > { %v4483_v28 = vpop.xlane.xlu1 %4482 }
0x19ce   : > { %v4485_v16 = vmul.f32 0.03125, %v4483_v28 }
0x19d0   : > { %v4487_v31 = vadd.f32 1e-05, %v4485_v16 }
0x19d2   : > { %5698 = vrsqrt.f32 %v4487_v31 }
0x19dc   : > { %v5699_v32 = vpop.eup %5698 }
0x19dd   : > { %v4491_v7 = vmul.f32 %v5699_v32, %v4475_v3 }
0x19df   : > { %v4497_v33 = vmul.f32 %v4495_v46, %v4491_v7 }
0x19e1   : > { %v4503_v35 = vadd.f32 %v4501_v52, %v4497_v33 }
0x19e3   : > { %5434 = vmatmul.mubr.msk.f32.vlgmr.msra.gmra.mrb[54].mxu0 %vm694_vm0, %v4503_v35 }
0x1ab6   : > { %v5435_v9 = vpop.f32.mrb[54].mxu0 }
0x1ab7   : > { %v4593_v63 = vadd.f32 %v5435_v9, %v4979_v60  ;;  %v4587_v39 = vpop.f32.mrb[55].mxu0 }
0x1ab8   : > { %v4588_v4 = vadd.f32 %v4979_v60, %v4587_v39 }
0x1ab9   : > { %v4597_v14 = vmax.f32 %v4593_v63, 0.0 }
0x1aba   : > { %v4596_v5 = vmax.f32 %v4588_v4, 0.0 }
0x1abc   : > { %5452 = vmatprep.mubr.msk.f32.mxu1 %vm4613_vm8, %v4596_v5 }
0x1abd   : > { %5453 = vmatmul.mubr.msk.f32.vlgmr.msra.gmra.mrb[52].mxu1 %vm4613_vm8, %v4597_v14 }
0x1b90   : > { %v5454_v11 = vpop.f32.mrb[52].mxu1 }
0x1b91   : > { %v4692_v26 = vadd.f32 %v5454_v11, %v4982_v17  ;;  %v4686_v43 = vpop.f32.mrb[53].mxu1 }
0x1b92   : > { %v4687_v34 = vadd.f32 %v4982_v17, %v4686_v43 }
0x1b93   : > { %v4696_v12 = vadd.f32 %v4692_v26, %v4503_v35 }
0x1b94   : > { %v4695_v18 = vadd.f32 %v4687_v34, %v6480_v30 }
0x1b95   : > { %v4700_v42 = vsel %vm694_vm0, %v4696_v12, 0.0 }
0x1b96   : > { %4701 = vadd.xlane.f32.xlu1 %v4700_v42  ;;  %v4697_v8 = vsel %vm694_vm0, %v4695_v18, 0.0 }
0x1b97   : > { %4698 = vadd.xlane.f32.xlu0 %v4697_v8 }
0x1c23   : > { %v4702_v44 = vpop.xlane.xlu1 %4701 }
0x1c24   : > { %v4704_v45 = vmul.f32 0.03125, %v4702_v44  ;;  %v4699_v62 = vpop.xlane.xlu0 %4698 }
0x1c25   : > { %v4703_v46 = vmul.f32 0.03125, %v4699_v62 }
0x1c26   : > { %v4706_v50 = vsub.f32 %v4696_v12, %v4704_v45 }
0x1c27   : > { %v4705_v6 = vsub.f32 %v4695_v18, %v4703_v46 }
0x1c28   : > { %v4708_v52 = vmul.f32 %v4706_v50, %v4706_v50 }
0x1c29   : > { %v4707_v48 = vmul.f32 %v4705_v6, %v4705_v6 }
0x1c2a   : > { %v4712_v51 = vsel %vm694_vm0, %v4708_v52, 0.0 }
0x1c2b   : > { %4713 = vadd.xlane.f32.xlu1 %v4712_v51  ;;  %v4709_v54 = vsel %vm694_vm0, %v4707_v48, 0.0 }
0x1c2c   : > { %4710 = vadd.xlane.f32.xlu0 %v4709_v54 }
0x1cb8   : > { %v4714_v30 = vpop.xlane.xlu1 %4713 }
0x1cb9   : > { %v4716_v55 = vmul.f32 0.03125, %v4714_v30  ;;  %v4711_v56 = vpop.xlane.xlu0 %4710 }
0x1cba   : > { %v4715_v58 = vmul.f32 0.03125, %v4711_v56 }
0x1cbb   : > { %v4718_v59 = vadd.f32 1e-05, %v4716_v55 }
0x1cbc   : > { %v4717_v53 = vadd.f32 1e-05, %v4715_v58 }
0x1cbd   : > { %5700 = vrsqrt.f32 %v4718_v59 }
0x1cbe   : > { %5702 = vrsqrt.f32 %v4717_v53 }
0x1cc7   : > { %v5701_v3 = vpop.eup %5700 }
0x1cc8   : > { %v5703_v49 = vpop.eup %5702  ;;  %v4722_v10 = vmul.f32 %v5701_v3, %v4706_v50 }
0x1cc9   : > { %v4721_v47 = vmul.f32 %v5703_v49, %v4705_v6 }
0x1cca   : > { %v4728_v21 = vmul.f32 %v4726_v25, %v4722_v10 }
0x1ccb   : > { %v4727_v57 = vmul.f32 %v4726_v25, %v4721_v47 }
0x1ccc   : > { %v4734_v15 = vadd.f32 %v4732_v20, %v4728_v21 }
0x1ccd   : > { %v4733_v19 = vadd.f32 %v4732_v20, %v4727_v57 }
0x1cce   : > { %4736 = vst.msk [vmem:[%s648_s0 + $0x8] sm:$0xff] %vm694_vm0, %v4734_v15 }
0x1ccf   : > { %4735 = vst.msk [vmem:[%s648_s0] sm:$0xff] %vm694_vm0, %v4733_v19 }
0x1cd0 PF: > { %s29_s27 = sadd.s32 1, %s5710_s27  }
0x1cd1   : > { %p26_p6 = scmp.ge.s32.totalorder %s29_s27, 6  }
0x1cd3   :  { %28 = sbr.rel (!%p26_p6) target bundleno = 4 (0x4), region = 146 }

</bundles_post_ra>
